<compile_context>
chip_gen: v5e
topology: v5e:2x2
jax: 0.10.0
libtpu: 0.0.40
codegen_flags: <defaults>
</compile_context>

<pallas_src>
import math
import functools

import jax
import jax.numpy as jnp
from jax import lax
from jax.experimental import pallas as pl
from jax.experimental.pallas import tpu as pltpu

EPS = 1e-6


# ----------------------------- in-kernel helpers -----------------------------

def _layer_norm(x, g, b):
    # matches torchnlp: gamma * (x - mean) / (std_unbiased + eps) + beta
    H = x.shape[-1]
    mean = jnp.mean(x, axis=-1, keepdims=True)
    var = jnp.sum((x - mean) ** 2, axis=-1, keepdims=True) * (1.0 / (H - 1))
    inv = 1.0 / (jnp.sqrt(var) + EPS)
    return g * (x - mean) * inv + b


def _split_heads(t, Bb, Lt, num_heads, dk):
    """[Bb*Lt, nh*dk] -> [nh*Bb, Lt, dk] (lane slices + free leading reshapes)."""
    return jnp.concatenate(
        [t[:, h * dk:(h + 1) * dk].reshape(Bb, Lt, dk) for h in range(num_heads)],
        axis=0)


def _merge_heads(ctx, Bb, Lq, num_heads, dk):
    """[nh*Bb, Lq, dk] -> [Bb*Lq, nh*dk] (leading slices + one lane concat)."""
    return jnp.concatenate(
        [ctx[h * Bb:(h + 1) * Bb].reshape(Bb * Lq, dk) for h in range(num_heads)],
        axis=-1)


def _mha(q, k, v, wo, num_heads, Bb, Lq, Lk, bias):
    """Batched multi-head attention.
    q: [Bb*Lq, H], k/v: [Bb*Lk, H] (f32), wo: [H, H] (bf16, already W_o^T).
    The 1/sqrt(dk) query scale is folded into WQ on the host."""
    H = q.shape[-1]
    dk = H // num_heads

    qh = _split_heads(q, Bb, Lq, num_heads, dk)                       # [A, Lq, dk]
    kh_t = jnp.swapaxes(_split_heads(k, Bb, Lk, num_heads, dk), 1, 2)  # [A, dk, Lk]
    vh = _split_heads(v, Bb, Lk, num_heads, dk)                       # [A, Lk, dk]

    logits = jnp.einsum('aqd,adk->aqk', qh, kh_t,
                        preferred_element_type=jnp.float32)           # [A, Lq, Lk]
    if bias is not None:
        logits = logits + bias                                        # [1, Lq, Lk] bcast
    m = jnp.max(logits, axis=-1, keepdims=True)
    e = jnp.exp(logits - m)
    p = e * pl.reciprocal(jnp.sum(e, axis=-1, keepdims=True), approx=True)
    ctx = jnp.einsum('aqk,akd->aqd', p, vh,
                     preferred_element_type=jnp.float32)              # [A, Lq, dk]

    merged = _merge_heads(ctx, Bb, Lq, num_heads, dk)                 # [Bb*Lq, H]
    return jnp.dot(merged.astype(wo.dtype), wo,
                   preferred_element_type=jnp.float32)


def _causal_conv(x, w_mat, b, K, keep):
    """Causal 1D conv (left pad K-1) as one matmul over K rolled copies.
    x: [M, Cin] f32; w_mat: [K*Cin, Cout] tap-major bf16; b: [1, Cout] f32;
    keep[s]: [M, 1] bool mask (position-in-sequence >= s) for shift s."""
    parts = []
    for k in range(K):
        s = K - 1 - k                        # tap k reads x[t - s]
        if s == 0:
            parts.append(x)
        else:
            rolled = pltpu.roll(x, shift=s, axis=0)        # XLU sublane rotate
            parts.append(jnp.where(keep[s], rolled, 0.0))  # zero wrapped rows
    stacked = jnp.concatenate(parts, axis=-1)              # [M, K*Cin]
    return jnp.dot(stacked.astype(w_mat.dtype), w_mat,
                   preferred_element_type=jnp.float32) + b


# --------------------------------- kernel ------------------------------------

def fused_decoder_kernel(num_heads, conv_k, Bb, L, Le,
                         x_ref, enc_ref, ts_ref, wep_ref, bias_ref, pos_ref,
                         g1_ref, b1_ref, wqkv1_ref, wo1_ref,
                         g2_ref, b2_ref, wq2_ref, wkv2_ref, wo2_ref,
                         g3_ref, b3_ref, cw1_ref, cb1_ref, cw2_ref, cb2_ref,
                         gf_ref, bf_ref,
                         out_ref):
    H = ts_ref.shape[1]
    num_layers = g1_ref.shape[0]

    # --- embedding projection + timing signal (input dropout = identity) ---
    x = jnp.dot(x_ref[0].astype(wep_ref.dtype), wep_ref[...],
                preferred_element_type=jnp.float32) + ts_ref[...]      # [M, H]

    enc = enc_ref[0]                                                   # [Me, H]

    # --- grid-invariant constants (host precomputed), hoisted out of the loop ---
    causal_bias = bias_ref[...][None, :, :]                 # [1, L, L]  (0 / -1e9)
    pos = pos_ref[...]                                      # [M, 1] int32
    conv_keep = {s: pos >= s for s in range(1, conv_k)}     # masks for rolled taps

    for l in range(num_layers):          # static unroll (2 layers); use fori_loop
                                         # + dynamic weight indexing for deep nets
        # --- masked multi-head self attention ---
        xn = _layer_norm(x, g1_ref[l], b1_ref[l])
        qkv = jnp.dot(xn.astype(wqkv1_ref.dtype), wqkv1_ref[l],
                      preferred_element_type=jnp.float32)              # [M, 3H]
        y = _mha(qkv[:, :H], qkv[:, H:2 * H], qkv[:, 2 * H:],
                 wo1_ref[l], num_heads, Bb, L, L, causal_bias)
        x = x + y

        # --- encoder-decoder attention (no mask) ---
        xn = _layer_norm(x, g2_ref[l], b2_ref[l])
        q = jnp.dot(xn.astype(wq2_ref.dtype), wq2_ref[l],
                    preferred_element_type=jnp.float32)                # [M, H]
        kv = jnp.dot(enc.astype(wkv2_ref.dtype), wkv2_ref[l],
                     preferred_element_type=jnp.float32)               # [Me, 2H]
        y = _mha(q, kv[:, :H], kv[:, H:], wo2_ref[l], num_heads, Bb, L, Le, None)
        x = x + y

        # --- positionwise FFN: causal conv -> relu -> causal conv -> relu ---
        # (ReLU after BOTH convs matches the reference module on purpose)
        xn = _layer_norm(x, g3_ref[l], b3_ref[l])
        h = jnp.maximum(_causal_conv(xn, cw1_ref[l], cb1_ref[l], conv_k, conv_keep), 0.0)
        y = jnp.maximum(_causal_conv(h, cw2_ref[l], cb2_ref[l], conv_k, conv_keep), 0.0)
        x = x + y

    out_ref[0] = _layer_norm(x, gf_ref[...], bf_ref[...])


# -------------------------------- wrapper ------------------------------------

def _num_parallel_blocks(batch):
    """2 'parallel' grid steps on dual-TensorCore chips (v7x), else 1 so the
    whole batch is folded into the matmul M dimension of a single step."""
    kind = ""
    try:
        kind = jax.devices()[0].device_kind.lower()
    except Exception:
        pass
    dual_tc = ("v7" in kind) or ("tpu7" in kind) or ("7x" in kind)
    if dual_tc and batch % 2 == 0:
        return 2
    return 1


def fused_forward(x, enc, ts_L, wep_T, layer_packed, g_fin, b_fin,
                  num_heads, conv_k, num_blocks=None):
    B, L, E = x.shape
    _, Le, H = enc.shape
    if num_blocks is None:
        num_blocks = _num_parallel_blocks(B)
    assert B % num_blocks == 0
    Bb = B // num_blocks
    M, Me = Bb * L, Bb * Le

    # Fold batch into matmul rows on the host (no in-kernel relayout needed).
    x_r = x.reshape(num_blocks, M, E)
    enc_r = enc.reshape(num_blocks, Me, H)

    # Grid-invariant host-precomputed constants.
    ts_tiled = jnp.tile(ts_L, (Bb, 1))                                    # [M, H]
    pos = jnp.tile(jnp.arange(L, dtype=jnp.int32), (Bb,))[:, None]        # [M, 1]
    idx = jnp.arange(L, dtype=jnp.int32)
    causal_bias = jnp.where(idx[None, :] > idx[:, None],
                            jnp.float32(-1e9), jnp.float32(0.0))          # [L, L]

    consts = [ts_tiled, wep_T, causal_bias, pos] + list(layer_packed) + [g_fin, b_fin]

    kernel = functools.partial(fused_decoder_kernel, num_heads, conv_k, Bb, L, Le)

    in_specs = [pl.BlockSpec((1, M, E), lambda b: (b, 0, 0)),
                pl.BlockSpec((1, Me, H), lambda b: (b, 0, 0))]
    for c in consts:  # weights / constants: full-array, grid-invariant blocks
        in_specs.append(pl.BlockSpec(c.shape, lambda b, nd=c.ndim: (0,) * nd))

    out = pl.pallas_call(
        kernel,
        out_shape=jax.ShapeDtypeStruct((num_blocks, M, H), jnp.float32),
        grid=(num_blocks,),
        in_specs=in_specs,
        out_specs=pl.BlockSpec((1, M, H), lambda b: (b, 0, 0)),
        compiler_params=pltpu.CompilerParams(
            dimension_semantics=("parallel",),       # feeds both TCs on v7x
        ),
    )(x_r, enc_r, *consts)

    return out.reshape(B, L, H)


# ------------------------------ parameter setup -------------------------------

def gen_timing_signal(length, channels, min_timescale=1.0, max_timescale=1e4):
    position = jnp.arange(length, dtype=jnp.float32)
    num_timescales = channels // 2
    log_inc = math.log(float(max_timescale) / float(min_timescale)) / (num_timescales - 1)
    inv_ts = min_timescale * jnp.exp(
        jnp.arange(num_timescales, dtype=jnp.float32) * -log_inc)
    scaled = position[:, None] * inv_ts[None, :]
    signal = jnp.concatenate([jnp.sin(scaled), jnp.cos(scaled)], axis=1)
    if channels % 2:
        signal = jnp.pad(signal, ((0, 0), (0, 1)))
    return signal.astype(jnp.float32)  # [length, channels]


def make_layer_params(key, H, F, K=3, scale=0.1):
    """Raw PyTorch-layout ([out, in]) params for one decoder layer."""
    ks = jax.random.split(key, 12)
    n = lambda kk, s: jax.random.normal(kk, s, jnp.float32) * scale
    return dict(
        g1=jnp.ones((1, H), jnp.float32), b1=jnp.zeros((1, H), jnp.float32),
        wq1=n(ks[0], (H, H)), wk1=n(ks[1], (H, H)),
        wv1=n(ks[2], (H, H)), wo1=n(ks[3], (H, H)),
        g2=jnp.ones((1, H), jnp.float32), b2=jnp.zeros((1, H), jnp.float32),
        wq2=n(ks[4], (H, H)), wk2=n(ks[5], (H, H)),
        wv2=n(ks[6], (H, H)), wo2=n(ks[7], (H, H)),
        g3=jnp.ones((1, H), jnp.float32), b3=jnp.zeros((1, H), jnp.float32),
        cw1=n(ks[8], (K, F, H)), cb1=n(ks[9], (1, F)),     # causal Conv1d: [K,out,in]
        cw2=n(ks[10], (K, H, F)), cb2=n(ks[11], (1, H)),
    )


def pack_params(layer_dicts, num_heads, K, w_dtype=jnp.bfloat16):
    """Stack per-layer params along a leading layer axis, pre-transpose weights
    to [in, out], fold the 1/sqrt(dk) query scale into WQ, fuse QKV / KV, and
    flatten conv weights to tap-major [K*Cin, Cout]. Matmul weights -> bf16."""
    H = layer_dicts[0]['g1'].shape[1]
    F = layer_dicts[0]['cb1'].shape[1]
    scale_q = (H // num_heads) ** -0.5

    def stack(fn):
        return jnp.stack([fn(p) for p in layer_dicts], axis=0)

    g1 = stack(lambda p: p['g1']); b1 = stack(lambda p: p['b1'])
    wqkv1 = stack(lambda p: jnp.concatenate(
        [p['wq1'] * scale_q, p['wk1'], p['wv1']], axis=0).T.astype(w_dtype))   # [H,3H]
    wo1 = stack(lambda p: p['wo1'].T.astype(w_dtype))                          # [H,H]
    g2 = stack(lambda p: p['g2']); b2 = stack(lambda p: p['b2'])
    wq2 = stack(lambda p: (p['wq2'] * scale_q).T.astype(w_dtype))              # [H,H]
    wkv2 = stack(lambda p: jnp.concatenate(
        [p['wk2'], p['wv2']], axis=0).T.astype(w_dtype))                       # [H,2H]
    wo2 = stack(lambda p: p['wo2'].T.astype(w_dtype))
    g3 = stack(lambda p: p['g3']); b3 = stack(lambda p: p['b3'])
    cw1 = stack(lambda p: jnp.transpose(p['cw1'], (0, 2, 1))
                .reshape(K * H, F).astype(w_dtype))                            # [K*H,F]
    cb1 = stack(lambda p: p['cb1'])
    cw2 = stack(lambda p: jnp.transpose(p['cw2'], (0, 2, 1))
                .reshape(K * F, H).astype(w_dtype))                            # [K*F,H]
    cb2 = stack(lambda p: p['cb2'])
    return [g1, b1, wqkv1, wo1, g2, b2, wq2, wkv2, wo2,
            g3, b3, cw1, cb1, cw2, cb2]


# ----------------------------------- main -------------------------------------

if __name__ == "__main__":
    B, L, Le = 2, 8, 8
    E, H, F = 32, 32, 64
    NUM_HEADS = 4
    NUM_LAYERS = 2
    K = 3
    MAX_LENGTH = 100

    key = jax.random.PRNGKey(0)
    k_x, k_enc, k_ep, *k_layers = jax.random.split(key, 3 + NUM_LAYERS)

    x = jax.random.normal(k_x, (B, L, E), jnp.float32)          # inputs_word_emb
    encoder_output = jax.random.normal(k_enc, (B, Le, H), jnp.float32)

    w_ep = jax.random.normal(k_ep, (H, E), jnp.float32) * 0.1   # embedding_proj (no bias)
    ts = gen_timing_signal(MAX_LENGTH, H)[:L]                   # timing-signal slice

    layer_dicts = [make_layer_params(k, H, F, K) for k in k_layers]
    layer_packed = pack_params(layer_dicts, NUM_HEADS, K)

    g_fin = jnp.ones((1, H), jnp.float32)
    b_fin = jnp.zeros((1, H), jnp.float32)

    out = fused_forward(x, encoder_output, ts, w_ep.T.astype(jnp.bfloat16),
                        layer_packed, g_fin, b_fin, NUM_HEADS, K)
    jax.block_until_ready(out)
    assert out.shape == (B, L, H) and out.dtype == jnp.float32
    assert bool(jnp.all(jnp.isfinite(out)))
    print("KERNEL_OK")
</pallas_src>

<mosaic_0001>
module attributes {stable_mosaic.version = 11 : i64} {
  func.func @fused_decoder_kernel(%arg0: i32, %arg1: memref<1x16x32xf32, #tpu.memory_space<vmem>>, %arg2: memref<1x16x32xf32, #tpu.memory_space<vmem>>, %arg3: memref<16x32xf32, #tpu.memory_space<vmem>>, %arg4: memref<32x32xbf16, #tpu.memory_space<vmem>>, %arg5: memref<8x8xf32, #tpu.memory_space<vmem>>, %arg6: memref<16x1xi32, #tpu.memory_space<vmem>>, %arg7: memref<2x1x32xf32, #tpu.memory_space<vmem>>, %arg8: memref<2x1x32xf32, #tpu.memory_space<vmem>>, %arg9: memref<2x32x96xbf16, #tpu.memory_space<vmem>>, %arg10: memref<2x32x32xbf16, #tpu.memory_space<vmem>>, %arg11: memref<2x1x32xf32, #tpu.memory_space<vmem>>, %arg12: memref<2x1x32xf32, #tpu.memory_space<vmem>>, %arg13: memref<2x32x32xbf16, #tpu.memory_space<vmem>>, %arg14: memref<2x32x64xbf16, #tpu.memory_space<vmem>>, %arg15: memref<2x32x32xbf16, #tpu.memory_space<vmem>>, %arg16: memref<2x1x32xf32, #tpu.memory_space<vmem>>, %arg17: memref<2x1x32xf32, #tpu.memory_space<vmem>>, %arg18: memref<2x96x64xbf16, #tpu.memory_space<vmem>>, %arg19: memref<2x1x64xf32, #tpu.memory_space<vmem>>, %arg20: memref<2x192x32xbf16, #tpu.memory_space<vmem>>, %arg21: memref<2x1x32xf32, #tpu.memory_space<vmem>>, %arg22: memref<1x32xf32, #tpu.memory_space<vmem>>, %arg23: memref<1x32xf32, #tpu.memory_space<vmem>>, %arg24: memref<1x16x32xf32, #tpu.memory_space<vmem>>) attributes {dimension_semantics = [#tpu.dimension_semantics<parallel>], iteration_bounds = array<i64: 1>, scalar_prefetch = 0 : i64, scratch_operands = 0 : i64, tpu.core_type = #tpu.core_type<tc>, window_params = [{transform_indices = @transform_0, window_bounds = array<i64: 1, 16, 32>}, {transform_indices = @transform_1, window_bounds = array<i64: 1, 16, 32>}, {pipeline_mode = #tpu.pipeline_mode<synchronous>, transform_indices = @transform_2, window_bounds = array<i64: 16, 32>}, {pipeline_mode = #tpu.pipeline_mode<synchronous>, transform_indices = @transform_3, window_bounds = array<i64: 32, 32>}, {pipeline_mode = #tpu.pipeline_mode<synchronous>, transform_indices = @transform_4, window_bounds = array<i64: 8, 8>}, {pipeline_mode = #tpu.pipeline_mode<synchronous>, transform_indices = @transform_5, window_bounds = array<i64: 16, 1>}, {pipeline_mode = #tpu.pipeline_mode<synchronous>, transform_indices = @transform_6, window_bounds = array<i64: 2, 1, 32>}, {pipeline_mode = #tpu.pipeline_mode<synchronous>, transform_indices = @transform_7, window_bounds = array<i64: 2, 1, 32>}, {pipeline_mode = #tpu.pipeline_mode<synchronous>, transform_indices = @transform_8, window_bounds = array<i64: 2, 32, 96>}, {pipeline_mode = #tpu.pipeline_mode<synchronous>, transform_indices = @transform_9, window_bounds = array<i64: 2, 32, 32>}, {pipeline_mode = #tpu.pipeline_mode<synchronous>, transform_indices = @transform_10, window_bounds = array<i64: 2, 1, 32>}, {pipeline_mode = #tpu.pipeline_mode<synchronous>, transform_indices = @transform_11, window_bounds = array<i64: 2, 1, 32>}, {pipeline_mode = #tpu.pipeline_mode<synchronous>, transform_indices = @transform_12, window_bounds = array<i64: 2, 32, 32>}, {pipeline_mode = #tpu.pipeline_mode<synchronous>, transform_indices = @transform_13, window_bounds = array<i64: 2, 32, 64>}, {pipeline_mode = #tpu.pipeline_mode<synchronous>, transform_indices = @transform_14, window_bounds = array<i64: 2, 32, 32>}, {pipeline_mode = #tpu.pipeline_mode<synchronous>, transform_indices = @transform_15, window_bounds = array<i64: 2, 1, 32>}, {pipeline_mode = #tpu.pipeline_mode<synchronous>, transform_indices = @transform_16, window_bounds = array<i64: 2, 1, 32>}, {pipeline_mode = #tpu.pipeline_mode<synchronous>, transform_indices = @transform_17, window_bounds = array<i64: 2, 96, 64>}, {pipeline_mode = #tpu.pipeline_mode<synchronous>, transform_indices = @transform_18, window_bounds = array<i64: 2, 1, 64>}, {pipeline_mode = #tpu.pipeline_mode<synchronous>, transform_indices = @transform_19, window_bounds = array<i64: 2, 192, 32>}, {pipeline_mode = #tpu.pipeline_mode<synchronous>, transform_indices = @transform_20, window_bounds = array<i64: 2, 1, 32>}, {pipeline_mode = #tpu.pipeline_mode<synchronous>, transform_indices = @transform_21, window_bounds = array<i64: 1, 32>}, {pipeline_mode = #tpu.pipeline_mode<synchronous>, transform_indices = @transform_22, window_bounds = array<i64: 1, 32>}, {transform_indices = @transform_23, window_bounds = array<i64: 1, 16, 32>}]} {
    %c0 = arith.constant 0 : index
    %c0_0 = arith.constant 0 : index
    %c0_1 = arith.constant 0 : index
    %0 = vector.load %arg1[%c0, %c0_0, %c0_1] : memref<1x16x32xf32, #tpu.memory_space<vmem>>, vector<1x16x32xf32>
    %1 = vector.shape_cast %0 : vector<1x16x32xf32> to vector<16x32xf32>
    %2 = arith.truncf %1 : vector<16x32xf32> to vector<16x32xbf16>
    %c0_2 = arith.constant 0 : index
    %c0_3 = arith.constant 0 : index
    %3 = vector.load %arg4[%c0_2, %c0_3] : memref<32x32xbf16, #tpu.memory_space<vmem>>, vector<32x32xbf16>
    %cst = arith.constant dense<0.000000e+00> : vector<16x32xf32>
    %4 = tpu.matmul %2, %3, %cst {dimension_numbers = #tpu.dot_dimension_numbers<[1], [0], [0], [1], [0, 0, 1, 1], [], []>} : vector<16x32xbf16>, vector<32x32xbf16>, vector<16x32xf32> -> vector<16x32xf32>
    %c0_4 = arith.constant 0 : index
    %c0_5 = arith.constant 0 : index
    %5 = vector.load %arg3[%c0_4, %c0_5] : memref<16x32xf32, #tpu.memory_space<vmem>>, vector<16x32xf32>
    %6 = arith.addf %4, %5 : vector<16x32xf32>
    %c0_6 = arith.constant 0 : index
    %c0_7 = arith.constant 0 : index
    %c0_8 = arith.constant 0 : index
    %7 = vector.load %arg2[%c0_6, %c0_7, %c0_8] : memref<1x16x32xf32, #tpu.memory_space<vmem>>, vector<1x16x32xf32>
    %8 = vector.shape_cast %7 : vector<1x16x32xf32> to vector<16x32xf32>
    %c0_9 = arith.constant 0 : index
    %c0_10 = arith.constant 0 : index
    %9 = vector.load %arg5[%c0_9, %c0_10] : memref<8x8xf32, #tpu.memory_space<vmem>>, vector<8x8xf32>
    %10 = vector.shape_cast %9 : vector<8x8xf32> to vector<1x8x8xf32>
    %c0_11 = arith.constant 0 : index
    %c0_12 = arith.constant 0 : index
    %11 = vector.load %arg6[%c0_11, %c0_12] : memref<16x1xi32, #tpu.memory_space<vmem>>, vector<16x1xi32>
    %c1_i32 = arith.constant 1 : i32
    %12 = vector.broadcast %c1_i32 : i32 to vector<16x1xi32>
    %13 = arith.cmpi sge, %11, %12 : vector<16x1xi32>
    %c2_i32 = arith.constant 2 : i32
    %14 = vector.broadcast %c2_i32 : i32 to vector<16x1xi32>
    %15 = arith.cmpi sge, %11, %14 : vector<16x1xi32>
    %c0_13 = arith.constant 0 : index
    %c0_14 = arith.constant 0 : index
    %c0_15 = arith.constant 0 : index
    %16 = vector.load %arg7[%c0_13, %c0_14, %c0_15] : memref<2x1x32xf32, #tpu.memory_space<vmem>>, vector<1x1x32xf32>
    %17 = vector.shape_cast %16 : vector<1x1x32xf32> to vector<1x32xf32>
    %c0_16 = arith.constant 0 : index
    %c0_17 = arith.constant 0 : index
    %c0_18 = arith.constant 0 : index
    %18 = vector.load %arg8[%c0_16, %c0_17, %c0_18] : memref<2x1x32xf32, #tpu.memory_space<vmem>>, vector<1x1x32xf32>
    %19 = vector.shape_cast %18 : vector<1x1x32xf32> to vector<1x32xf32>
    %cst_19 = arith.constant dense<0.000000e+00> : vector<16xf32>
    %20 = vector.multi_reduction <add>, %6, %cst_19 [1] : vector<16x32xf32> to vector<16xf32>
    %21 = vector.shape_cast %20 : vector<16xf32> to vector<16x1xf32>
    %cst_20 = arith.constant 3.200000e+01 : f32
    %22 = vector.broadcast %cst_20 : f32 to vector<16x1xf32>
    %23 = arith.divf %21, %22 : vector<16x1xf32>
    %24 = vector.broadcast %23 : vector<16x1xf32> to vector<16x32xf32>
    %25 = arith.subf %6, %24 : vector<16x32xf32>
    %26 = arith.mulf %25, %25 : vector<16x32xf32>
    %cst_21 = arith.constant dense<0.000000e+00> : vector<16xf32>
    %27 = vector.multi_reduction <add>, %26, %cst_21 [1] : vector<16x32xf32> to vector<16xf32>
    %28 = vector.shape_cast %27 : vector<16xf32> to vector<16x1xf32>
    %cst_22 = arith.constant 0.0322580636 : f32
    %29 = vector.broadcast %cst_22 : f32 to vector<16x1xf32>
    %30 = arith.mulf %28, %29 : vector<16x1xf32>
    %31 = math.sqrt %30 : vector<16x1xf32>
    %cst_23 = arith.constant 9.99999997E-7 : f32
    %32 = vector.broadcast %cst_23 : f32 to vector<16x1xf32>
    %33 = arith.addf %31, %32 : vector<16x1xf32>
    %cst_24 = arith.constant 1.000000e+00 : f32
    %34 = vector.broadcast %cst_24 : f32 to vector<16x1xf32>
    %35 = arith.divf %34, %33 : vector<16x1xf32>
    %36 = vector.broadcast %23 : vector<16x1xf32> to vector<16x32xf32>
    %37 = arith.subf %6, %36 : vector<16x32xf32>
    %38 = vector.broadcast %17 : vector<1x32xf32> to vector<16x32xf32>
    %39 = arith.mulf %38, %37 : vector<16x32xf32>
    %40 = vector.broadcast %35 : vector<16x1xf32> to vector<16x32xf32>
    %41 = arith.mulf %39, %40 : vector<16x32xf32>
    %42 = vector.broadcast %19 : vector<1x32xf32> to vector<16x32xf32>
    %43 = arith.addf %41, %42 : vector<16x32xf32>
    %44 = arith.truncf %43 : vector<16x32xf32> to vector<16x32xbf16>
    %c0_25 = arith.constant 0 : index
    %c0_26 = arith.constant 0 : index
    %c0_27 = arith.constant 0 : index
    %45 = vector.load %arg9[%c0_25, %c0_26, %c0_27] : memref<2x32x96xbf16, #tpu.memory_space<vmem>>, vector<1x32x96xbf16>
    %46 = vector.shape_cast %45 : vector<1x32x96xbf16> to vector<32x96xbf16>
    %cst_28 = arith.constant dense<0.000000e+00> : vector<16x96xf32>
    %47 = tpu.matmul %44, %46, %cst_28 {dimension_numbers = #tpu.dot_dimension_numbers<[1], [0], [0], [1], [0, 0, 1, 1], [], []>} : vector<16x32xbf16>, vector<32x96xbf16>, vector<16x96xf32> -> vector<16x96xf32>
    %48 = vector.extract_strided_slice %47 {offsets = [0, 0], sizes = [16, 32], strides = [1, 1]} : vector<16x96xf32> to vector<16x32xf32>
    %49 = vector.extract_strided_slice %47 {offsets = [0, 32], sizes = [16, 32], strides = [1, 1]} : vector<16x96xf32> to vector<16x32xf32>
    %50 = vector.extract_strided_slice %47 {offsets = [0, 64], sizes = [16, 32], strides = [1, 1]} : vector<16x96xf32> to vector<16x32xf32>
    %c0_29 = arith.constant 0 : index
    %c0_30 = arith.constant 0 : index
    %c0_31 = arith.constant 0 : index
    %51 = vector.load %arg10[%c0_29, %c0_30, %c0_31] : memref<2x32x32xbf16, #tpu.memory_space<vmem>>, vector<1x32x32xbf16>
    %52 = vector.shape_cast %51 : vector<1x32x32xbf16> to vector<32x32xbf16>
    %53 = vector.extract_strided_slice %48 {offsets = [0, 0], sizes = [16, 8], strides = [1, 1]} : vector<16x32xf32> to vector<16x8xf32>
    %54 = vector.shape_cast %53 : vector<16x8xf32> to vector<2x8x8xf32>
    %55 = vector.extract_strided_slice %48 {offsets = [0, 8], sizes = [16, 8], strides = [1, 1]} : vector<16x32xf32> to vector<16x8xf32>
    %56 = vector.shape_cast %55 : vector<16x8xf32> to vector<2x8x8xf32>
    %57 = vector.extract_strided_slice %48 {offsets = [0, 16], sizes = [16, 8], strides = [1, 1]} : vector<16x32xf32> to vector<16x8xf32>
    %58 = vector.shape_cast %57 : vector<16x8xf32> to vector<2x8x8xf32>
    %59 = vector.extract_strided_slice %48 {offsets = [0, 24], sizes = [16, 8], strides = [1, 1]} : vector<16x32xf32> to vector<16x8xf32>
    %60 = vector.shape_cast %59 : vector<16x8xf32> to vector<2x8x8xf32>
    %61 = tpu.concatenate %54, %56, %58, %60 in 0 : vector<2x8x8xf32>, vector<2x8x8xf32>, vector<2x8x8xf32>, vector<2x8x8xf32> -> vector<8x8x8xf32>
    %62 = vector.extract_strided_slice %49 {offsets = [0, 0], sizes = [16, 8], strides = [1, 1]} : vector<16x32xf32> to vector<16x8xf32>
    %63 = vector.shape_cast %62 : vector<16x8xf32> to vector<2x8x8xf32>
    %64 = vector.extract_strided_slice %49 {offsets = [0, 8], sizes = [16, 8], strides = [1, 1]} : vector<16x32xf32> to vector<16x8xf32>
    %65 = vector.shape_cast %64 : vector<16x8xf32> to vector<2x8x8xf32>
    %66 = vector.extract_strided_slice %49 {offsets = [0, 16], sizes = [16, 8], strides = [1, 1]} : vector<16x32xf32> to vector<16x8xf32>
    %67 = vector.shape_cast %66 : vector<16x8xf32> to vector<2x8x8xf32>
    %68 = vector.extract_strided_slice %49 {offsets = [0, 24], sizes = [16, 8], strides = [1, 1]} : vector<16x32xf32> to vector<16x8xf32>
    %69 = vector.shape_cast %68 : vector<16x8xf32> to vector<2x8x8xf32>
    %70 = tpu.concatenate %63, %65, %67, %69 in 0 : vector<2x8x8xf32>, vector<2x8x8xf32>, vector<2x8x8xf32>, vector<2x8x8xf32> -> vector<8x8x8xf32>
    %71 = tpu.transpose %70, [0, 2, 1] : vector<8x8x8xf32> -> vector<8x8x8xf32>
    %72 = vector.extract_strided_slice %50 {offsets = [0, 0], sizes = [16, 8], strides = [1, 1]} : vector<16x32xf32> to vector<16x8xf32>
    %73 = vector.shape_cast %72 : vector<16x8xf32> to vector<2x8x8xf32>
    %74 = vector.extract_strided_slice %50 {offsets = [0, 8], sizes = [16, 8], strides = [1, 1]} : vector<16x32xf32> to vector<16x8xf32>
    %75 = vector.shape_cast %74 : vector<16x8xf32> to vector<2x8x8xf32>
    %76 = vector.extract_strided_slice %50 {offsets = [0, 16], sizes = [16, 8], strides = [1, 1]} : vector<16x32xf32> to vector<16x8xf32>
    %77 = vector.shape_cast %76 : vector<16x8xf32> to vector<2x8x8xf32>
    %78 = vector.extract_strided_slice %50 {offsets = [0, 24], sizes = [16, 8], strides = [1, 1]} : vector<16x32xf32> to vector<16x8xf32>
    %79 = vector.shape_cast %78 : vector<16x8xf32> to vector<2x8x8xf32>
    %80 = tpu.concatenate %73, %75, %77, %79 in 0 : vector<2x8x8xf32>, vector<2x8x8xf32>, vector<2x8x8xf32>, vector<2x8x8xf32> -> vector<8x8x8xf32>
    "tpu.trace_start"() <{level = 10 : i32, message = "aqd,adk->aqk"}> : () -> ()
    %cst_32 = arith.constant dense<0.000000e+00> : vector<8x8x8xf32>
    %81 = tpu.matmul %61, %71, %cst_32 {dimension_numbers = #tpu.dot_dimension_numbers<[2], [1], [1], [2], [0, 0, 0, 1, 1, 2], [0], [0]>} : vector<8x8x8xf32>, vector<8x8x8xf32>, vector<8x8x8xf32> -> vector<8x8x8xf32>
    "tpu.trace_stop"() : () -> ()
    %82 = vector.broadcast %10 : vector<1x8x8xf32> to vector<8x8x8xf32>
    %83 = arith.addf %81, %82 : vector<8x8x8xf32>
    %cst_33 = arith.constant dense<0xFF800000> : vector<8x8xf32>
    %84 = vector.multi_reduction <maximumf>, %83, %cst_33 [2] : vector<8x8x8xf32> to vector<8x8xf32>
    %85 = vector.shape_cast %84 : vector<8x8xf32> to vector<8x8x1xf32>
    %86 = vector.broadcast %85 : vector<8x8x1xf32> to vector<8x8x8xf32>
    %87 = arith.subf %83, %86 : vector<8x8x8xf32>
    %88 = math.exp %87 : vector<8x8x8xf32>
    %cst_34 = arith.constant dense<0.000000e+00> : vector<8x8xf32>
    %89 = vector.multi_reduction <add>, %88, %cst_34 [2] : vector<8x8x8xf32> to vector<8x8xf32>
    %90 = vector.shape_cast %89 : vector<8x8xf32> to vector<8x8x1xf32>
    %91 = tpu.reciprocal %90 {approx = true} : vector<8x8x1xf32> -> vector<8x8x1xf32>
    %92 = vector.broadcast %91 : vector<8x8x1xf32> to vector<8x8x8xf32>
    %93 = arith.mulf %88, %92 : vector<8x8x8xf32>
    "tpu.trace_start"() <{level = 10 : i32, message = "aqk,akd->aqd"}> : () -> ()
    %cst_35 = arith.constant dense<0.000000e+00> : vector<8x8x8xf32>
    %94 = tpu.matmul %93, %80, %cst_35 {dimension_numbers = #tpu.dot_dimension_numbers<[2], [1], [1], [2], [0, 0, 0, 1, 1, 2], [0], [0]>} : vector<8x8x8xf32>, vector<8x8x8xf32>, vector<8x8x8xf32> -> vector<8x8x8xf32>
    "tpu.trace_stop"() : () -> ()
    %95 = vector.extract_strided_slice %94 {offsets = [0, 0, 0], sizes = [2, 8, 8], strides = [1, 1, 1]} : vector<8x8x8xf32> to vector<2x8x8xf32>
    %96 = vector.shape_cast %95 : vector<2x8x8xf32> to vector<16x8xf32>
    %97 = vector.extract_strided_slice %94 {offsets = [2, 0, 0], sizes = [2, 8, 8], strides = [1, 1, 1]} : vector<8x8x8xf32> to vector<2x8x8xf32>
    %98 = vector.shape_cast %97 : vector<2x8x8xf32> to vector<16x8xf32>
    %99 = vector.extract_strided_slice %94 {offsets = [4, 0, 0], sizes = [2, 8, 8], strides = [1, 1, 1]} : vector<8x8x8xf32> to vector<2x8x8xf32>
    %100 = vector.shape_cast %99 : vector<2x8x8xf32> to vector<16x8xf32>
    %101 = vector.extract_strided_slice %94 {offsets = [6, 0, 0], sizes = [2, 8, 8], strides = [1, 1, 1]} : vector<8x8x8xf32> to vector<2x8x8xf32>
    %102 = vector.shape_cast %101 : vector<2x8x8xf32> to vector<16x8xf32>
    %103 = tpu.concatenate %96, %98, %100, %102 in 1 : vector<16x8xf32>, vector<16x8xf32>, vector<16x8xf32>, vector<16x8xf32> -> vector<16x32xf32>
    %104 = arith.truncf %103 : vector<16x32xf32> to vector<16x32xbf16>
    %cst_36 = arith.constant dense<0.000000e+00> : vector<16x32xf32>
    %105 = tpu.matmul %104, %52, %cst_36 {dimension_numbers = #tpu.dot_dimension_numbers<[1], [0], [0], [1], [0, 0, 1, 1], [], []>} : vector<16x32xbf16>, vector<32x32xbf16>, vector<16x32xf32> -> vector<16x32xf32>
    %106 = arith.addf %6, %105 : vector<16x32xf32>
    %c0_37 = arith.constant 0 : index
    %c0_38 = arith.constant 0 : index
    %c0_39 = arith.constant 0 : index
    %107 = vector.load %arg11[%c0_37, %c0_38, %c0_39] : memref<2x1x32xf32, #tpu.memory_space<vmem>>, vector<1x1x32xf32>
    %108 = vector.shape_cast %107 : vector<1x1x32xf32> to vector<1x32xf32>
    %c0_40 = arith.constant 0 : index
    %c0_41 = arith.constant 0 : index
    %c0_42 = arith.constant 0 : index
    %109 = vector.load %arg12[%c0_40, %c0_41, %c0_42] : memref<2x1x32xf32, #tpu.memory_space<vmem>>, vector<1x1x32xf32>
    %110 = vector.shape_cast %109 : vector<1x1x32xf32> to vector<1x32xf32>
    %cst_43 = arith.constant dense<0.000000e+00> : vector<16xf32>
    %111 = vector.multi_reduction <add>, %106, %cst_43 [1] : vector<16x32xf32> to vector<16xf32>
    %112 = vector.shape_cast %111 : vector<16xf32> to vector<16x1xf32>
    %cst_44 = arith.constant 3.200000e+01 : f32
    %113 = vector.broadcast %cst_44 : f32 to vector<16x1xf32>
    %114 = arith.divf %112, %113 : vector<16x1xf32>
    %115 = vector.broadcast %114 : vector<16x1xf32> to vector<16x32xf32>
    %116 = arith.subf %106, %115 : vector<16x32xf32>
    %117 = arith.mulf %116, %116 : vector<16x32xf32>
    %cst_45 = arith.constant dense<0.000000e+00> : vector<16xf32>
    %118 = vector.multi_reduction <add>, %117, %cst_45 [1] : vector<16x32xf32> to vector<16xf32>
    %119 = vector.shape_cast %118 : vector<16xf32> to vector<16x1xf32>
    %cst_46 = arith.constant 0.0322580636 : f32
    %120 = vector.broadcast %cst_46 : f32 to vector<16x1xf32>
    %121 = arith.mulf %119, %120 : vector<16x1xf32>
    %122 = math.sqrt %121 : vector<16x1xf32>
    %cst_47 = arith.constant 9.99999997E-7 : f32
    %123 = vector.broadcast %cst_47 : f32 to vector<16x1xf32>
    %124 = arith.addf %122, %123 : vector<16x1xf32>
    %cst_48 = arith.constant 1.000000e+00 : f32
    %125 = vector.broadcast %cst_48 : f32 to vector<16x1xf32>
    %126 = arith.divf %125, %124 : vector<16x1xf32>
    %127 = vector.broadcast %114 : vector<16x1xf32> to vector<16x32xf32>
    %128 = arith.subf %106, %127 : vector<16x32xf32>
    %129 = vector.broadcast %108 : vector<1x32xf32> to vector<16x32xf32>
    %130 = arith.mulf %129, %128 : vector<16x32xf32>
    %131 = vector.broadcast %126 : vector<16x1xf32> to vector<16x32xf32>
    %132 = arith.mulf %130, %131 : vector<16x32xf32>
    %133 = vector.broadcast %110 : vector<1x32xf32> to vector<16x32xf32>
    %134 = arith.addf %132, %133 : vector<16x32xf32>
    %135 = arith.truncf %134 : vector<16x32xf32> to vector<16x32xbf16>
    %c0_49 = arith.constant 0 : index
    %c0_50 = arith.constant 0 : index
    %c0_51 = arith.constant 0 : index
    %136 = vector.load %arg13[%c0_49, %c0_50, %c0_51] : memref<2x32x32xbf16, #tpu.memory_space<vmem>>, vector<1x32x32xbf16>
    %137 = vector.shape_cast %136 : vector<1x32x32xbf16> to vector<32x32xbf16>
    %cst_52 = arith.constant dense<0.000000e+00> : vector<16x32xf32>
    %138 = tpu.matmul %135, %137, %cst_52 {dimension_numbers = #tpu.dot_dimension_numbers<[1], [0], [0], [1], [0, 0, 1, 1], [], []>} : vector<16x32xbf16>, vector<32x32xbf16>, vector<16x32xf32> -> vector<16x32xf32>
    %139 = arith.truncf %8 : vector<16x32xf32> to vector<16x32xbf16>
    %c0_53 = arith.constant 0 : index
    %c0_54 = arith.constant 0 : index
    %c0_55 = arith.constant 0 : index
    %140 = vector.load %arg14[%c0_53, %c0_54, %c0_55] : memref<2x32x64xbf16, #tpu.memory_space<vmem>>, vector<1x32x64xbf16>
    %141 = vector.shape_cast %140 : vector<1x32x64xbf16> to vector<32x64xbf16>
    %cst_56 = arith.constant dense<0.000000e+00> : vector<16x64xf32>
    %142 = tpu.matmul %139, %141, %cst_56 {dimension_numbers = #tpu.dot_dimension_numbers<[1], [0], [0], [1], [0, 0, 1, 1], [], []>} : vector<16x32xbf16>, vector<32x64xbf16>, vector<16x64xf32> -> vector<16x64xf32>
    %143 = vector.extract_strided_slice %142 {offsets = [0, 0], sizes = [16, 32], strides = [1, 1]} : vector<16x64xf32> to vector<16x32xf32>
    %144 = vector.extract_strided_slice %142 {offsets = [0, 32], sizes = [16, 32], strides = [1, 1]} : vector<16x64xf32> to vector<16x32xf32>
    %c0_57 = arith.constant 0 : index
    %c0_58 = arith.constant 0 : index
    %c0_59 = arith.constant 0 : index
    %145 = vector.load %arg15[%c0_57, %c0_58, %c0_59] : memref<2x32x32xbf16, #tpu.memory_space<vmem>>, vector<1x32x32xbf16>
    %146 = vector.shape_cast %145 : vector<1x32x32xbf16> to vector<32x32xbf16>
    %147 = vector.extract_strided_slice %138 {offsets = [0, 0], sizes = [16, 8], strides = [1, 1]} : vector<16x32xf32> to vector<16x8xf32>
    %148 = vector.shape_cast %147 : vector<16x8xf32> to vector<2x8x8xf32>
    %149 = vector.extract_strided_slice %138 {offsets = [0, 8], sizes = [16, 8], strides = [1, 1]} : vector<16x32xf32> to vector<16x8xf32>
    %150 = vector.shape_cast %149 : vector<16x8xf32> to vector<2x8x8xf32>
    %151 = vector.extract_strided_slice %138 {offsets = [0, 16], sizes = [16, 8], strides = [1, 1]} : vector<16x32xf32> to vector<16x8xf32>
    %152 = vector.shape_cast %151 : vector<16x8xf32> to vector<2x8x8xf32>
    %153 = vector.extract_strided_slice %138 {offsets = [0, 24], sizes = [16, 8], strides = [1, 1]} : vector<16x32xf32> to vector<16x8xf32>
    %154 = vector.shape_cast %153 : vector<16x8xf32> to vector<2x8x8xf32>
    %155 = tpu.concatenate %148, %150, %152, %154 in 0 : vector<2x8x8xf32>, vector<2x8x8xf32>, vector<2x8x8xf32>, vector<2x8x8xf32> -> vector<8x8x8xf32>
    %156 = vector.extract_strided_slice %143 {offsets = [0, 0], sizes = [16, 8], strides = [1, 1]} : vector<16x32xf32> to vector<16x8xf32>
    %157 = vector.shape_cast %156 : vector<16x8xf32> to vector<2x8x8xf32>
    %158 = vector.extract_strided_slice %143 {offsets = [0, 8], sizes = [16, 8], strides = [1, 1]} : vector<16x32xf32> to vector<16x8xf32>
    %159 = vector.shape_cast %158 : vector<16x8xf32> to vector<2x8x8xf32>
    %160 = vector.extract_strided_slice %143 {offsets = [0, 16], sizes = [16, 8], strides = [1, 1]} : vector<16x32xf32> to vector<16x8xf32>
    %161 = vector.shape_cast %160 : vector<16x8xf32> to vector<2x8x8xf32>
    %162 = vector.extract_strided_slice %143 {offsets = [0, 24], sizes = [16, 8], strides = [1, 1]} : vector<16x32xf32> to vector<16x8xf32>
    %163 = vector.shape_cast %162 : vector<16x8xf32> to vector<2x8x8xf32>
    %164 = tpu.concatenate %157, %159, %161, %163 in 0 : vector<2x8x8xf32>, vector<2x8x8xf32>, vector<2x8x8xf32>, vector<2x8x8xf32> -> vector<8x8x8xf32>
    %165 = tpu.transpose %164, [0, 2, 1] : vector<8x8x8xf32> -> vector<8x8x8xf32>
    %166 = vector.extract_strided_slice %144 {offsets = [0, 0], sizes = [16, 8], strides = [1, 1]} : vector<16x32xf32> to vector<16x8xf32>
    %167 = vector.shape_cast %166 : vector<16x8xf32> to vector<2x8x8xf32>
    %168 = vector.extract_strided_slice %144 {offsets = [0, 8], sizes = [16, 8], strides = [1, 1]} : vector<16x32xf32> to vector<16x8xf32>
    %169 = vector.shape_cast %168 : vector<16x8xf32> to vector<2x8x8xf32>
    %170 = vector.extract_strided_slice %144 {offsets = [0, 16], sizes = [16, 8], strides = [1, 1]} : vector<16x32xf32> to vector<16x8xf32>
    %171 = vector.shape_cast %170 : vector<16x8xf32> to vector<2x8x8xf32>
    %172 = vector.extract_strided_slice %144 {offsets = [0, 24], sizes = [16, 8], strides = [1, 1]} : vector<16x32xf32> to vector<16x8xf32>
    %173 = vector.shape_cast %172 : vector<16x8xf32> to vector<2x8x8xf32>
    %174 = tpu.concatenate %167, %169, %171, %173 in 0 : vector<2x8x8xf32>, vector<2x8x8xf32>, vector<2x8x8xf32>, vector<2x8x8xf32> -> vector<8x8x8xf32>
    "tpu.trace_start"() <{level = 10 : i32, message = "aqd,adk->aqk"}> : () -> ()
    %cst_60 = arith.constant dense<0.000000e+00> : vector<8x8x8xf32>
    %175 = tpu.matmul %155, %165, %cst_60 {dimension_numbers = #tpu.dot_dimension_numbers<[2], [1], [1], [2], [0, 0, 0, 1, 1, 2], [0], [0]>} : vector<8x8x8xf32>, vector<8x8x8xf32>, vector<8x8x8xf32> -> vector<8x8x8xf32>
    "tpu.trace_stop"() : () -> ()
    %cst_61 = arith.constant dense<0xFF800000> : vector<8x8xf32>
    %176 = vector.multi_reduction <maximumf>, %175, %cst_61 [2] : vector<8x8x8xf32> to vector<8x8xf32>
    %177 = vector.shape_cast %176 : vector<8x8xf32> to vector<8x8x1xf32>
    %178 = vector.broadcast %177 : vector<8x8x1xf32> to vector<8x8x8xf32>
    %179 = arith.subf %175, %178 : vector<8x8x8xf32>
    %180 = math.exp %179 : vector<8x8x8xf32>
    %cst_62 = arith.constant dense<0.000000e+00> : vector<8x8xf32>
    %181 = vector.multi_reduction <add>, %180, %cst_62 [2] : vector<8x8x8xf32> to vector<8x8xf32>
    %182 = vector.shape_cast %181 : vector<8x8xf32> to vector<8x8x1xf32>
    %183 = tpu.reciprocal %182 {approx = true} : vector<8x8x1xf32> -> vector<8x8x1xf32>
    %184 = vector.broadcast %183 : vector<8x8x1xf32> to vector<8x8x8xf32>
    %185 = arith.mulf %180, %184 : vector<8x8x8xf32>
    "tpu.trace_start"() <{level = 10 : i32, message = "aqk,akd->aqd"}> : () -> ()
    %cst_63 = arith.constant dense<0.000000e+00> : vector<8x8x8xf32>
    %186 = tpu.matmul %185, %174, %cst_63 {dimension_numbers = #tpu.dot_dimension_numbers<[2], [1], [1], [2], [0, 0, 0, 1, 1, 2], [0], [0]>} : vector<8x8x8xf32>, vector<8x8x8xf32>, vector<8x8x8xf32> -> vector<8x8x8xf32>
    "tpu.trace_stop"() : () -> ()
    %187 = vector.extract_strided_slice %186 {offsets = [0, 0, 0], sizes = [2, 8, 8], strides = [1, 1, 1]} : vector<8x8x8xf32> to vector<2x8x8xf32>
    %188 = vector.shape_cast %187 : vector<2x8x8xf32> to vector<16x8xf32>
    %189 = vector.extract_strided_slice %186 {offsets = [2, 0, 0], sizes = [2, 8, 8], strides = [1, 1, 1]} : vector<8x8x8xf32> to vector<2x8x8xf32>
    %190 = vector.shape_cast %189 : vector<2x8x8xf32> to vector<16x8xf32>
    %191 = vector.extract_strided_slice %186 {offsets = [4, 0, 0], sizes = [2, 8, 8], strides = [1, 1, 1]} : vector<8x8x8xf32> to vector<2x8x8xf32>
    %192 = vector.shape_cast %191 : vector<2x8x8xf32> to vector<16x8xf32>
    %193 = vector.extract_strided_slice %186 {offsets = [6, 0, 0], sizes = [2, 8, 8], strides = [1, 1, 1]} : vector<8x8x8xf32> to vector<2x8x8xf32>
    %194 = vector.shape_cast %193 : vector<2x8x8xf32> to vector<16x8xf32>
    %195 = tpu.concatenate %188, %190, %192, %194 in 1 : vector<16x8xf32>, vector<16x8xf32>, vector<16x8xf32>, vector<16x8xf32> -> vector<16x32xf32>
    %196 = arith.truncf %195 : vector<16x32xf32> to vector<16x32xbf16>
    %cst_64 = arith.constant dense<0.000000e+00> : vector<16x32xf32>
    %197 = tpu.matmul %196, %146, %cst_64 {dimension_numbers = #tpu.dot_dimension_numbers<[1], [0], [0], [1], [0, 0, 1, 1], [], []>} : vector<16x32xbf16>, vector<32x32xbf16>, vector<16x32xf32> -> vector<16x32xf32>
    %198 = arith.addf %106, %197 : vector<16x32xf32>
    %c0_65 = arith.constant 0 : index
    %c0_66 = arith.constant 0 : index
    %c0_67 = arith.constant 0 : index
    %199 = vector.load %arg16[%c0_65, %c0_66, %c0_67] : memref<2x1x32xf32, #tpu.memory_space<vmem>>, vector<1x1x32xf32>
    %200 = vector.shape_cast %199 : vector<1x1x32xf32> to vector<1x32xf32>
    %c0_68 = arith.constant 0 : index
    %c0_69 = arith.constant 0 : index
    %c0_70 = arith.constant 0 : index
    %201 = vector.load %arg17[%c0_68, %c0_69, %c0_70] : memref<2x1x32xf32, #tpu.memory_space<vmem>>, vector<1x1x32xf32>
    %202 = vector.shape_cast %201 : vector<1x1x32xf32> to vector<1x32xf32>
    %cst_71 = arith.constant dense<0.000000e+00> : vector<16xf32>
    %203 = vector.multi_reduction <add>, %198, %cst_71 [1] : vector<16x32xf32> to vector<16xf32>
    %204 = vector.shape_cast %203 : vector<16xf32> to vector<16x1xf32>
    %cst_72 = arith.constant 3.200000e+01 : f32
    %205 = vector.broadcast %cst_72 : f32 to vector<16x1xf32>
    %206 = arith.divf %204, %205 : vector<16x1xf32>
    %207 = vector.broadcast %206 : vector<16x1xf32> to vector<16x32xf32>
    %208 = arith.subf %198, %207 : vector<16x32xf32>
    %209 = arith.mulf %208, %208 : vector<16x32xf32>
    %cst_73 = arith.constant dense<0.000000e+00> : vector<16xf32>
    %210 = vector.multi_reduction <add>, %209, %cst_73 [1] : vector<16x32xf32> to vector<16xf32>
    %211 = vector.shape_cast %210 : vector<16xf32> to vector<16x1xf32>
    %cst_74 = arith.constant 0.0322580636 : f32
    %212 = vector.broadcast %cst_74 : f32 to vector<16x1xf32>
    %213 = arith.mulf %211, %212 : vector<16x1xf32>
    %214 = math.sqrt %213 : vector<16x1xf32>
    %cst_75 = arith.constant 9.99999997E-7 : f32
    %215 = vector.broadcast %cst_75 : f32 to vector<16x1xf32>
    %216 = arith.addf %214, %215 : vector<16x1xf32>
    %cst_76 = arith.constant 1.000000e+00 : f32
    %217 = vector.broadcast %cst_76 : f32 to vector<16x1xf32>
    %218 = arith.divf %217, %216 : vector<16x1xf32>
    %219 = vector.broadcast %206 : vector<16x1xf32> to vector<16x32xf32>
    %220 = arith.subf %198, %219 : vector<16x32xf32>
    %221 = vector.broadcast %200 : vector<1x32xf32> to vector<16x32xf32>
    %222 = arith.mulf %221, %220 : vector<16x32xf32>
    %223 = vector.broadcast %218 : vector<16x1xf32> to vector<16x32xf32>
    %224 = arith.mulf %222, %223 : vector<16x32xf32>
    %225 = vector.broadcast %202 : vector<1x32xf32> to vector<16x32xf32>
    %226 = arith.addf %224, %225 : vector<16x32xf32>
    %c0_77 = arith.constant 0 : index
    %c0_78 = arith.constant 0 : index
    %c0_79 = arith.constant 0 : index
    %227 = vector.load %arg18[%c0_77, %c0_78, %c0_79] : memref<2x96x64xbf16, #tpu.memory_space<vmem>>, vector<1x96x64xbf16>
    %228 = vector.shape_cast %227 : vector<1x96x64xbf16> to vector<96x64xbf16>
    %c0_80 = arith.constant 0 : index
    %c0_81 = arith.constant 0 : index
    %c0_82 = arith.constant 0 : index
    %229 = vector.load %arg19[%c0_80, %c0_81, %c0_82] : memref<2x1x64xf32, #tpu.memory_space<vmem>>, vector<1x1x64xf32>
    %230 = vector.shape_cast %229 : vector<1x1x64xf32> to vector<1x64xf32>
    %c2_i32_83 = arith.constant 2 : i32
    %231 = tpu.dynamic_rotate %226 by %c2_i32_83 dim 0 : vector<16x32xf32>, i32 -> vector<16x32xf32>
    %cst_84 = arith.constant 0.000000e+00 : f32
    %232 = vector.shape_cast %15 : vector<16x1xi1> to vector<16x1xi1>
    %233 = vector.broadcast %232 : vector<16x1xi1> to vector<16x32xi1>
    %234 = vector.broadcast %cst_84 : f32 to vector<16x32xf32>
    %235 = arith.select %233, %231, %234 : vector<16x32xi1>, vector<16x32xf32>
    %c1_i32_85 = arith.constant 1 : i32
    %236 = tpu.dynamic_rotate %226 by %c1_i32_85 dim 0 : vector<16x32xf32>, i32 -> vector<16x32xf32>
    %cst_86 = arith.constant 0.000000e+00 : f32
    %237 = vector.shape_cast %13 : vector<16x1xi1> to vector<16x1xi1>
    %238 = vector.broadcast %237 : vector<16x1xi1> to vector<16x32xi1>
    %239 = vector.broadcast %cst_86 : f32 to vector<16x32xf32>
    %240 = arith.select %238, %236, %239 : vector<16x32xi1>, vector<16x32xf32>
    %241 = tpu.concatenate %235, %240, %226 in 1 : vector<16x32xf32>, vector<16x32xf32>, vector<16x32xf32> -> vector<16x96xf32>
    %242 = arith.truncf %241 : vector<16x96xf32> to vector<16x96xbf16>
    %cst_87 = arith.constant dense<0.000000e+00> : vector<16x64xf32>
    %243 = tpu.matmul %242, %228, %cst_87 {dimension_numbers = #tpu.dot_dimension_numbers<[1], [0], [0], [1], [0, 0, 1, 1], [], []>} : vector<16x96xbf16>, vector<96x64xbf16>, vector<16x64xf32> -> vector<16x64xf32>
    %244 = vector.broadcast %230 : vector<1x64xf32> to vector<16x64xf32>
    %245 = arith.addf %243, %244 : vector<16x64xf32>
    %cst_88 = arith.constant 0.000000e+00 : f32
    %246 = vector.broadcast %cst_88 : f32 to vector<16x64xf32>
    %247 = arith.maximumf %245, %246 : vector<16x64xf32>
    %c0_89 = arith.constant 0 : index
    %c0_90 = arith.constant 0 : index
    %c0_91 = arith.constant 0 : index
    %248 = vector.load %arg20[%c0_89, %c0_90, %c0_91] : memref<2x192x32xbf16, #tpu.memory_space<vmem>>, vector<1x192x32xbf16>
    %249 = vector.shape_cast %248 : vector<1x192x32xbf16> to vector<192x32xbf16>
    %c0_92 = arith.constant 0 : index
    %c0_93 = arith.constant 0 : index
    %c0_94 = arith.constant 0 : index
    %250 = vector.load %arg21[%c0_92, %c0_93, %c0_94] : memref<2x1x32xf32, #tpu.memory_space<vmem>>, vector<1x1x32xf32>
    %251 = vector.shape_cast %250 : vector<1x1x32xf32> to vector<1x32xf32>
    %c2_i32_95 = arith.constant 2 : i32
    %252 = tpu.dynamic_rotate %247 by %c2_i32_95 dim 0 : vector<16x64xf32>, i32 -> vector<16x64xf32>
    %cst_96 = arith.constant 0.000000e+00 : f32
    %253 = vector.shape_cast %15 : vector<16x1xi1> to vector<16x1xi1>
    %254 = vector.broadcast %253 : vector<16x1xi1> to vector<16x64xi1>
    %255 = vector.broadcast %cst_96 : f32 to vector<16x64xf32>
    %256 = arith.select %254, %252, %255 : vector<16x64xi1>, vector<16x64xf32>
    %c1_i32_97 = arith.constant 1 : i32
    %257 = tpu.dynamic_rotate %247 by %c1_i32_97 dim 0 : vector<16x64xf32>, i32 -> vector<16x64xf32>
    %cst_98 = arith.constant 0.000000e+00 : f32
    %258 = vector.shape_cast %13 : vector<16x1xi1> to vector<16x1xi1>
    %259 = vector.broadcast %258 : vector<16x1xi1> to vector<16x64xi1>
    %260 = vector.broadcast %cst_98 : f32 to vector<16x64xf32>
    %261 = arith.select %259, %257, %260 : vector<16x64xi1>, vector<16x64xf32>
    %262 = tpu.concatenate %256, %261, %247 in 1 : vector<16x64xf32>, vector<16x64xf32>, vector<16x64xf32> -> vector<16x192xf32>
    %263 = arith.truncf %262 : vector<16x192xf32> to vector<16x192xbf16>
    %cst_99 = arith.constant dense<0.000000e+00> : vector<16x32xf32>
    %264 = tpu.matmul %263, %249, %cst_99 {dimension_numbers = #tpu.dot_dimension_numbers<[1], [0], [0], [1], [0, 0, 1, 1], [], []>} : vector<16x192xbf16>, vector<192x32xbf16>, vector<16x32xf32> -> vector<16x32xf32>
    %265 = vector.broadcast %251 : vector<1x32xf32> to vector<16x32xf32>
    %266 = arith.addf %264, %265 : vector<16x32xf32>
    %cst_100 = arith.constant 0.000000e+00 : f32
    %267 = vector.broadcast %cst_100 : f32 to vector<16x32xf32>
    %268 = arith.maximumf %266, %267 : vector<16x32xf32>
    %269 = arith.addf %198, %268 : vector<16x32xf32>
    %c1 = arith.constant 1 : index
    %c0_101 = arith.constant 0 : index
    %c0_102 = arith.constant 0 : index
    %270 = vector.load %arg7[%c1, %c0_101, %c0_102] : memref<2x1x32xf32, #tpu.memory_space<vmem>>, vector<1x1x32xf32>
    %271 = vector.shape_cast %270 : vector<1x1x32xf32> to vector<1x32xf32>
    %c1_103 = arith.constant 1 : index
    %c0_104 = arith.constant 0 : index
    %c0_105 = arith.constant 0 : index
    %272 = vector.load %arg8[%c1_103, %c0_104, %c0_105] : memref<2x1x32xf32, #tpu.memory_space<vmem>>, vector<1x1x32xf32>
    %273 = vector.shape_cast %272 : vector<1x1x32xf32> to vector<1x32xf32>
    %cst_106 = arith.constant dense<0.000000e+00> : vector<16xf32>
    %274 = vector.multi_reduction <add>, %269, %cst_106 [1] : vector<16x32xf32> to vector<16xf32>
    %275 = vector.shape_cast %274 : vector<16xf32> to vector<16x1xf32>
    %cst_107 = arith.constant 3.200000e+01 : f32
    %276 = vector.broadcast %cst_107 : f32 to vector<16x1xf32>
    %277 = arith.divf %275, %276 : vector<16x1xf32>
    %278 = vector.broadcast %277 : vector<16x1xf32> to vector<16x32xf32>
    %279 = arith.subf %269, %278 : vector<16x32xf32>
    %280 = arith.mulf %279, %279 : vector<16x32xf32>
    %cst_108 = arith.constant dense<0.000000e+00> : vector<16xf32>
    %281 = vector.multi_reduction <add>, %280, %cst_108 [1] : vector<16x32xf32> to vector<16xf32>
    %282 = vector.shape_cast %281 : vector<16xf32> to vector<16x1xf32>
    %cst_109 = arith.constant 0.0322580636 : f32
    %283 = vector.broadcast %cst_109 : f32 to vector<16x1xf32>
    %284 = arith.mulf %282, %283 : vector<16x1xf32>
    %285 = math.sqrt %284 : vector<16x1xf32>
    %cst_110 = arith.constant 9.99999997E-7 : f32
    %286 = vector.broadcast %cst_110 : f32 to vector<16x1xf32>
    %287 = arith.addf %285, %286 : vector<16x1xf32>
    %cst_111 = arith.constant 1.000000e+00 : f32
    %288 = vector.broadcast %cst_111 : f32 to vector<16x1xf32>
    %289 = arith.divf %288, %287 : vector<16x1xf32>
    %290 = vector.broadcast %277 : vector<16x1xf32> to vector<16x32xf32>
    %291 = arith.subf %269, %290 : vector<16x32xf32>
    %292 = vector.broadcast %271 : vector<1x32xf32> to vector<16x32xf32>
    %293 = arith.mulf %292, %291 : vector<16x32xf32>
    %294 = vector.broadcast %289 : vector<16x1xf32> to vector<16x32xf32>
    %295 = arith.mulf %293, %294 : vector<16x32xf32>
    %296 = vector.broadcast %273 : vector<1x32xf32> to vector<16x32xf32>
    %297 = arith.addf %295, %296 : vector<16x32xf32>
    %298 = arith.truncf %297 : vector<16x32xf32> to vector<16x32xbf16>
    %c1_112 = arith.constant 1 : index
    %c0_113 = arith.constant 0 : index
    %c0_114 = arith.constant 0 : index
    %299 = vector.load %arg9[%c1_112, %c0_113, %c0_114] : memref<2x32x96xbf16, #tpu.memory_space<vmem>>, vector<1x32x96xbf16>
    %300 = vector.shape_cast %299 : vector<1x32x96xbf16> to vector<32x96xbf16>
    %cst_115 = arith.constant dense<0.000000e+00> : vector<16x96xf32>
    %301 = tpu.matmul %298, %300, %cst_115 {dimension_numbers = #tpu.dot_dimension_numbers<[1], [0], [0], [1], [0, 0, 1, 1], [], []>} : vector<16x32xbf16>, vector<32x96xbf16>, vector<16x96xf32> -> vector<16x96xf32>
    %302 = vector.extract_strided_slice %301 {offsets = [0, 0], sizes = [16, 32], strides = [1, 1]} : vector<16x96xf32> to vector<16x32xf32>
    %303 = vector.extract_strided_slice %301 {offsets = [0, 32], sizes = [16, 32], strides = [1, 1]} : vector<16x96xf32> to vector<16x32xf32>
    %304 = vector.extract_strided_slice %301 {offsets = [0, 64], sizes = [16, 32], strides = [1, 1]} : vector<16x96xf32> to vector<16x32xf32>
    %c1_116 = arith.constant 1 : index
    %c0_117 = arith.constant 0 : index
    %c0_118 = arith.constant 0 : index
    %305 = vector.load %arg10[%c1_116, %c0_117, %c0_118] : memref<2x32x32xbf16, #tpu.memory_space<vmem>>, vector<1x32x32xbf16>
    %306 = vector.shape_cast %305 : vector<1x32x32xbf16> to vector<32x32xbf16>
    %307 = vector.extract_strided_slice %302 {offsets = [0, 0], sizes = [16, 8], strides = [1, 1]} : vector<16x32xf32> to vector<16x8xf32>
    %308 = vector.shape_cast %307 : vector<16x8xf32> to vector<2x8x8xf32>
    %309 = vector.extract_strided_slice %302 {offsets = [0, 8], sizes = [16, 8], strides = [1, 1]} : vector<16x32xf32> to vector<16x8xf32>
    %310 = vector.shape_cast %309 : vector<16x8xf32> to vector<2x8x8xf32>
    %311 = vector.extract_strided_slice %302 {offsets = [0, 16], sizes = [16, 8], strides = [1, 1]} : vector<16x32xf32> to vector<16x8xf32>
    %312 = vector.shape_cast %311 : vector<16x8xf32> to vector<2x8x8xf32>
    %313 = vector.extract_strided_slice %302 {offsets = [0, 24], sizes = [16, 8], strides = [1, 1]} : vector<16x32xf32> to vector<16x8xf32>
    %314 = vector.shape_cast %313 : vector<16x8xf32> to vector<2x8x8xf32>
    %315 = tpu.concatenate %308, %310, %312, %314 in 0 : vector<2x8x8xf32>, vector<2x8x8xf32>, vector<2x8x8xf32>, vector<2x8x8xf32> -> vector<8x8x8xf32>
    %316 = vector.extract_strided_slice %303 {offsets = [0, 0], sizes = [16, 8], strides = [1, 1]} : vector<16x32xf32> to vector<16x8xf32>
    %317 = vector.shape_cast %316 : vector<16x8xf32> to vector<2x8x8xf32>
    %318 = vector.extract_strided_slice %303 {offsets = [0, 8], sizes = [16, 8], strides = [1, 1]} : vector<16x32xf32> to vector<16x8xf32>
    %319 = vector.shape_cast %318 : vector<16x8xf32> to vector<2x8x8xf32>
    %320 = vector.extract_strided_slice %303 {offsets = [0, 16], sizes = [16, 8], strides = [1, 1]} : vector<16x32xf32> to vector<16x8xf32>
    %321 = vector.shape_cast %320 : vector<16x8xf32> to vector<2x8x8xf32>
    %322 = vector.extract_strided_slice %303 {offsets = [0, 24], sizes = [16, 8], strides = [1, 1]} : vector<16x32xf32> to vector<16x8xf32>
    %323 = vector.shape_cast %322 : vector<16x8xf32> to vector<2x8x8xf32>
    %324 = tpu.concatenate %317, %319, %321, %323 in 0 : vector<2x8x8xf32>, vector<2x8x8xf32>, vector<2x8x8xf32>, vector<2x8x8xf32> -> vector<8x8x8xf32>
    %325 = tpu.transpose %324, [0, 2, 1] : vector<8x8x8xf32> -> vector<8x8x8xf32>
    %326 = vector.extract_strided_slice %304 {offsets = [0, 0], sizes = [16, 8], strides = [1, 1]} : vector<16x32xf32> to vector<16x8xf32>
    %327 = vector.shape_cast %326 : vector<16x8xf32> to vector<2x8x8xf32>
    %328 = vector.extract_strided_slice %304 {offsets = [0, 8], sizes = [16, 8], strides = [1, 1]} : vector<16x32xf32> to vector<16x8xf32>
    %329 = vector.shape_cast %328 : vector<16x8xf32> to vector<2x8x8xf32>
    %330 = vector.extract_strided_slice %304 {offsets = [0, 16], sizes = [16, 8], strides = [1, 1]} : vector<16x32xf32> to vector<16x8xf32>
    %331 = vector.shape_cast %330 : vector<16x8xf32> to vector<2x8x8xf32>
    %332 = vector.extract_strided_slice %304 {offsets = [0, 24], sizes = [16, 8], strides = [1, 1]} : vector<16x32xf32> to vector<16x8xf32>
    %333 = vector.shape_cast %332 : vector<16x8xf32> to vector<2x8x8xf32>
    %334 = tpu.concatenate %327, %329, %331, %333 in 0 : vector<2x8x8xf32>, vector<2x8x8xf32>, vector<2x8x8xf32>, vector<2x8x8xf32> -> vector<8x8x8xf32>
    "tpu.trace_start"() <{level = 10 : i32, message = "aqd,adk->aqk"}> : () -> ()
    %cst_119 = arith.constant dense<0.000000e+00> : vector<8x8x8xf32>
    %335 = tpu.matmul %315, %325, %cst_119 {dimension_numbers = #tpu.dot_dimension_numbers<[2], [1], [1], [2], [0, 0, 0, 1, 1, 2], [0], [0]>} : vector<8x8x8xf32>, vector<8x8x8xf32>, vector<8x8x8xf32> -> vector<8x8x8xf32>
    "tpu.trace_stop"() : () -> ()
    %336 = vector.broadcast %10 : vector<1x8x8xf32> to vector<8x8x8xf32>
    %337 = arith.addf %335, %336 : vector<8x8x8xf32>
    %cst_120 = arith.constant dense<0xFF800000> : vector<8x8xf32>
    %338 = vector.multi_reduction <maximumf>, %337, %cst_120 [2] : vector<8x8x8xf32> to vector<8x8xf32>
    %339 = vector.shape_cast %338 : vector<8x8xf32> to vector<8x8x1xf32>
    %340 = vector.broadcast %339 : vector<8x8x1xf32> to vector<8x8x8xf32>
    %341 = arith.subf %337, %340 : vector<8x8x8xf32>
    %342 = math.exp %341 : vector<8x8x8xf32>
    %cst_121 = arith.constant dense<0.000000e+00> : vector<8x8xf32>
    %343 = vector.multi_reduction <add>, %342, %cst_121 [2] : vector<8x8x8xf32> to vector<8x8xf32>
    %344 = vector.shape_cast %343 : vector<8x8xf32> to vector<8x8x1xf32>
    %345 = tpu.reciprocal %344 {approx = true} : vector<8x8x1xf32> -> vector<8x8x1xf32>
    %346 = vector.broadcast %345 : vector<8x8x1xf32> to vector<8x8x8xf32>
    %347 = arith.mulf %342, %346 : vector<8x8x8xf32>
    "tpu.trace_start"() <{level = 10 : i32, message = "aqk,akd->aqd"}> : () -> ()
    %cst_122 = arith.constant dense<0.000000e+00> : vector<8x8x8xf32>
    %348 = tpu.matmul %347, %334, %cst_122 {dimension_numbers = #tpu.dot_dimension_numbers<[2], [1], [1], [2], [0, 0, 0, 1, 1, 2], [0], [0]>} : vector<8x8x8xf32>, vector<8x8x8xf32>, vector<8x8x8xf32> -> vector<8x8x8xf32>
    "tpu.trace_stop"() : () -> ()
    %349 = vector.extract_strided_slice %348 {offsets = [0, 0, 0], sizes = [2, 8, 8], strides = [1, 1, 1]} : vector<8x8x8xf32> to vector<2x8x8xf32>
    %350 = vector.shape_cast %349 : vector<2x8x8xf32> to vector<16x8xf32>
    %351 = vector.extract_strided_slice %348 {offsets = [2, 0, 0], sizes = [2, 8, 8], strides = [1, 1, 1]} : vector<8x8x8xf32> to vector<2x8x8xf32>
    %352 = vector.shape_cast %351 : vector<2x8x8xf32> to vector<16x8xf32>
    %353 = vector.extract_strided_slice %348 {offsets = [4, 0, 0], sizes = [2, 8, 8], strides = [1, 1, 1]} : vector<8x8x8xf32> to vector<2x8x8xf32>
    %354 = vector.shape_cast %353 : vector<2x8x8xf32> to vector<16x8xf32>
    %355 = vector.extract_strided_slice %348 {offsets = [6, 0, 0], sizes = [2, 8, 8], strides = [1, 1, 1]} : vector<8x8x8xf32> to vector<2x8x8xf32>
    %356 = vector.shape_cast %355 : vector<2x8x8xf32> to vector<16x8xf32>
    %357 = tpu.concatenate %350, %352, %354, %356 in 1 : vector<16x8xf32>, vector<16x8xf32>, vector<16x8xf32>, vector<16x8xf32> -> vector<16x32xf32>
    %358 = arith.truncf %357 : vector<16x32xf32> to vector<16x32xbf16>
    %cst_123 = arith.constant dense<0.000000e+00> : vector<16x32xf32>
    %359 = tpu.matmul %358, %306, %cst_123 {dimension_numbers = #tpu.dot_dimension_numbers<[1], [0], [0], [1], [0, 0, 1, 1], [], []>} : vector<16x32xbf16>, vector<32x32xbf16>, vector<16x32xf32> -> vector<16x32xf32>
    %360 = arith.addf %269, %359 : vector<16x32xf32>
    %c1_124 = arith.constant 1 : index
    %c0_125 = arith.constant 0 : index
    %c0_126 = arith.constant 0 : index
    %361 = vector.load %arg11[%c1_124, %c0_125, %c0_126] : memref<2x1x32xf32, #tpu.memory_space<vmem>>, vector<1x1x32xf32>
    %362 = vector.shape_cast %361 : vector<1x1x32xf32> to vector<1x32xf32>
    %c1_127 = arith.constant 1 : index
    %c0_128 = arith.constant 0 : index
    %c0_129 = arith.constant 0 : index
    %363 = vector.load %arg12[%c1_127, %c0_128, %c0_129] : memref<2x1x32xf32, #tpu.memory_space<vmem>>, vector<1x1x32xf32>
    %364 = vector.shape_cast %363 : vector<1x1x32xf32> to vector<1x32xf32>
    %cst_130 = arith.constant dense<0.000000e+00> : vector<16xf32>
    %365 = vector.multi_reduction <add>, %360, %cst_130 [1] : vector<16x32xf32> to vector<16xf32>
    %366 = vector.shape_cast %365 : vector<16xf32> to vector<16x1xf32>
    %cst_131 = arith.constant 3.200000e+01 : f32
    %367 = vector.broadcast %cst_131 : f32 to vector<16x1xf32>
    %368 = arith.divf %366, %367 : vector<16x1xf32>
    %369 = vector.broadcast %368 : vector<16x1xf32> to vector<16x32xf32>
    %370 = arith.subf %360, %369 : vector<16x32xf32>
    %371 = arith.mulf %370, %370 : vector<16x32xf32>
    %cst_132 = arith.constant dense<0.000000e+00> : vector<16xf32>
    %372 = vector.multi_reduction <add>, %371, %cst_132 [1] : vector<16x32xf32> to vector<16xf32>
    %373 = vector.shape_cast %372 : vector<16xf32> to vector<16x1xf32>
    %cst_133 = arith.constant 0.0322580636 : f32
    %374 = vector.broadcast %cst_133 : f32 to vector<16x1xf32>
    %375 = arith.mulf %373, %374 : vector<16x1xf32>
    %376 = math.sqrt %375 : vector<16x1xf32>
    %cst_134 = arith.constant 9.99999997E-7 : f32
    %377 = vector.broadcast %cst_134 : f32 to vector<16x1xf32>
    %378 = arith.addf %376, %377 : vector<16x1xf32>
    %cst_135 = arith.constant 1.000000e+00 : f32
    %379 = vector.broadcast %cst_135 : f32 to vector<16x1xf32>
    %380 = arith.divf %379, %378 : vector<16x1xf32>
    %381 = vector.broadcast %368 : vector<16x1xf32> to vector<16x32xf32>
    %382 = arith.subf %360, %381 : vector<16x32xf32>
    %383 = vector.broadcast %362 : vector<1x32xf32> to vector<16x32xf32>
    %384 = arith.mulf %383, %382 : vector<16x32xf32>
    %385 = vector.broadcast %380 : vector<16x1xf32> to vector<16x32xf32>
    %386 = arith.mulf %384, %385 : vector<16x32xf32>
    %387 = vector.broadcast %364 : vector<1x32xf32> to vector<16x32xf32>
    %388 = arith.addf %386, %387 : vector<16x32xf32>
    %389 = arith.truncf %388 : vector<16x32xf32> to vector<16x32xbf16>
    %c1_136 = arith.constant 1 : index
    %c0_137 = arith.constant 0 : index
    %c0_138 = arith.constant 0 : index
    %390 = vector.load %arg13[%c1_136, %c0_137, %c0_138] : memref<2x32x32xbf16, #tpu.memory_space<vmem>>, vector<1x32x32xbf16>
    %391 = vector.shape_cast %390 : vector<1x32x32xbf16> to vector<32x32xbf16>
    %cst_139 = arith.constant dense<0.000000e+00> : vector<16x32xf32>
    %392 = tpu.matmul %389, %391, %cst_139 {dimension_numbers = #tpu.dot_dimension_numbers<[1], [0], [0], [1], [0, 0, 1, 1], [], []>} : vector<16x32xbf16>, vector<32x32xbf16>, vector<16x32xf32> -> vector<16x32xf32>
    %393 = arith.truncf %8 : vector<16x32xf32> to vector<16x32xbf16>
    %c1_140 = arith.constant 1 : index
    %c0_141 = arith.constant 0 : index
    %c0_142 = arith.constant 0 : index
    %394 = vector.load %arg14[%c1_140, %c0_141, %c0_142] : memref<2x32x64xbf16, #tpu.memory_space<vmem>>, vector<1x32x64xbf16>
    %395 = vector.shape_cast %394 : vector<1x32x64xbf16> to vector<32x64xbf16>
    %cst_143 = arith.constant dense<0.000000e+00> : vector<16x64xf32>
    %396 = tpu.matmul %393, %395, %cst_143 {dimension_numbers = #tpu.dot_dimension_numbers<[1], [0], [0], [1], [0, 0, 1, 1], [], []>} : vector<16x32xbf16>, vector<32x64xbf16>, vector<16x64xf32> -> vector<16x64xf32>
    %397 = vector.extract_strided_slice %396 {offsets = [0, 0], sizes = [16, 32], strides = [1, 1]} : vector<16x64xf32> to vector<16x32xf32>
    %398 = vector.extract_strided_slice %396 {offsets = [0, 32], sizes = [16, 32], strides = [1, 1]} : vector<16x64xf32> to vector<16x32xf32>
    %c1_144 = arith.constant 1 : index
    %c0_145 = arith.constant 0 : index
    %c0_146 = arith.constant 0 : index
    %399 = vector.load %arg15[%c1_144, %c0_145, %c0_146] : memref<2x32x32xbf16, #tpu.memory_space<vmem>>, vector<1x32x32xbf16>
    %400 = vector.shape_cast %399 : vector<1x32x32xbf16> to vector<32x32xbf16>
    %401 = vector.extract_strided_slice %392 {offsets = [0, 0], sizes = [16, 8], strides = [1, 1]} : vector<16x32xf32> to vector<16x8xf32>
    %402 = vector.shape_cast %401 : vector<16x8xf32> to vector<2x8x8xf32>
    %403 = vector.extract_strided_slice %392 {offsets = [0, 8], sizes = [16, 8], strides = [1, 1]} : vector<16x32xf32> to vector<16x8xf32>
    %404 = vector.shape_cast %403 : vector<16x8xf32> to vector<2x8x8xf32>
    %405 = vector.extract_strided_slice %392 {offsets = [0, 16], sizes = [16, 8], strides = [1, 1]} : vector<16x32xf32> to vector<16x8xf32>
    %406 = vector.shape_cast %405 : vector<16x8xf32> to vector<2x8x8xf32>
    %407 = vector.extract_strided_slice %392 {offsets = [0, 24], sizes = [16, 8], strides = [1, 1]} : vector<16x32xf32> to vector<16x8xf32>
    %408 = vector.shape_cast %407 : vector<16x8xf32> to vector<2x8x8xf32>
    %409 = tpu.concatenate %402, %404, %406, %408 in 0 : vector<2x8x8xf32>, vector<2x8x8xf32>, vector<2x8x8xf32>, vector<2x8x8xf32> -> vector<8x8x8xf32>
    %410 = vector.extract_strided_slice %397 {offsets = [0, 0], sizes = [16, 8], strides = [1, 1]} : vector<16x32xf32> to vector<16x8xf32>
    %411 = vector.shape_cast %410 : vector<16x8xf32> to vector<2x8x8xf32>
    %412 = vector.extract_strided_slice %397 {offsets = [0, 8], sizes = [16, 8], strides = [1, 1]} : vector<16x32xf32> to vector<16x8xf32>
    %413 = vector.shape_cast %412 : vector<16x8xf32> to vector<2x8x8xf32>
    %414 = vector.extract_strided_slice %397 {offsets = [0, 16], sizes = [16, 8], strides = [1, 1]} : vector<16x32xf32> to vector<16x8xf32>
    %415 = vector.shape_cast %414 : vector<16x8xf32> to vector<2x8x8xf32>
    %416 = vector.extract_strided_slice %397 {offsets = [0, 24], sizes = [16, 8], strides = [1, 1]} : vector<16x32xf32> to vector<16x8xf32>
    %417 = vector.shape_cast %416 : vector<16x8xf32> to vector<2x8x8xf32>
    %418 = tpu.concatenate %411, %413, %415, %417 in 0 : vector<2x8x8xf32>, vector<2x8x8xf32>, vector<2x8x8xf32>, vector<2x8x8xf32> -> vector<8x8x8xf32>
    %419 = tpu.transpose %418, [0, 2, 1] : vector<8x8x8xf32> -> vector<8x8x8xf32>
    %420 = vector.extract_strided_slice %398 {offsets = [0, 0], sizes = [16, 8], strides = [1, 1]} : vector<16x32xf32> to vector<16x8xf32>
    %421 = vector.shape_cast %420 : vector<16x8xf32> to vector<2x8x8xf32>
    %422 = vector.extract_strided_slice %398 {offsets = [0, 8], sizes = [16, 8], strides = [1, 1]} : vector<16x32xf32> to vector<16x8xf32>
    %423 = vector.shape_cast %422 : vector<16x8xf32> to vector<2x8x8xf32>
    %424 = vector.extract_strided_slice %398 {offsets = [0, 16], sizes = [16, 8], strides = [1, 1]} : vector<16x32xf32> to vector<16x8xf32>
    %425 = vector.shape_cast %424 : vector<16x8xf32> to vector<2x8x8xf32>
    %426 = vector.extract_strided_slice %398 {offsets = [0, 24], sizes = [16, 8], strides = [1, 1]} : vector<16x32xf32> to vector<16x8xf32>
    %427 = vector.shape_cast %426 : vector<16x8xf32> to vector<2x8x8xf32>
    %428 = tpu.concatenate %421, %423, %425, %427 in 0 : vector<2x8x8xf32>, vector<2x8x8xf32>, vector<2x8x8xf32>, vector<2x8x8xf32> -> vector<8x8x8xf32>
    "tpu.trace_start"() <{level = 10 : i32, message = "aqd,adk->aqk"}> : () -> ()
    %cst_147 = arith.constant dense<0.000000e+00> : vector<8x8x8xf32>
    %429 = tpu.matmul %409, %419, %cst_147 {dimension_numbers = #tpu.dot_dimension_numbers<[2], [1], [1], [2], [0, 0, 0, 1, 1, 2], [0], [0]>} : vector<8x8x8xf32>, vector<8x8x8xf32>, vector<8x8x8xf32> -> vector<8x8x8xf32>
    "tpu.trace_stop"() : () -> ()
    %cst_148 = arith.constant dense<0xFF800000> : vector<8x8xf32>
    %430 = vector.multi_reduction <maximumf>, %429, %cst_148 [2] : vector<8x8x8xf32> to vector<8x8xf32>
    %431 = vector.shape_cast %430 : vector<8x8xf32> to vector<8x8x1xf32>
    %432 = vector.broadcast %431 : vector<8x8x1xf32> to vector<8x8x8xf32>
    %433 = arith.subf %429, %432 : vector<8x8x8xf32>
    %434 = math.exp %433 : vector<8x8x8xf32>
    %cst_149 = arith.constant dense<0.000000e+00> : vector<8x8xf32>
    %435 = vector.multi_reduction <add>, %434, %cst_149 [2] : vector<8x8x8xf32> to vector<8x8xf32>
    %436 = vector.shape_cast %435 : vector<8x8xf32> to vector<8x8x1xf32>
    %437 = tpu.reciprocal %436 {approx = true} : vector<8x8x1xf32> -> vector<8x8x1xf32>
    %438 = vector.broadcast %437 : vector<8x8x1xf32> to vector<8x8x8xf32>
    %439 = arith.mulf %434, %438 : vector<8x8x8xf32>
    "tpu.trace_start"() <{level = 10 : i32, message = "aqk,akd->aqd"}> : () -> ()
    %cst_150 = arith.constant dense<0.000000e+00> : vector<8x8x8xf32>
    %440 = tpu.matmul %439, %428, %cst_150 {dimension_numbers = #tpu.dot_dimension_numbers<[2], [1], [1], [2], [0, 0, 0, 1, 1, 2], [0], [0]>} : vector<8x8x8xf32>, vector<8x8x8xf32>, vector<8x8x8xf32> -> vector<8x8x8xf32>
    "tpu.trace_stop"() : () -> ()
    %441 = vector.extract_strided_slice %440 {offsets = [0, 0, 0], sizes = [2, 8, 8], strides = [1, 1, 1]} : vector<8x8x8xf32> to vector<2x8x8xf32>
    %442 = vector.shape_cast %441 : vector<2x8x8xf32> to vector<16x8xf32>
    %443 = vector.extract_strided_slice %440 {offsets = [2, 0, 0], sizes = [2, 8, 8], strides = [1, 1, 1]} : vector<8x8x8xf32> to vector<2x8x8xf32>
    %444 = vector.shape_cast %443 : vector<2x8x8xf32> to vector<16x8xf32>
    %445 = vector.extract_strided_slice %440 {offsets = [4, 0, 0], sizes = [2, 8, 8], strides = [1, 1, 1]} : vector<8x8x8xf32> to vector<2x8x8xf32>
    %446 = vector.shape_cast %445 : vector<2x8x8xf32> to vector<16x8xf32>
    %447 = vector.extract_strided_slice %440 {offsets = [6, 0, 0], sizes = [2, 8, 8], strides = [1, 1, 1]} : vector<8x8x8xf32> to vector<2x8x8xf32>
    %448 = vector.shape_cast %447 : vector<2x8x8xf32> to vector<16x8xf32>
    %449 = tpu.concatenate %442, %444, %446, %448 in 1 : vector<16x8xf32>, vector<16x8xf32>, vector<16x8xf32>, vector<16x8xf32> -> vector<16x32xf32>
    %450 = arith.truncf %449 : vector<16x32xf32> to vector<16x32xbf16>
    %cst_151 = arith.constant dense<0.000000e+00> : vector<16x32xf32>
    %451 = tpu.matmul %450, %400, %cst_151 {dimension_numbers = #tpu.dot_dimension_numbers<[1], [0], [0], [1], [0, 0, 1, 1], [], []>} : vector<16x32xbf16>, vector<32x32xbf16>, vector<16x32xf32> -> vector<16x32xf32>
    %452 = arith.addf %360, %451 : vector<16x32xf32>
    %c1_152 = arith.constant 1 : index
    %c0_153 = arith.constant 0 : index
    %c0_154 = arith.constant 0 : index
    %453 = vector.load %arg16[%c1_152, %c0_153, %c0_154] : memref<2x1x32xf32, #tpu.memory_space<vmem>>, vector<1x1x32xf32>
    %454 = vector.shape_cast %453 : vector<1x1x32xf32> to vector<1x32xf32>
    %c1_155 = arith.constant 1 : index
    %c0_156 = arith.constant 0 : index
    %c0_157 = arith.constant 0 : index
    %455 = vector.load %arg17[%c1_155, %c0_156, %c0_157] : memref<2x1x32xf32, #tpu.memory_space<vmem>>, vector<1x1x32xf32>
    %456 = vector.shape_cast %455 : vector<1x1x32xf32> to vector<1x32xf32>
    %cst_158 = arith.constant dense<0.000000e+00> : vector<16xf32>
    %457 = vector.multi_reduction <add>, %452, %cst_158 [1] : vector<16x32xf32> to vector<16xf32>
    %458 = vector.shape_cast %457 : vector<16xf32> to vector<16x1xf32>
    %cst_159 = arith.constant 3.200000e+01 : f32
    %459 = vector.broadcast %cst_159 : f32 to vector<16x1xf32>
    %460 = arith.divf %458, %459 : vector<16x1xf32>
    %461 = vector.broadcast %460 : vector<16x1xf32> to vector<16x32xf32>
    %462 = arith.subf %452, %461 : vector<16x32xf32>
    %463 = arith.mulf %462, %462 : vector<16x32xf32>
    %cst_160 = arith.constant dense<0.000000e+00> : vector<16xf32>
    %464 = vector.multi_reduction <add>, %463, %cst_160 [1] : vector<16x32xf32> to vector<16xf32>
    %465 = vector.shape_cast %464 : vector<16xf32> to vector<16x1xf32>
    %cst_161 = arith.constant 0.0322580636 : f32
    %466 = vector.broadcast %cst_161 : f32 to vector<16x1xf32>
    %467 = arith.mulf %465, %466 : vector<16x1xf32>
    %468 = math.sqrt %467 : vector<16x1xf32>
    %cst_162 = arith.constant 9.99999997E-7 : f32
    %469 = vector.broadcast %cst_162 : f32 to vector<16x1xf32>
    %470 = arith.addf %468, %469 : vector<16x1xf32>
    %cst_163 = arith.constant 1.000000e+00 : f32
    %471 = vector.broadcast %cst_163 : f32 to vector<16x1xf32>
    %472 = arith.divf %471, %470 : vector<16x1xf32>
    %473 = vector.broadcast %460 : vector<16x1xf32> to vector<16x32xf32>
    %474 = arith.subf %452, %473 : vector<16x32xf32>
    %475 = vector.broadcast %454 : vector<1x32xf32> to vector<16x32xf32>
    %476 = arith.mulf %475, %474 : vector<16x32xf32>
    %477 = vector.broadcast %472 : vector<16x1xf32> to vector<16x32xf32>
    %478 = arith.mulf %476, %477 : vector<16x32xf32>
    %479 = vector.broadcast %456 : vector<1x32xf32> to vector<16x32xf32>
    %480 = arith.addf %478, %479 : vector<16x32xf32>
    %c1_164 = arith.constant 1 : index
    %c0_165 = arith.constant 0 : index
    %c0_166 = arith.constant 0 : index
    %481 = vector.load %arg18[%c1_164, %c0_165, %c0_166] : memref<2x96x64xbf16, #tpu.memory_space<vmem>>, vector<1x96x64xbf16>
    %482 = vector.shape_cast %481 : vector<1x96x64xbf16> to vector<96x64xbf16>
    %c1_167 = arith.constant 1 : index
    %c0_168 = arith.constant 0 : index
    %c0_169 = arith.constant 0 : index
    %483 = vector.load %arg19[%c1_167, %c0_168, %c0_169] : memref<2x1x64xf32, #tpu.memory_space<vmem>>, vector<1x1x64xf32>
    %484 = vector.shape_cast %483 : vector<1x1x64xf32> to vector<1x64xf32>
    %c2_i32_170 = arith.constant 2 : i32
    %485 = tpu.dynamic_rotate %480 by %c2_i32_170 dim 0 : vector<16x32xf32>, i32 -> vector<16x32xf32>
    %cst_171 = arith.constant 0.000000e+00 : f32
    %486 = vector.shape_cast %15 : vector<16x1xi1> to vector<16x1xi1>
    %487 = vector.broadcast %486 : vector<16x1xi1> to vector<16x32xi1>
    %488 = vector.broadcast %cst_171 : f32 to vector<16x32xf32>
    %489 = arith.select %487, %485, %488 : vector<16x32xi1>, vector<16x32xf32>
    %c1_i32_172 = arith.constant 1 : i32
    %490 = tpu.dynamic_rotate %480 by %c1_i32_172 dim 0 : vector<16x32xf32>, i32 -> vector<16x32xf32>
    %cst_173 = arith.constant 0.000000e+00 : f32
    %491 = vector.shape_cast %13 : vector<16x1xi1> to vector<16x1xi1>
    %492 = vector.broadcast %491 : vector<16x1xi1> to vector<16x32xi1>
    %493 = vector.broadcast %cst_173 : f32 to vector<16x32xf32>
    %494 = arith.select %492, %490, %493 : vector<16x32xi1>, vector<16x32xf32>
    %495 = tpu.concatenate %489, %494, %480 in 1 : vector<16x32xf32>, vector<16x32xf32>, vector<16x32xf32> -> vector<16x96xf32>
    %496 = arith.truncf %495 : vector<16x96xf32> to vector<16x96xbf16>
    %cst_174 = arith.constant dense<0.000000e+00> : vector<16x64xf32>
    %497 = tpu.matmul %496, %482, %cst_174 {dimension_numbers = #tpu.dot_dimension_numbers<[1], [0], [0], [1], [0, 0, 1, 1], [], []>} : vector<16x96xbf16>, vector<96x64xbf16>, vector<16x64xf32> -> vector<16x64xf32>
    %498 = vector.broadcast %484 : vector<1x64xf32> to vector<16x64xf32>
    %499 = arith.addf %497, %498 : vector<16x64xf32>
    %cst_175 = arith.constant 0.000000e+00 : f32
    %500 = vector.broadcast %cst_175 : f32 to vector<16x64xf32>
    %501 = arith.maximumf %499, %500 : vector<16x64xf32>
    %c1_176 = arith.constant 1 : index
    %c0_177 = arith.constant 0 : index
    %c0_178 = arith.constant 0 : index
    %502 = vector.load %arg20[%c1_176, %c0_177, %c0_178] : memref<2x192x32xbf16, #tpu.memory_space<vmem>>, vector<1x192x32xbf16>
    %503 = vector.shape_cast %502 : vector<1x192x32xbf16> to vector<192x32xbf16>
    %c1_179 = arith.constant 1 : index
    %c0_180 = arith.constant 0 : index
    %c0_181 = arith.constant 0 : index
    %504 = vector.load %arg21[%c1_179, %c0_180, %c0_181] : memref<2x1x32xf32, #tpu.memory_space<vmem>>, vector<1x1x32xf32>
    %505 = vector.shape_cast %504 : vector<1x1x32xf32> to vector<1x32xf32>
    %c2_i32_182 = arith.constant 2 : i32
    %506 = tpu.dynamic_rotate %501 by %c2_i32_182 dim 0 : vector<16x64xf32>, i32 -> vector<16x64xf32>
    %cst_183 = arith.constant 0.000000e+00 : f32
    %507 = vector.shape_cast %15 : vector<16x1xi1> to vector<16x1xi1>
    %508 = vector.broadcast %507 : vector<16x1xi1> to vector<16x64xi1>
    %509 = vector.broadcast %cst_183 : f32 to vector<16x64xf32>
    %510 = arith.select %508, %506, %509 : vector<16x64xi1>, vector<16x64xf32>
    %c1_i32_184 = arith.constant 1 : i32
    %511 = tpu.dynamic_rotate %501 by %c1_i32_184 dim 0 : vector<16x64xf32>, i32 -> vector<16x64xf32>
    %cst_185 = arith.constant 0.000000e+00 : f32
    %512 = vector.shape_cast %13 : vector<16x1xi1> to vector<16x1xi1>
    %513 = vector.broadcast %512 : vector<16x1xi1> to vector<16x64xi1>
    %514 = vector.broadcast %cst_185 : f32 to vector<16x64xf32>
    %515 = arith.select %513, %511, %514 : vector<16x64xi1>, vector<16x64xf32>
    %516 = tpu.concatenate %510, %515, %501 in 1 : vector<16x64xf32>, vector<16x64xf32>, vector<16x64xf32> -> vector<16x192xf32>
    %517 = arith.truncf %516 : vector<16x192xf32> to vector<16x192xbf16>
    %cst_186 = arith.constant dense<0.000000e+00> : vector<16x32xf32>
    %518 = tpu.matmul %517, %503, %cst_186 {dimension_numbers = #tpu.dot_dimension_numbers<[1], [0], [0], [1], [0, 0, 1, 1], [], []>} : vector<16x192xbf16>, vector<192x32xbf16>, vector<16x32xf32> -> vector<16x32xf32>
    %519 = vector.broadcast %505 : vector<1x32xf32> to vector<16x32xf32>
    %520 = arith.addf %518, %519 : vector<16x32xf32>
    %cst_187 = arith.constant 0.000000e+00 : f32
    %521 = vector.broadcast %cst_187 : f32 to vector<16x32xf32>
    %522 = arith.maximumf %520, %521 : vector<16x32xf32>
    %523 = arith.addf %452, %522 : vector<16x32xf32>
    %c0_188 = arith.constant 0 : index
    %c0_189 = arith.constant 0 : index
    %524 = vector.load %arg22[%c0_188, %c0_189] : memref<1x32xf32, #tpu.memory_space<vmem>>, vector<1x32xf32>
    %c0_190 = arith.constant 0 : index
    %c0_191 = arith.constant 0 : index
    %525 = vector.load %arg23[%c0_190, %c0_191] : memref<1x32xf32, #tpu.memory_space<vmem>>, vector<1x32xf32>
    %cst_192 = arith.constant dense<0.000000e+00> : vector<16xf32>
    %526 = vector.multi_reduction <add>, %523, %cst_192 [1] : vector<16x32xf32> to vector<16xf32>
    %527 = vector.shape_cast %526 : vector<16xf32> to vector<16x1xf32>
    %cst_193 = arith.constant 3.200000e+01 : f32
    %528 = vector.broadcast %cst_193 : f32 to vector<16x1xf32>
    %529 = arith.divf %527, %528 : vector<16x1xf32>
    %530 = vector.broadcast %529 : vector<16x1xf32> to vector<16x32xf32>
    %531 = arith.subf %523, %530 : vector<16x32xf32>
    %532 = arith.mulf %531, %531 : vector<16x32xf32>
    %cst_194 = arith.constant dense<0.000000e+00> : vector<16xf32>
    %533 = vector.multi_reduction <add>, %532, %cst_194 [1] : vector<16x32xf32> to vector<16xf32>
    %534 = vector.shape_cast %533 : vector<16xf32> to vector<16x1xf32>
    %cst_195 = arith.constant 0.0322580636 : f32
    %535 = vector.broadcast %cst_195 : f32 to vector<16x1xf32>
    %536 = arith.mulf %534, %535 : vector<16x1xf32>
    %537 = math.sqrt %536 : vector<16x1xf32>
    %cst_196 = arith.constant 9.99999997E-7 : f32
    %538 = vector.broadcast %cst_196 : f32 to vector<16x1xf32>
    %539 = arith.addf %537, %538 : vector<16x1xf32>
    %cst_197 = arith.constant 1.000000e+00 : f32
    %540 = vector.broadcast %cst_197 : f32 to vector<16x1xf32>
    %541 = arith.divf %540, %539 : vector<16x1xf32>
    %542 = vector.broadcast %529 : vector<16x1xf32> to vector<16x32xf32>
    %543 = arith.subf %523, %542 : vector<16x32xf32>
    %544 = vector.broadcast %524 : vector<1x32xf32> to vector<16x32xf32>
    %545 = arith.mulf %544, %543 : vector<16x32xf32>
    %546 = vector.broadcast %541 : vector<16x1xf32> to vector<16x32xf32>
    %547 = arith.mulf %545, %546 : vector<16x32xf32>
    %548 = vector.broadcast %525 : vector<1x32xf32> to vector<16x32xf32>
    %549 = arith.addf %547, %548 : vector<16x32xf32>
    %c0_198 = arith.constant 0 : index
    %c0_199 = arith.constant 0 : index
    %c0_200 = arith.constant 0 : index
    %550 = vector.load %arg24[%c0_198, %c0_199, %c0_200] : memref<1x16x32xf32, #tpu.memory_space<vmem>>, vector<1x16x32xf32>
    %551 = vector.shape_cast %550 : vector<1x16x32xf32> to vector<16x32xf32>
    %552 = vector.shape_cast %549 : vector<16x32xf32> to vector<1x16x32xf32>
    tpu.vector_store %arg24[%c0_198, %c0_199, %c0_200], %552 {strides = array<i32>} : memref<1x16x32xf32, #tpu.memory_space<vmem>>, vector<1x16x32xf32>,
    return
  }
  func.func @transform_0(%arg0: i32) -> (i32, i32, i32) {
    %c0_i32 = arith.constant 0 : i32
    %c0_i32_0 = arith.constant 0 : i32
    %c0_i32_1 = arith.constant 0 : i32
    return %arg0, %c0_i32, %c0_i32_0 : i32, i32, i32
  }
  func.func @transform_1(%arg0: i32) -> (i32, i32, i32) {
    %c0_i32 = arith.constant 0 : i32
    %c0_i32_0 = arith.constant 0 : i32
    %c0_i32_1 = arith.constant 0 : i32
    return %arg0, %c0_i32, %c0_i32_0 : i32, i32, i32
  }
  func.func @transform_2(%arg0: i32) -> (i32, i32) {
    %c0_i32 = arith.constant 0 : i32
    %c0_i32_0 = arith.constant 0 : i32
    %c0_i32_1 = arith.constant 0 : i32
    return %c0_i32, %c0_i32_0 : i32, i32
  }
  func.func @transform_3(%arg0: i32) -> (i32, i32) {
    %c0_i32 = arith.constant 0 : i32
    %c0_i32_0 = arith.constant 0 : i32
    %c0_i32_1 = arith.constant 0 : i32
    return %c0_i32, %c0_i32_0 : i32, i32
  }
  func.func @transform_4(%arg0: i32) -> (i32, i32) {
    %c0_i32 = arith.constant 0 : i32
    %c0_i32_0 = arith.constant 0 : i32
    %c0_i32_1 = arith.constant 0 : i32
    return %c0_i32, %c0_i32_0 : i32, i32
  }
  func.func @transform_5(%arg0: i32) -> (i32, i32) {
    %c0_i32 = arith.constant 0 : i32
    %c0_i32_0 = arith.constant 0 : i32
    %c0_i32_1 = arith.constant 0 : i32
    return %c0_i32, %c0_i32_0 : i32, i32
  }
  func.func @transform_6(%arg0: i32) -> (i32, i32, i32) {
    %c0_i32 = arith.constant 0 : i32
    %c0_i32_0 = arith.constant 0 : i32
    %c0_i32_1 = arith.constant 0 : i32
    %c0_i32_2 = arith.constant 0 : i32
    return %c0_i32, %c0_i32_0, %c0_i32_1 : i32, i32, i32
  }
  func.func @transform_7(%arg0: i32) -> (i32, i32, i32) {
    %c0_i32 = arith.constant 0 : i32
    %c0_i32_0 = arith.constant 0 : i32
    %c0_i32_1 = arith.constant 0 : i32
    %c0_i32_2 = arith.constant 0 : i32
    return %c0_i32, %c0_i32_0, %c0_i32_1 : i32, i32, i32
  }
  func.func @transform_8(%arg0: i32) -> (i32, i32, i32) {
    %c0_i32 = arith.constant 0 : i32
    %c0_i32_0 = arith.constant 0 : i32
    %c0_i32_1 = arith.constant 0 : i32
    %c0_i32_2 = arith.constant 0 : i32
    return %c0_i32, %c0_i32_0, %c0_i32_1 : i32, i32, i32
  }
  func.func @transform_9(%arg0: i32) -> (i32, i32, i32) {
    %c0_i32 = arith.constant 0 : i32
    %c0_i32_0 = arith.constant 0 : i32
    %c0_i32_1 = arith.constant 0 : i32
    %c0_i32_2 = arith.constant 0 : i32
    return %c0_i32, %c0_i32_0, %c0_i32_1 : i32, i32, i32
  }
  func.func @transform_10(%arg0: i32) -> (i32, i32, i32) {
    %c0_i32 = arith.constant 0 : i32
    %c0_i32_0 = arith.constant 0 : i32
    %c0_i32_1 = arith.constant 0 : i32
    %c0_i32_2 = arith.constant 0 : i32
    return %c0_i32, %c0_i32_0, %c0_i32_1 : i32, i32, i32
  }
  func.func @transform_11(%arg0: i32) -> (i32, i32, i32) {
    %c0_i32 = arith.constant 0 : i32
    %c0_i32_0 = arith.constant 0 : i32
    %c0_i32_1 = arith.constant 0 : i32
    %c0_i32_2 = arith.constant 0 : i32
    return %c0_i32, %c0_i32_0, %c0_i32_1 : i32, i32, i32
  }
  func.func @transform_12(%arg0: i32) -> (i32, i32, i32) {
    %c0_i32 = arith.constant 0 : i32
    %c0_i32_0 = arith.constant 0 : i32
    %c0_i32_1 = arith.constant 0 : i32
    %c0_i32_2 = arith.constant 0 : i32
    return %c0_i32, %c0_i32_0, %c0_i32_1 : i32, i32, i32
  }
  func.func @transform_13(%arg0: i32) -> (i32, i32, i32) {
    %c0_i32 = arith.constant 0 : i32
    %c0_i32_0 = arith.constant 0 : i32
    %c0_i32_1 = arith.constant 0 : i32
    %c0_i32_2 = arith.constant 0 : i32
    return %c0_i32, %c0_i32_0, %c0_i32_1 : i32, i32, i32
  }
  func.func @transform_14(%arg0: i32) -> (i32, i32, i32) {
    %c0_i32 = arith.constant 0 : i32
    %c0_i32_0 = arith.constant 0 : i32
    %c0_i32_1 = arith.constant 0 : i32
    %c0_i32_2 = arith.constant 0 : i32
    return %c0_i32, %c0_i32_0, %c0_i32_1 : i32, i32, i32
  }
  func.func @transform_15(%arg0: i32) -> (i32, i32, i32) {
    %c0_i32 = arith.constant 0 : i32
    %c0_i32_0 = arith.constant 0 : i32
    %c0_i32_1 = arith.constant 0 : i32
    %c0_i32_2 = arith.constant 0 : i32
    return %c0_i32, %c0_i32_0, %c0_i32_1 : i32, i32, i32
  }
  func.func @transform_16(%arg0: i32) -> (i32, i32, i32) {
    %c0_i32 = arith.constant 0 : i32
    %c0_i32_0 = arith.constant 0 : i32
    %c0_i32_1 = arith.constant 0 : i32
    %c0_i32_2 = arith.constant 0 : i32
    return %c0_i32, %c0_i32_0, %c0_i32_1 : i32, i32, i32
  }
  func.func @transform_17(%arg0: i32) -> (i32, i32, i32) {
    %c0_i32 = arith.constant 0 : i32
    %c0_i32_0 = arith.constant 0 : i32
    %c0_i32_1 = arith.constant 0 : i32
    %c0_i32_2 = arith.constant 0 : i32
    return %c0_i32, %c0_i32_0, %c0_i32_1 : i32, i32, i32
  }
  func.func @transform_18(%arg0: i32) -> (i32, i32, i32) {
    %c0_i32 = arith.constant 0 : i32
    %c0_i32_0 = arith.constant 0 : i32
    %c0_i32_1 = arith.constant 0 : i32
    %c0_i32_2 = arith.constant 0 : i32
    return %c0_i32, %c0_i32_0, %c0_i32_1 : i32, i32, i32
  }
  func.func @transform_19(%arg0: i32) -> (i32, i32, i32) {
    %c0_i32 = arith.constant 0 : i32
    %c0_i32_0 = arith.constant 0 : i32
    %c0_i32_1 = arith.constant 0 : i32
    %c0_i32_2 = arith.constant 0 : i32
    return %c0_i32, %c0_i32_0, %c0_i32_1 : i32, i32, i32
  }
  func.func @transform_20(%arg0: i32) -> (i32, i32, i32) {
    %c0_i32 = arith.constant 0 : i32
    %c0_i32_0 = arith.constant 0 : i32
    %c0_i32_1 = arith.constant 0 : i32
    %c0_i32_2 = arith.constant 0 : i32
    return %c0_i32, %c0_i32_0, %c0_i32_1 : i32, i32, i32
  }
  func.func @transform_21(%arg0: i32) -> (i32, i32) {
    %c0_i32 = arith.constant 0 : i32
    %c0_i32_0 = arith.constant 0 : i32
    %c0_i32_1 = arith.constant 0 : i32
    return %c0_i32, %c0_i32_0 : i32, i32
  }
  func.func @transform_22(%arg0: i32) -> (i32, i32) {
    %c0_i32 = arith.constant 0 : i32
    %c0_i32_0 = arith.constant 0 : i32
    %c0_i32_1 = arith.constant 0 : i32
    return %c0_i32, %c0_i32_0 : i32, i32
  }
  func.func @transform_23(%arg0: i32) -> (i32, i32, i32) {
    %c0_i32 = arith.constant 0 : i32
    %c0_i32_0 = arith.constant 0 : i32
    %c0_i32_1 = arith.constant 0 : i32
    return %arg0, %c0_i32, %c0_i32_0 : i32, i32, i32
  }
}

</mosaic_0001>

<bundles_post_ra>
// kernel: tpu_custom_call.1
= control target key start
LH: loop header
LB: loop body
LE: loop exit
PB: predicated region body
PF: predicated region fallthrough
CT: control target
= control target key end

     0   :  { %s5957_s0 = inlined_call_operand.vmem [shape: f32[1,16,32], index: 0, kind: input, shape index: {}]   ;;  %s5958_s1 = inlined_call_operand.vmem [shape: f32[1,16,32], index: 1, kind: input, shape index: {}]   ;;  %s5959_s2 = inlined_call_operand.vmem [shape: f32[16,32], index: 2, kind: input, shape index: {}]   ;;  %s5960_s3 = inlined_call_operand.vmem [shape: bf16[32,32], index: 3, kind: input, shape index: {}]   ;;  %s5961_s4 = inlined_call_operand.vmem [shape: f32[8,8], index: 4, kind: input, shape index: {}]   ;;  %s5962_s5 = inlined_call_operand.vmem [shape: s32[16,1], index: 5, kind: input, shape index: {}]   ;;  %s5963_s6 = inlined_call_operand.vmem [shape: f32[2,1,32], index: 6, kind: input, shape index: {}]   ;;  %s5964_s7 = inlined_call_operand.vmem [shape: f32[2,1,32], index: 7, kind: input, shape index: {}]   ;;  %s5965_s8 = inlined_call_operand.vmem [shape: bf16[2,32,96], index: 8, kind: input, shape index: {}]   ;;  %s5966_s9 = inlined_call_operand.vmem [shape: bf16[2,32,32], index: 9, kind: input, shape index: {}]   ;;  %s5967_s10 = inlined_call_operand.vmem [shape: f32[2,1,32], index: 10, kind: input, shape index: {}]   ;;  %s5968_s11 = inlined_call_operand.vmem [shape: f32[2,1,32], index: 11, kind: input, shape index: {}]   ;;  %s5969_s12 = inlined_call_operand.vmem [shape: bf16[2,32,32], index: 12, kind: input, shape index: {}]   ;;  %s5970_s13 = inlined_call_operand.vmem [shape: bf16[2,32,64], index: 13, kind: input, shape index: {}]   ;;  %s5971_s14 = inlined_call_operand.vmem [shape: bf16[2,32,32], index: 14, kind: input, shape index: {}]   ;;  %s5972_s15 = inlined_call_operand.vmem [shape: f32[2,1,32], index: 15, kind: input, shape index: {}]   ;;  %s5973_s16 = inlined_call_operand.vmem [shape: f32[2,1,32], index: 16, kind: input, shape index: {}]   ;;  %s5974_s17 = inlined_call_operand.vmem [shape: bf16[2,96,64], index: 17, kind: input, shape index: {}]   ;;  %s5975_s18 = inlined_call_operand.vmem [shape: f32[2,1,64], index: 18, kind: input, shape index: {}]   ;;  %s5976_s19 = inlined_call_operand.vmem [shape: bf16[2,192,32], index: 19, kind: input, shape index: {}]   ;;  %s5977_s20 = inlined_call_operand.vmem [shape: f32[2,1,32], index: 20, kind: input, shape index: {}]   ;;  %s5978_s21 = inlined_call_operand.vmem [shape: f32[1,32], index: 21, kind: input, shape index: {}]   ;;  %s5979_s22 = inlined_call_operand.vmem [shape: f32[1,32], index: 22, kind: input, shape index: {}]   ;;  %s5980_s23 = inlined_call_operand.hbm [shape: f32[1,16,32], index: 23, kind: output, shape index: {}]  }
   0x1   :  { %6009 = sst [smem:[#allocation5_spill]] %s5957_s0 }
   0x2   :  { %6010 = sst [smem:[#allocation6_spill]] %s5958_s1 }
   0x3   :  { %6011 = sst [smem:[#allocation7_spill]] %s5959_s2 }
   0x4   :  { %6012 = sst [smem:[#allocation8_spill]] %s5960_s3 }
   0x5   :  { %6013 = sst [smem:[#allocation9_spill]] %s5961_s4 }
   0x6   :  { %6014 = sst [smem:[#allocation10_spill]] %s5962_s5 }
   0x7   :  { %6015 = sst [smem:[#allocation11_spill]] %s5963_s6 }
   0x8   :  { %6016 = sst [smem:[#allocation12_spill]] %s5964_s7 }
   0x9   :  { %6017 = sst [smem:[#allocation13_spill]] %s5978_s21 }
   0xa   :  { %6018 = sst [smem:[#allocation14_spill]] %s5979_s22 }
   0xb   :  { %6019 = sst [smem:[#allocation15_spill]] %s5980_s23 }
   0xc   :  { %s6020_s24 = sld [smem:[#allocation8_spill]]  ;;  %vm97_vm0 = vcmask 261120  }
   0xd   :  { %s6021_s2 = sld [smem:[#allocation5_spill]] }
  0x12   :  { %v4291_v0 = vld [vmem:[%s6020_s24 + $0x8] sm:$0xff]  ;;  %v4290_v1 = vld [vmem:[%s6020_s24] sm:$0xff] }
  0x13   :  { %v76_v2 = vld [vmem:[%s6021_s2] sm:$0xff]  ;;  %v77_v3 = vld [vmem:[%s6021_s2 + $0x8] sm:$0xff]  ;;  %107 = vmatpush.bf16.msra.mxu0 %v4291_v0 }
  0x14   :  { %v78_v4 = vpack.c.bf16 %v77_v3, %v76_v2 }
  0x17   :  { %108 = vmatpush.bf16.msra.mxu0 %v4290_v1 }
  0x18   :  { %28 = vsyncpa [#allocation3], 0  ;;  %s6022_s29 = sld [smem:[#allocation7_spill]]  ;;  %v4765_v13 = vmov 32.0   ;;  %v4293_v30 = vld [vmem:[%s5965_s8 + $0x8] sm:$0xff]  ;;  %v4292_v32 = vld [vmem:[%s5965_s8] sm:$0xff] }
  0x19   :  { %4552 = vrcp.f32 %v4765_v13  ;;  %247 = vmatpush.bf16.msra.mxu1 %v4293_v30  ;;  %s6023_s26 = sld [smem:[#allocation11_spill]]  ;;  %s5999_s7 = smov 112   ;;  %vm275_vm14 = vcmask 64512   ;;  %vm804_vm15 = vcmask 130048  }
  0x1a   :  { %3891 = vmatmul.msk.bf16.vlgmr.msra.gmra.mxu0 %vm97_vm0, %v78_v4  ;;  %s6024_s27 = sld [smem:[#allocation12_spill]]  ;;  %s6001_s28 = smov 120  }
  0x1b   :  { %s6003_s3 = smov 104   ;;  %s6025_s30 = sld [smem:[#allocation9_spill]] }
  0x1c   :  { %s5989_s24 = smov 64   ;;  %s5995_s25 = smov 8  }
  0x1d   :  { %248 = vmatpush.bf16.msra.mxu1 %v4292_v32  ;;  %s5993_s5 = smov 24   ;;  %s5991_s1 = smov 16  }
  0x1e   :  { %v83_v5 = vld [vmem:[%s6022_s29] sm:$0xff]  ;;  %v84_v9 = vld [vmem:[%s6022_s29 + $0x8] sm:$0xff]  ;;  %s5997_s29 = smov 96   ;;  %s6027_s4 = smov 96  }
  0x1f   :  { %v4553_v14 = vpop.eup %4552  ;;  %v4534_v3 = vld [vmem:[%s6023_s26] ss:$0 sm:$0xff]  ;;  %s6028_s2 = smov 8   ;;  %s6029_s6 = smov 24  }
  0x20   :  { %v133_v15 = vmul.f32 32.0, %v4553_v14  ;;  %vm137_vm1 = vweird.f32 %v4553_v14  ;;  %s6030_s0 = smov 16  }
  0x22   :  { %v134_v16 = vsub.f32 1.0, %v133_v15 }
  0x24   :  { %v135_v17 = vmul.f32 %v4553_v14, %v134_v16 }
  0x26   :  { %v136_v18 = vadd.f32 %v4553_v14, %v135_v17 }
  0x28   :  { %v4925_v19 = vsel %vm137_vm1, %v4553_v14, %v136_v18  ;;  %vm807_vm1 = vcmask 195584  }
  0x97   :  { %v110_v6 = vpop.f32.mrf.mxu0 }
  0x98   :  { %v4914_v7 = vadd.f32 %v110_v6, %v83_v5 }
  0x9a   :  { %v126_v8 = vsel %vm97_vm0, %v4914_v7, 0.0 }
  0x9b   :  { %127 = vadd.xlane.f32.xlu0 %v126_v8 }
  0x9f   :  { %v112_v10 = vpop.f32.mrf.mxu0 }
  0xa0   :  { %v4921_v11 = vadd.f32 %v112_v10, %v84_v9 }
  0xa2   :  { %v129_v12 = vsel %vm97_vm0, %v4921_v11, 0.0 }
  0xa3   :  { %130 = vadd.xlane.f32.xlu0 %v129_v12 }
 0x10e   :  { %v128_v20 = vpop.xlane.xlu0 %127 }
 0x10f   :  { %v139_v21 = vmul.f32 %v4925_v19, %v128_v20  ;;  %v4535_v20 = vld [vmem:[%s6024_s27] ss:$0 sm:$0xff] }
 0x111   :  { %v4929_v22 = vsub.f32 %v4914_v7, %v139_v21 }
 0x113   :  { %v143_v23 = vmul.f32 %v4929_v22, %v4929_v22  ;;  %v212_v13 = vmul.f32 %v4534_v3, %v4929_v22 }
 0x115   :  { %v145_v24 = vsel %vm97_vm0, %v143_v23, 0.0 }
 0x116   :  { %146 = vadd.xlane.f32.xlu1 %v145_v24  ;;  %v131_v25 = vpop.xlane.xlu0 %130 }
 0x117   :  { %v140_v26 = vmul.f32 %v4925_v19, %v131_v25 }
 0x119   :  { %v4936_v27 = vsub.f32 %v4921_v11, %v140_v26 }
 0x11b   :  { %v144_v28 = vmul.f32 %v4936_v27, %v4936_v27  ;;  %v213_v16 = vmul.f32 %v4534_v3, %v4936_v27 }
 0x11d   :  { %v148_v29 = vsel %vm97_vm0, %v144_v28, 0.0 }
 0x11e   :  { %149 = vadd.xlane.f32.xlu1 %v148_v29 }
 0x189   :  { %v147_v31 = vpop.xlane.xlu1 %146 }
 0x18a   :  { %v151_v33 = vmul.f32 0.032258064, %v147_v31 }
 0x18c   :  { %4554 = vrsqrt.f32 %v151_v33  ;;  %vm160_vm2 = vcmp.eq.f32.partialorder %v151_v33, inf  ;;  %v163_v46 = vand.u32 2147483648, %v151_v33  ;;  %vm162_vm3 = vcmp.eq.f32.partialorder %v151_v33, 0.0 }
 0x191   :  { %v150_v34 = vpop.xlane.xlu1 %149 }
 0x192   :  { %v4555_v35 = vpop.eup %4554  ;;  %v152_v36 = vmul.f32 0.032258064, %v150_v34 }
 0x193   :  { %v154_v37 = vmul.f32 %v4555_v35, %v151_v33 }
 0x194   :  { %4556 = vrsqrt.f32 %v152_v36  ;;  %vm172_vm4 = vcmp.eq.f32.partialorder %v152_v36, inf  ;;  %v175_v54 = vand.u32 2147483648, %v152_v36  ;;  %vm174_vm5 = vcmp.eq.f32.partialorder %v152_v36, 0.0 }
 0x195   :  { %v155_v38 = vmul.f32 %v4555_v35, %v154_v37 }
 0x197   :  { %v156_v39 = vmul.f32 0.5, %v155_v38 }
 0x199   :  { %v157_v40 = vsub.f32 1.5, %v156_v39 }
 0x19a   :  { %v4557_v41 = vpop.eup %4556 }
 0x19b   :  { %v158_v42 = vmul.f32 %v4555_v35, %v157_v40  ;;  %v166_v43 = vmul.f32 %v4557_v41, %v152_v36 }
 0x19d   :  { %v159_v44 = vmul.f32 %v158_v42, %v151_v33  ;;  %v167_v45 = vmul.f32 %v4557_v41, %v166_v43  ;;  %v117_v42 = vld [vmem:[%s6025_s30] sm:$0xff] }
 0x19f   :  { %v161_v47 = vsel %vm160_vm2, %v151_v33, %v159_v44  ;;  %v168_v48 = vmul.f32 0.5, %v167_v45 }
 0x1a0   :  { %v164_v49 = vsel %vm162_vm3, %v163_v46, %v161_v47 }
 0x1a1   :  { %v169_v50 = vsub.f32 1.5, %v168_v48  ;;  %v177_v51 = vadd.f32 1e-06, %v164_v49 }
 0x1a3   :  { %v170_v52 = vmul.f32 %v4557_v41, %v169_v50  ;;  %4558 = vrcp.f32 %v177_v51  ;;  %v190_v0 = vand.u32 2147483648, %v177_v51  ;;  %vm184_vm7 = vweird.f32 %v177_v51 }
 0x1a4   :  { %v188_v1 = vand.u32 2147483647, %v177_v51 }
 0x1a5   :  { %v171_v53 = vmul.f32 %v170_v52, %v152_v36  ;;  %v191_v6 = vor.u32 1.1754944e-38, %v190_v0 }
 0x1a6   :  { %vm189_vm9 = vcmp.eq.f32.partialorder %v188_v1, 8.507059e+37 }
 0x1a7   :  { %v173_v55 = vsel %vm172_vm4, %v152_v36, %v171_v53 }
 0x1a8   :  { %v176_v56 = vsel %vm174_vm5, %v175_v54, %v173_v55 }
 0x1a9   :  { %v4559_v57 = vpop.eup %4558  ;;  %v178_v58 = vadd.f32 1e-06, %v176_v56 }
 0x1aa   :  { %v180_v59 = vmul.f32 %v4559_v57, %v177_v51  ;;  %vm185_vm6 = vweird.f32 %v4559_v57 }
 0x1ab   :  { %4560 = vrcp.f32 %v178_v58  ;;  %vm186_vm8 = vmor %vm184_vm7, %vm185_vm6  ;;  %v205_v8 = vand.u32 2147483648, %v178_v58  ;;  %v203_v10 = vand.u32 2147483647, %v178_v58  ;;  %vm199_vm11 = vweird.f32 %v178_v58 }
 0x1ac   :  { %v181_v60 = vsub.f32 1.0, %v180_v59 }
 0x1ad   :  { %v206_v15 = vor.u32 1.1754944e-38, %v205_v8  ;;  %vm204_vm13 = vcmp.eq.f32.partialorder %v203_v10, 8.507059e+37 }
 0x1ae   :  { %v182_v61 = vmul.f32 %v4559_v57, %v181_v60 }
 0x1b0   :  { %v183_v62 = vadd.f32 %v4559_v57, %v182_v61 }
 0x1b1   :  { %v4561_v63 = vpop.eup %4560 }
 0x1b2   :  { %v195_v2 = vmul.f32 %v4561_v63, %v178_v58  ;;  %v187_v4 = vsel %vm186_vm8, %v4559_v57, %v183_v62  ;;  %vm200_vm10 = vweird.f32 %v4561_v63 }
 0x1b3   :  { %v192_v12 = vsel %vm189_vm9, %v191_v6, %v187_v4  ;;  %vm201_vm12 = vmor %vm199_vm11, %vm200_vm10 }
 0x1b4   :  { %v196_v5 = vsub.f32 1.0, %v195_v2  ;;  %v214_v18 = vmul.f32 %v212_v13, %v192_v12 }
 0x1b6   :  { %v197_v9 = vmul.f32 %v4561_v63, %v196_v5  ;;  %v219_v24 = vadd.f32 %v4535_v20, %v214_v18 }
 0x1b8   :  { %v198_v14 = vadd.f32 %v4561_v63, %v197_v9 }
 0x1ba   :  { %v202_v17 = vsel %vm201_vm12, %v4561_v63, %v198_v14 }
 0x1bb   :  { %v207_v21 = vsel %vm204_vm13, %v206_v15, %v202_v17 }
 0x1bc   :  { %v215_v23 = vmul.f32 %v213_v16, %v207_v21 }
 0x1be   :  { %v220_v25 = vadd.f32 %v4535_v20, %v215_v23 }
 0x1c0   :  { %v221_v26 = vpack.c.bf16 %v220_v25, %v219_v24 }
 0x1c2   :  { %3900 = vmatmul.msk.bf16.vlgmr.msra.gmra.mxu1 %vm97_vm0, %v221_v26 }
 0x23f   :  { %v4956_v22 = vpop.f32.mrf.mxu1 }
 0x240   :  { %265 = vrot.lane.b32.xlu0 %v4956_v22, %s5999_s7  ;;  %261 = vrot.lane.b32.xlu2 %v4956_v22, %s6001_s28 }
 0x247   :  { %v4962_v27 = vpop.f32.mrf.mxu1 }
 0x248   :  { %300 = vrot.lane.b32.xlu0 %v4962_v27, %s5997_s29  ;;  %267 = vrot.lane.b32.xlu1 %v4962_v27, %s5999_s7  ;;  %v4361_v15 = vpack.i.bf16 %v4962_v27, %v4956_v22 }
 0x249   :  { %263 = vrot.lane.b32.xlu2 %v4962_v27, %s6001_s28 }
 0x251   :  { %269 = vrot.lane.b32.xlu2 %v4956_v22, %s6003_s3 }
 0x259   :  { %271 = vrot.lane.b32.xlu2 %v4962_v27, %s6003_s3 }
 0x261   :  { %273 = vrot.lane.b32.xlu2 %v4956_v22, %s5997_s29 }
 0x29a   :  { %v4976_v28 = vpop.permute.xlu2 %261 }
 0x29b   :  { %326 = vrot.lane.b32.xlu2 %v4976_v28, %s5997_s29 }
 0x2a3   :  { %v4980_v29 = vpop.permute.xlu2 %263 }
 0x2a4   :  { %352 = vrot.lane.b32.xlu1 %v4980_v29, %s5997_s29 }
 0x2ab   :  { %v4984_v30 = vpop.permute.xlu2 %269 }
 0x2ac   :  { %430 = vrot.lane.b32.xlu1 %v4984_v30, %s5997_s29 }
 0x2b2   :  { %v4988_v31 = vpop.permute.xlu0 %265 }
 0x2b3   :  { %v4990_v32 = vpop.permute.xlu2 %271  ;;  %378 = vrot.lane.b32.xlu0 %v4988_v31, %s5997_s29 }
 0x2ba   :  { %v301_v33 = vpop.permute.xlu0 %300  ;;  %v4994_v34 = vpop.permute.xlu1 %267 }
 0x2bb   :  { %v274_v35 = vpop.permute.xlu2 %273  ;;  %3903 = vmatpush.xpose.msk.msra.mxu3 %vm275_vm14, %v301_v33  ;;  %404 = vrot.lane.b32.xlu2 %v4994_v34, %s5997_s29 }
 0x2bc   :  { %456 = vrot.lane.b32.xlu0 %v4990_v32, %s5997_s29  ;;  %3901 = vmatpush.xpose.msk.msra.mxu2 %vm275_vm14, %v274_v35  ;;  %s6031_s29 = sld [smem:[#allocation10_spill]] }
 0x2be   :  { %3904 = vmatmul.msk.f32.vlgmr.msra.gmra.mxu3 %vm275_vm14, %v4962_v27 }
 0x2bf   :  { %3902 = vmatmul.msk.f32.vlgmr.msra.gmra.mxu2 %vm275_vm14, %v4956_v22 }
 0x2f5   :  { %v327_v36 = vpop.permute.xlu2 %326 }
 0x2f6   :  { %3905 = vmatpush.xpose.msk.msrb.mxu2 %vm275_vm14, %v327_v36 }
 0x2f9   :  { %3906 = vmatmul.msk.f32.vlgmr.msrb.gmra.mxu2 %vm275_vm14, %v4976_v28 }
 0x315   :  { %v405_v37 = vpop.permute.xlu2 %404 }
 0x316   :  { %v353_v38 = vpop.permute.xlu1 %352 }
 0x317   :  { %3907 = vmatpush.xpose.msk.msrb.mxu3 %vm275_vm14, %v353_v38 }
 0x31a   :  { %3908 = vmatmul.msk.f32.vlgmr.msrb.gmra.mxu3 %vm275_vm14, %v4980_v29 }
 0x31b   :  { %3911 = vmatpush.xpose.msk.msra.mxu3 %vm275_vm14, %v405_v37 }
 0x31e   :  { %v431_v39 = vpop.permute.xlu1 %430 }
 0x31f   :  { %3913 = vmatpush.xpose.msk.msrb.mxu0 %vm275_vm14, %v431_v39 }
 0x322   :  { %3912 = vmatmul.msk.f32.vlgmr.msra.gmra.mxu3 %vm275_vm14, %v4994_v34  ;;  %3914 = vmatmul.msk.f32.vlgmr.msrb.gmra.mxu0 %vm275_vm14, %v4984_v30 }
 0x325   :  { %v379_v40 = vpop.permute.xlu0 %378 }
 0x326   :  { %3909 = vmatpush.xpose.msk.msra.mxu2 %vm275_vm14, %v379_v40 }
 0x329   :  { %3910 = vmatmul.msk.f32.vlgmr.msra.gmra.mxu2 %vm275_vm14, %v4988_v31 }
 0x32e   :  { %v457_v41 = vpop.permute.xlu0 %456 }
 0x32f   :  { %3915 = vmatpush.xpose.msk.msrb.mxu1 %vm275_vm14, %v457_v41 }
 0x332   :  { %3916 = vmatmul.msk.f32.vlgmr.msrb.gmra.mxu1 %vm275_vm14, %v4990_v32 }
 0x341   :  { %v323_v43 = vpop.f32.mrf.mxu3 }
 0x342   :  { %v297_v44 = vpop.f32.mrf.mxu2  ;;  %v324_v45 = vadd.f32 %v323_v43, %v117_v42 }
 0x343   :  { %v298_v46 = vadd.f32 %v297_v44, %v117_v42 }
 0x344   :  { %v485_v47 = vsel %vm275_vm14, %v324_v45, -inf }
 0x345   :  { %486 = vmax.xlane.f32.xlu1 %v485_v47  ;;  %v482_v48 = vsel %vm275_vm14, %v298_v46, -inf }
 0x346   :  { %483 = vmax.xlane.f32.xlu2 %v482_v48 }
 0x37c   :  { %v349_v49 = vpop.f32.mrf.mxu2 }
 0x37d   :  { %v350_v50 = vadd.f32 %v349_v49, %v117_v42  ;;  %v4376_v49 = vpack.i.bf16 %v4990_v32, %v4984_v30 }
 0x37f   :  { %v488_v51 = vsel %vm275_vm14, %v350_v50, -inf }
 0x380   :  { %489 = vmax.xlane.f32.xlu0 %v488_v51 }
 0x39d   :  { %v375_v55 = vpop.f32.mrf.mxu3 }
 0x39e   :  { %v376_v56 = vadd.f32 %v375_v55, %v117_v42 }
 0x39f   :  { %v453_v52 = vpop.f32.mrf.mxu0 }
 0x3a0   :  { %v454_v53 = vadd.f32 %v453_v52, %v117_v42  ;;  %v491_v57 = vsel %vm275_vm14, %v376_v56, -inf }
 0x3a2   :  { %v500_v54 = vsel %vm275_vm14, %v454_v53, -inf }
 0x3a3   :  { %501 = vmax.xlane.f32.xlu2 %v500_v54 }
 0x3a5   :  { %v427_v12 = vpop.f32.mrf.mxu3 }
 0x3a6   :  { %v428_v13 = vadd.f32 %v427_v12, %v117_v42 }
 0x3a8   :  { %v497_v14 = vsel %vm275_vm14, %v428_v13, -inf }
 0x3ab   :  { %492 = vmax.xlane.f32.xlu2 %v491_v57 }
 0x3ac   :  { %v401_v61 = vpop.f32.mrf.mxu2 }
 0x3ad   :  { %v402_v62 = vadd.f32 %v401_v61, %v117_v42 }
 0x3af   :  { %v479_v58 = vpop.f32.mrf.mxu1  ;;  %v494_v3 = vsel %vm275_vm14, %v402_v62, -inf }
 0x3b0   :  { %v480_v59 = vadd.f32 %v479_v58, %v117_v42 }
 0x3b2   :  { %v503_v60 = vsel %vm275_vm14, %v480_v59, -inf }
 0x3b3   :  { %504 = vmax.xlane.f32.xlu1 %v503_v60 }
 0x3b8   :  { %v487_v63 = vpop.xlane.xlu1 %486 }
 0x3b9   :  { %v507_v0 = vsub.f32 %v324_v45, %v487_v63  ;;  %v484_v1 = vpop.xlane.xlu2 %483 }
 0x3ba   :  { %v506_v2 = vsub.f32 %v298_v46, %v484_v1 }
 0x3bb   :  { %v516_v4 = vmul.f32 1.442695, %v507_v0  ;;  %495 = vmax.xlane.f32.xlu1 %v494_v3 }
 0x3bc   :  { %v514_v5 = vmul.f32 1.442695, %v506_v2 }
 0x3bd   :  { %4562 = vpow2.f32 %v516_v4 }
 0x3be   :  { %4564 = vpow2.f32 %v514_v5 }
 0x3c3   :  { %v5034_v6 = vpop.eup %4562 }
 0x3c4   :  { %v5036_v8 = vpop.eup %4564  ;;  %v533_v9 = vsel %vm275_vm14, %v5034_v6, 0.0 }
 0x3c5   :  { %534 = vadd.xlane.f32.xlu2 %v533_v9  ;;  %v530_v10 = vsel %vm275_vm14, %v5036_v8, 0.0 }
 0x3c6   :  { %531 = vadd.xlane.f32.xlu0 %v530_v10 }
 0x3ce   :  { %498 = vmax.xlane.f32.xlu0 %v497_v14 }
 0x3e2   :  { %4362 = vrot.lane.b32.xlu0 %v4361_v15, %s5989_s24 }
 0x3f3   :  { %v490_v16 = vpop.xlane.xlu0 %489 }
 0x3f4   :  { %v508_v17 = vsub.f32 %v350_v50, %v490_v16 }
 0x3f6   :  { %v518_v18 = vmul.f32 1.442695, %v508_v17 }
 0x3f8   :  { %4566 = vpow2.f32 %v518_v18 }
 0x3fe   :  { %v5046_v20 = vpop.eup %4566 }
 0x3ff   :  { %v536_v21 = vsel %vm275_vm14, %v5046_v20, 0.0 }
 0x400   :  { %537 = vadd.xlane.f32.xlu1 %v536_v21 }
 0x416   :  { %v502_v23 = vpop.xlane.xlu2 %501 }
 0x417   :  { %v512_v24 = vsub.f32 %v454_v53, %v502_v23 }
 0x419   :  { %v526_v25 = vmul.f32 1.442695, %v512_v24 }
 0x41b   :  { %4568 = vpow2.f32 %v526_v25 }
 0x41e   :  { %v493_v26 = vpop.xlane.xlu2 %492 }
 0x41f   :  { %v509_v33 = vsub.f32 %v376_v56, %v493_v26  ;;  %v4366_v56 = vpack.i.bf16 %v4980_v29, %v4976_v28  ;;  %v4371_v28 = vpack.i.bf16 %v4994_v34, %v4988_v31 }
 0x421   :  { %v5050_v22 = vpop.eup %4568  ;;  %v520_v27 = vmul.f32 1.442695, %v509_v33 }
 0x422   :  { %v548_v35 = vsel %vm275_vm14, %v5050_v22, 0.0 }
 0x423   :  { %4570 = vpow2.f32 %v520_v27  ;;  %549 = vadd.xlane.f32.xlu2 %v548_v35 }
 0x426   :  { %v505_v36 = vpop.xlane.xlu1 %504 }
 0x427   :  { %v513_v37 = vsub.f32 %v480_v59, %v505_v36 }
 0x429   :  { %v4571_v38 = vpop.eup %4570  ;;  %v528_v39 = vmul.f32 1.442695, %v513_v37 }
 0x42a   :  { %v539_v40 = vsel %vm275_vm14, %v4571_v38, 0.0 }
 0x42b   :  { %4572 = vpow2.f32 %v528_v39  ;;  %540 = vadd.xlane.f32.xlu0 %v539_v40 }
 0x42e   :  { %v496_v41 = vpop.xlane.xlu1 %495 }
 0x42f   :  { %v510_v42 = vsub.f32 %v402_v62, %v496_v41 }
 0x431   :  { %v5055_v43 = vpop.eup %4572  ;;  %v522_v44 = vmul.f32 1.442695, %v510_v42  ;;  %v4295_v42 = vld [vmem:[%s5966_s9 + $0x8] sm:$0xff] }
 0x432   :  { %v551_v45 = vsel %vm275_vm14, %v5055_v43, 0.0 }
 0x433   :  { %4574 = vpow2.f32 %v522_v44  ;;  %552 = vadd.xlane.f32.xlu1 %v551_v45 }
 0x438   :  { %v535_v53 = vpop.xlane.xlu2 %534 }
 0x439   :  { %v5059_v46 = vpop.eup %4574  ;;  %v532_v47 = vpop.xlane.xlu0 %531 }
 0x43a   :  { %v542_v48 = vsel %vm275_vm14, %v5059_v46, 0.0 }
 0x43b   :  { %543 = vadd.xlane.f32.xlu2 %v542_v48 }
 0x43f   :  { %4377 = vrot.lane.b32.xlu0 %v4376_v49, %s5989_s24 }
 0x441   :  { %v499_v50 = vpop.xlane.xlu0 %498 }
 0x442   :  { %v511_v51 = vsub.f32 %v428_v13, %v499_v50 }
 0x444   :  { %v524_v52 = vmul.f32 1.442695, %v511_v51 }
 0x446   :  { %4576 = vpow2.f32 %v524_v52 }
 0x447   :  { %4578 = vrcp.f32 %v535_v53 }
 0x448   :  { %4580 = vrcp.f32 %v532_v47 }
 0x44c   :  { %v4577_v54 = vpop.eup %4576 }
 0x44d   :  { %v545_v55 = vsel %vm275_vm14, %v4577_v54, 0.0  ;;  %v4579_v57 = vpop.eup %4578 }
 0x44e   :  { %546 = vadd.xlane.f32.xlu1 %v545_v55  ;;  %v4581_v58 = vpop.eup %4580  ;;  %v563_v61 = vmul.f32 %v4579_v57, %v5034_v6 }
 0x44f   :  { %v562_v60 = vmul.f32 %v4581_v58, %v5036_v8 }
 0x453   :  { %4367 = vrot.lane.b32.xlu2 %v4366_v56, %s5989_s24 }
 0x454   :  { %v4363_v30 = vpop.permute.xlu0 %4362 }
 0x455   :  { %v4365_v32 = vunpack.i.h.bf16 %v4363_v30  ;;  %v4364_v59 = vunpack.i.l.bf16 %v4363_v30 }
 0x457   :  { %591 = vmatpush.msrb.mxu2 %v4364_v59  ;;  %617 = vmatpush.msrb.mxu3 %v4365_v32 }
 0x458   :  { %3917 = vmatmul.msk.f32.vlgmr.msrb.gmra.mxu2 %vm275_vm14, %v562_v60  ;;  %3918 = vmatmul.msk.f32.vlgmr.msrb.gmra.mxu3 %vm275_vm14, %v563_v61 }
 0x467   :  { %4372 = vrot.lane.b32.xlu1 %v4371_v28, %s5989_s24 }
 0x473   :  { %v538_v62 = vpop.xlane.xlu1 %537 }
 0x474   :  { %4582 = vrcp.f32 %v538_v62 }
 0x47a   :  { %v4583_v1 = vpop.eup %4582 }
 0x47b   :  { %v564_v9 = vmul.f32 %v4583_v1, %v5046_v20 }
 0x496   :  { %v550_v29 = vpop.xlane.xlu2 %549 }
 0x49e   :  { %v541_v63 = vpop.xlane.xlu0 %540 }
 0x49f   :  { %4584 = vrcp.f32 %v541_v63 }
 0x4a0   :  { %4586 = vrcp.f32 %v550_v29 }
 0x4a5   :  { %v4585_v3 = vpop.eup %4584 }
 0x4a6   :  { %v553_v2 = vpop.xlane.xlu1 %552  ;;  %v565_v31 = vmul.f32 %v4585_v3, %v4571_v38  ;;  %v4587_v12 = vpop.eup %4586 }
 0x4a7   :  { %4588 = vrcp.f32 %v553_v2  ;;  %v568_v14 = vmul.f32 %v4587_v12, %v5050_v22 }
 0x4ad   :  { %v4589_v13 = vpop.eup %4588 }
 0x4ae   :  { %v544_v0 = vpop.xlane.xlu2 %543  ;;  %v569_v15 = vmul.f32 %v4589_v13, %v5055_v43  ;;  %v4294_v43 = vld [vmem:[%s5966_s9] sm:$0xff]  ;;  %v4297_v13 = vld [vmem:[%s5969_s12 + $0x8] sm:$0xff] }
 0x4af   :  { %4590 = vrcp.f32 %v544_v0 }
 0x4b1   :  { %v4378_v4 = vpop.permute.xlu0 %4377 }
 0x4b2   :  { %v4380_v34 = vunpack.i.h.bf16 %v4378_v4  ;;  %v4379_v10 = vunpack.i.l.bf16 %v4378_v4 }
 0x4b5   :  { %v4591_v17 = vpop.eup %4590 }
 0x4b6   :  { %v4368_v5 = vpop.permute.xlu2 %4367  ;;  %v566_v24 = vmul.f32 %v4591_v17, %v5059_v46 }
 0x4b7   :  { %v4370_v6 = vunpack.i.h.bf16 %v4368_v5  ;;  %v4369_v8 = vunpack.i.l.bf16 %v4368_v5 }
 0x4b9   :  { %643 = vmatpush.msra.mxu0 %v4369_v8  ;;  %669 = vmatpush.msra.mxu1 %v4370_v6  ;;  %v4299_v6 = vld [vmem:[%s5970_s13 + $0x8] sm:$0xff]  ;;  %v4298_v8 = vld [vmem:[%s5970_s13] sm:$0xff] }
 0x4ba   :  { %3919 = vmatmul.msk.f32.vlgmr.msra.gmra.mxu0 %vm275_vm14, %v564_v9  ;;  %3920 = vmatmul.msk.f32.vlgmr.msra.gmra.mxu1 %vm275_vm14, %v565_v31 }
 0x4bb   :  { %747 = vmatpush.msrb.mxu0 %v4379_v10  ;;  %773 = vmatpush.msrb.mxu1 %v4380_v34 }
 0x4bd   :  { %992 = vmatpush.bf16.msra.mxu0 %v4299_v6 }
 0x4c1   :  { %v547_v16 = vpop.xlane.xlu1 %546  ;;  %993 = vmatpush.bf16.msra.mxu0 %v4298_v8 }
 0x4c2   :  { %3923 = vmatmul.msk.f32.vlgmr.msrb.gmra.mxu0 %vm275_vm14, %v568_v14  ;;  %3924 = vmatmul.msk.f32.vlgmr.msrb.gmra.mxu1 %vm275_vm14, %v569_v15  ;;  %4592 = vrcp.f32 %v547_v16  ;;  %v4296_v14 = vld [vmem:[%s5969_s12] sm:$0xff] }
 0x4c8   :  { %v4593_v18 = vpop.eup %4592 }
 0x4c9   :  { %v567_v25 = vmul.f32 %v4593_v18, %v4577_v54 }
 0x4d9   :  { %v4373_v20 = vpop.permute.xlu1 %4372 }
 0x4da   :  { %v4375_v21 = vunpack.i.h.bf16 %v4373_v20  ;;  %v4374_v23 = vunpack.i.l.bf16 %v4373_v20 }
 0x4db   :  { %v593_v37 = vpop.f32.mrf.mxu2  ;;  %v619_v38 = vpop.f32.mrf.mxu3 }
 0x4dc   :  { %695 = vmatpush.msra.mxu2 %v4374_v23  ;;  %721 = vmatpush.msra.mxu3 %v4375_v21 }
 0x4dd   :  { %3921 = vmatmul.msk.f32.vlgmr.msra.gmra.mxu2 %vm275_vm14, %v566_v24  ;;  %3922 = vmatmul.msk.f32.vlgmr.msra.gmra.mxu3 %vm275_vm14, %v567_v25 }
 0x4de   :  { %832 = vmatpush.bf16.msrb.mxu2 %v4295_v42  ;;  %958 = vmatpush.bf16.msrb.mxu3 %v4297_v13 }
 0x4e2   :  { %833 = vmatpush.bf16.msrb.mxu2 %v4294_v43  ;;  %959 = vmatpush.bf16.msrb.mxu3 %v4296_v14 }
 0x537   :  { %v645_v26 = vpop.f32.mrf.mxu0  ;;  %v671_v33 = vpop.f32.mrf.mxu1 }
 0x538   :  { %v4381_v22 = vpack.i.bf16 %v671_v33, %v645_v26 }
 0x53a   :  { %4382 = vrot.lane.b32.xlu0 %v4381_v22, %s5995_s25 }
 0x53f   :  { %v749_v27 = vpop.f32.mrf.mxu0  ;;  %v775_v35 = vpop.f32.mrf.mxu1 }
 0x540   :  { %v4391_v36 = vpack.i.bf16 %v775_v35, %v749_v27 }
 0x542   :  { %4392 = vrot.lane.b32.xlu0 %v4391_v36, %s5993_s5  ;;  %s6026_s5 = sld [smem:[#allocation6_spill]] }
 0x548   :  { %v115_v9 = vld [vmem:[%s6026_s5] sm:$0xff]  ;;  %v116_v31 = vld [vmem:[%s6026_s5 + $0x8] sm:$0xff]  ;;  %s6032_s5 = smov 64  }
 0x549   :  { %v5139_v34 = vpack.c.bf16 %v116_v31, %v115_v9 }
 0x54b   :  { %3951 = vmatmul.msk.bf16.vlgmr.msra.gmra.mxu0 %vm97_vm0, %v5139_v34 }
 0x560   :  { %v697_v39 = vpop.f32.mrf.mxu2  ;;  %v723_v40 = vpop.f32.mrf.mxu3 }
 0x561   :  { %v4386_v41 = vpack.i.bf16 %v723_v40, %v697_v39 }
 0x563   :  { %4387 = vrot.lane.b32.xlu2 %v4386_v41, %s5991_s1  ;;  %s6005_s1 = smov 32  }
 0x5ac   :  { %v4383_v44 = vpop.permute.xlu0 %4382 }
 0x5ad   :  { %v4385_v45 = vunpack.i.h.bf16 %v4383_v44  ;;  %v4384_v46 = vunpack.i.l.bf16 %v4383_v44 }
 0x5af   :  { %v803_v51 = vsel %vm275_vm14, %v619_v38, %v4385_v45  ;;  %v802_v52 = vsel %vm275_vm14, %v593_v37, %v4384_v46 }
 0x5b4   :  { %v4393_v47 = vpop.permute.xlu0 %4392 }
 0x5b5   :  { %v4395_v53 = vunpack.i.h.bf16 %v4393_v47  ;;  %v4394_v54 = vunpack.i.l.bf16 %v4393_v47 }
 0x5bd   :  { %v4388_v48 = vpop.permute.xlu2 %4387 }
 0x5be   :  { %v4390_v49 = vunpack.i.h.bf16 %v4388_v48  ;;  %v4389_v50 = vunpack.i.l.bf16 %v4388_v48 }
 0x5c0   :  { %v805_v55 = vsel %vm804_vm15, %v802_v52, %v4389_v50  ;;  %v806_v56 = vsel %vm804_vm15, %v803_v51, %v4390_v49 }
 0x5c1   :  { %v808_v57 = vsel %vm807_vm1, %v805_v55, %v4394_v54  ;;  %v809_v58 = vsel %vm807_vm1, %v806_v56, %v4395_v53  ;;  %v4536_v55 = vld [vmem:[%s5967_s10] ss:$0 sm:$0xff] }
 0x5c2   :  { %v810_v30 = vpack.c.bf16 %v809_v58, %v808_v57 }
 0x5c4   :  { %3933 = vmatmul.msk.bf16.vlgmr.msrb.gmra.mxu2 %vm97_vm0, %v810_v30 }
 0x647   :  { %v835_v32 = vpop.f32.mrf.mxu2 }
 0x648   :  { %v5104_v59 = vadd.f32 %v835_v32, %v4914_v7 }
 0x64a   :  { %v844_v60 = vsel %vm97_vm0, %v5104_v59, 0.0 }
 0x64b   :  { %845 = vadd.xlane.f32.xlu1 %v844_v60 }
 0x64f   :  { %v837_v61 = vpop.f32.mrf.mxu2 }
 0x650   :  { %v5109_v28 = vadd.f32 %v837_v61, %v4921_v11 }
 0x652   :  { %v847_v29 = vsel %vm97_vm0, %v5109_v28, 0.0 }
 0x653   :  { %848 = vadd.xlane.f32.xlu2 %v847_v29 }
 0x6be   :  { %v846_v62 = vpop.xlane.xlu1 %845 }
 0x6bf   :  { %v850_v63 = vmul.f32 %v846_v62, %v4925_v19 }
 0x6c1   :  { %v5115_v0 = vsub.f32 %v5104_v59, %v850_v63 }
 0x6c3   :  { %v854_v7 = vmul.f32 %v5115_v0, %v5115_v0  ;;  %v923_v29 = vmul.f32 %v4536_v55, %v5115_v0  ;;  %v5158_v0 = vpop.f32.mrf.mxu0 }
 0x6c4   :  { %1020 = vrot.lane.b32.xlu2 %v5158_v0, %s6001_s28  ;;  %3952 = vmatpush.xpose.msk.msra.mxu1 %vm275_vm14, %v5158_v0 }
 0x6c5   :  { %v856_v1 = vsel %vm97_vm0, %v854_v7, 0.0 }
 0x6c6   :  { %857 = vadd.xlane.f32.xlu0 %v856_v1  ;;  %v849_v2 = vpop.xlane.xlu2 %848 }
 0x6c7   :  { %v851_v11 = vmul.f32 %v849_v2, %v4925_v19 }
 0x6c9   :  { %v5122_v3 = vsub.f32 %v5109_v28, %v851_v11  ;;  %v4537_v11 = vld [vmem:[%s5968_s11] ss:$0 sm:$0xff] }
 0x6cb   :  { %v855_v4 = vmul.f32 %v5122_v3, %v5122_v3  ;;  %v924_v7 = vmul.f32 %v4536_v55, %v5122_v3  ;;  %v5164_v3 = vpop.f32.mrf.mxu0 }
 0x6cc   :  { %1028 = vrot.lane.b32.xlu2 %v5158_v0, %s6003_s3  ;;  %3954 = vmatpush.xpose.msk.msrb.mxu1 %vm275_vm14, %v5164_v3 }
 0x6cd   :  { %v859_v5 = vsel %vm97_vm0, %v855_v4, 0.0 }
 0x6ce   :  { %860 = vadd.xlane.f32.xlu1 %v859_v5 }
 0x6da   :  { %1022 = vrot.lane.b32.xlu0 %v5164_v3, %s6001_s28 }
 0x739   :  { %v858_v10 = vpop.xlane.xlu0 %857 }
 0x73a   :  { %v862_v12 = vmul.f32 0.032258064, %v858_v10 }
 0x73c   :  { %4594 = vrsqrt.f32 %v862_v12  ;;  %vm871_vm2 = vcmp.eq.f32.partialorder %v862_v12, inf  ;;  %v874_v27 = vand.u32 2147483648, %v862_v12  ;;  %vm873_vm3 = vcmp.eq.f32.partialorder %v862_v12, 0.0 }
 0x741   :  { %v861_v15 = vpop.xlane.xlu1 %860 }
 0x742   :  { %v4595_v16 = vpop.eup %4594  ;;  %v863_v17 = vmul.f32 0.032258064, %v861_v15 }
 0x743   :  { %v865_v18 = vmul.f32 %v4595_v16, %v862_v12 }
 0x744   :  { %4596 = vrsqrt.f32 %v863_v17  ;;  %vm883_vm4 = vcmp.eq.f32.partialorder %v863_v17, inf  ;;  %v886_v42 = vand.u32 2147483648, %v863_v17  ;;  %vm885_vm5 = vcmp.eq.f32.partialorder %v863_v17, 0.0 }
 0x745   :  { %v866_v20 = vmul.f32 %v4595_v16, %v865_v18 }
 0x747   :  { %v867_v21 = vmul.f32 0.5, %v866_v20 }
 0x749   :  { %v868_v23 = vsub.f32 1.5, %v867_v21 }
 0x74a   :  { %v4597_v24 = vpop.eup %4596 }
 0x74b   :  { %v869_v25 = vmul.f32 %v4595_v16, %v868_v23  ;;  %v877_v26 = vmul.f32 %v4597_v24, %v863_v17 }
 0x74c   :  { %v1023_v14 = vpop.permute.xlu0 %1022 }
 0x74d   :  { %v870_v33 = vmul.f32 %v869_v25, %v862_v12  ;;  %v878_v22 = vmul.f32 %v4597_v24, %v877_v26  ;;  %3958 = vmatpush.xpose.msk.msra.mxu3 %vm275_vm14, %v1023_v14 }
 0x74f   :  { %v872_v35 = vsel %vm871_vm2, %v862_v12, %v870_v33  ;;  %v879_v36 = vmul.f32 0.5, %v878_v22  ;;  %v5183_v12 = vpop.permute.xlu2 %1020 }
 0x750   :  { %v875_v37 = vsel %vm873_vm3, %v874_v27, %v872_v35  ;;  %3956 = vmatpush.xpose.msk.msra.mxu2 %vm275_vm14, %v5183_v12 }
 0x751   :  { %v888_v38 = vadd.f32 1e-06, %v875_v37  ;;  %v880_v39 = vsub.f32 1.5, %v879_v36 }
 0x753   :  { %4598 = vrcp.f32 %v888_v38  ;;  %v881_v40 = vmul.f32 %v4597_v24, %v880_v39  ;;  %v901_v52 = vand.u32 2147483648, %v888_v38  ;;  %vm895_vm7 = vweird.f32 %v888_v38 }
 0x754   :  { %v899_v53 = vand.u32 2147483647, %v888_v38 }
 0x755   :  { %v882_v41 = vmul.f32 %v881_v40, %v863_v17  ;;  %v902_v58 = vor.u32 1.1754944e-38, %v901_v52 }
 0x756   :  { %vm900_vm9 = vcmp.eq.f32.partialorder %v899_v53, 8.507059e+37 }
 0x757   :  { %v884_v43 = vsel %vm883_vm4, %v863_v17, %v882_v41  ;;  %v5190_v13 = vpop.permute.xlu2 %1028 }
 0x758   :  { %v887_v44 = vsel %vm885_vm5, %v886_v42, %v884_v43  ;;  %3964 = vmatpush.xpose.msk.msrb.mxu2 %vm275_vm14, %v5190_v13 }
 0x759   :  { %v4599_v45 = vpop.eup %4598  ;;  %v889_v46 = vadd.f32 1e-06, %v887_v44 }
 0x75a   :  { %v891_v47 = vmul.f32 %v4599_v45, %v888_v38  ;;  %vm896_vm6 = vweird.f32 %v4599_v45 }
 0x75b   :  { %4600 = vrcp.f32 %v889_v46  ;;  %vm897_vm8 = vmor %vm895_vm7, %vm896_vm6  ;;  %v916_v30 = vand.u32 2147483648, %v889_v46  ;;  %v914_v60 = vand.u32 2147483647, %v889_v46  ;;  %vm910_vm11 = vweird.f32 %v889_v46 }
 0x75c   :  { %v892_v48 = vsub.f32 1.0, %v891_v47 }
 0x75d   :  { %v917_v63 = vor.u32 1.1754944e-38, %v916_v30  ;;  %vm915_vm13 = vcmp.eq.f32.partialorder %v914_v60, 8.507059e+37 }
 0x75e   :  { %v893_v49 = vmul.f32 %v4599_v45, %v892_v48 }
 0x760   :  { %v894_v50 = vadd.f32 %v4599_v45, %v893_v49 }
 0x761   :  { %v4601_v51 = vpop.eup %4600 }
 0x762   :  { %v906_v54 = vmul.f32 %v4601_v51, %v889_v46  ;;  %v898_v56 = vsel %vm897_vm8, %v4599_v45, %v894_v50  ;;  %vm911_vm10 = vweird.f32 %v4601_v51 }
 0x763   :  { %v903_v61 = vsel %vm900_vm9, %v902_v58, %v898_v56  ;;  %vm912_vm12 = vmor %vm910_vm11, %vm911_vm10 }
 0x764   :  { %v907_v57 = vsub.f32 1.0, %v906_v54  ;;  %v925_v2 = vmul.f32 %v923_v29, %v903_v61 }
 0x766   :  { %v908_v32 = vmul.f32 %v4601_v51, %v907_v57  ;;  %v930_v6 = vadd.f32 %v4537_v11, %v925_v2  ;;  %v4396_v57 = vpack.i.bf16 %v1023_v14, %v5183_v12 }
 0x768   :  { %v909_v62 = vadd.f32 %v4601_v51, %v908_v32 }
 0x76a   :  { %v913_v1 = vsel %vm912_vm12, %v4601_v51, %v909_v62 }
 0x76b   :  { %v918_v4 = vsel %vm915_vm13, %v917_v63, %v913_v1 }
 0x76c   :  { %v926_v5 = vmul.f32 %v924_v7, %v918_v4 }
 0x76e   :  { %v931_v8 = vadd.f32 %v4537_v11, %v926_v5 }
 0x770   :  { %v932_v9 = vpack.c.bf16 %v931_v8, %v930_v6 }
 0x772   :  { %3942 = vmatmul.msk.bf16.vlgmr.msrb.gmra.mxu3 %vm97_vm0, %v932_v9 }
 0x7f5   :  { %v961_v31 = vpop.f32.mrf.mxu3 }
 0x7f6   :  { %1006 = vrot.lane.b32.xlu1 %v961_v31, %s6001_s28  ;;  %3953 = vmatmul.msk.f32.vlgmr.msra.gmra.mxu1 %vm275_vm14, %v961_v31 }
 0x7fd   :  { %v963_v10 = vpop.f32.mrf.mxu3 }
 0x7fe   :  { %1016 = vrot.lane.b32.xlu2 %v963_v10, %s6003_s3  ;;  %1030 = vrot.lane.b32.xlu1 %v5164_v3, %s6003_s3 }
 0x7ff   :  { %1008 = vrot.lane.b32.xlu0 %v963_v10, %s6001_s28  ;;  %3955 = vmatmul.msk.f32.vlgmr.msrb.gmra.mxu1 %vm275_vm14, %v963_v10  ;;  %s6033_s28 = smov 104  }
 0x806   :  { %1010 = vrot.lane.b32.xlu2 %v961_v31, %s5999_s7  ;;  %1024 = vrot.lane.b32.xlu1 %v5158_v0, %s5999_s7 }
 0x807   :  { %1014 = vrot.lane.b32.xlu0 %v961_v31, %s6003_s3  ;;  %s6034_s3 = smov 120  }
 0x80e   :  { %1012 = vrot.lane.b32.xlu1 %v963_v10, %s5999_s7 }
 0x80f   :  { %1026 = vrot.lane.b32.xlu0 %v5164_v3, %s5999_s7 }
 0x858   :  { %v1017_v17 = vpop.permute.xlu2 %1016 }
 0x860   :  { %v1011_v25 = vpop.permute.xlu2 %1010 }
 0x868   :  { %v1007_v15 = vpop.permute.xlu1 %1006 }
 0x869   :  { %3957 = vmatmul.msk.f32.vlgmr.msra.gmra.mxu2 %vm275_vm14, %v1007_v15 }
 0x870   :  { %v5196_v16 = vpop.permute.xlu1 %1030 }
 0x871   :  { %v1009_v18 = vpop.permute.xlu0 %1008  ;;  %3966 = vmatpush.xpose.msk.msrb.mxu3 %vm275_vm14, %v5196_v16 }
 0x872   :  { %3959 = vmatmul.msk.f32.vlgmr.msra.gmra.mxu3 %vm275_vm14, %v1009_v18 }
 0x873   :  { %v1053_v20 = vpop.f32.mrf.mxu1 }
 0x874   :  { %v1224_v21 = vsel %vm275_vm14, %v1053_v20, -inf }
 0x875   :  { %1225 = vmax.xlane.f32.xlu1 %v1224_v21 }
 0x878   :  { %v5202_v23 = vpop.permute.xlu1 %1024 }
 0x879   :  { %v1015_v24 = vpop.permute.xlu0 %1014  ;;  %3960 = vmatpush.xpose.msk.msrb.mxu0 %vm275_vm14, %v5202_v23 }
 0x87a   :  { %3965 = vmatmul.msk.f32.vlgmr.msrb.gmra.mxu2 %vm275_vm14, %v1015_v24  ;;  %3967 = vmatmul.msk.f32.vlgmr.msrb.gmra.mxu3 %vm275_vm14, %v1017_v17 }
 0x87c   :  { %v1077_v26 = vpop.f32.mrf.mxu1  ;;  %3961 = vmatmul.msk.f32.vlgmr.msrb.gmra.mxu0 %vm275_vm14, %v1011_v25 }
 0x87d   :  { %v1227_v33 = vsel %vm275_vm14, %v1077_v26, -inf }
 0x87e   :  { %1228 = vmax.xlane.f32.xlu0 %v1227_v33 }
 0x880   :  { %v1013_v27 = vpop.permute.xlu1 %1012 }
 0x881   :  { %v5210_v22 = vpop.permute.xlu0 %1026 }
 0x882   :  { %3962 = vmatpush.xpose.msk.msra.mxu1 %vm275_vm14, %v5210_v22 }
 0x885   :  { %3963 = vmatmul.msk.f32.vlgmr.msra.gmra.mxu1 %vm275_vm14, %v1013_v27 }
 0x8e8   :  { %v1226_v49 = vpop.xlane.xlu1 %1225 }
 0x8e9   :  { %v1248_v50 = vsub.f32 %v1053_v20, %v1226_v49 }
 0x8eb   :  { %v1256_v52 = vmul.f32 1.442695, %v1248_v50 }
 0x8ec   :  { %v1101_v43 = vpop.f32.mrf.mxu2 }
 0x8ed   :  { %v1230_v46 = vsel %vm275_vm14, %v1101_v43, -inf }
 0x8f1   :  { %v1229_v35 = vpop.xlane.xlu0 %1228 }
 0x8f2   :  { %v1249_v36 = vsub.f32 %v1077_v26, %v1229_v35 }
 0x8f4   :  { %v1258_v37 = vmul.f32 1.442695, %v1249_v36 }
 0x8f5   :  { %v1125_v38 = vpop.f32.mrf.mxu3 }
 0x8f6   :  { %4602 = vpow2.f32 %v1258_v37  ;;  %v1233_v51 = vsel %vm275_vm14, %v1125_v38, -inf }
 0x8f7   :  { %4604 = vpow2.f32 %v1256_v52 }
 0x8f9   :  { %v1149_v39 = vpop.f32.mrf.mxu0 }
 0x8fa   :  { %v1236_v40 = vsel %vm275_vm14, %v1149_v39, -inf }
 0x8fb   :  { %1237 = vmax.xlane.f32.xlu0 %v1236_v40  ;;  %v4401_v40 = vpack.i.bf16 %v5164_v3, %v5158_v0 }
 0x8fc   :  { %v5216_v41 = vpop.eup %4602 }
 0x8fd   :  { %v1275_v42 = vsel %vm275_vm14, %v5216_v41, 0.0  ;;  %v1221_v44 = vpop.f32.mrf.mxu3  ;;  %v1197_v53 = vpop.f32.mrf.mxu2 }
 0x8fe   :  { %1276 = vadd.xlane.f32.xlu1 %v1275_v42  ;;  %v1245_v48 = vsel %vm275_vm14, %v1221_v44, -inf  ;;  %v1242_v54 = vsel %vm275_vm14, %v1197_v53, -inf  ;;  %v5225_v55 = vpop.eup %4604 }
 0x8ff   :  { %v1272_v56 = vsel %vm275_vm14, %v5225_v55, 0.0 }
 0x902   :  { %v1173_v45 = vpop.f32.mrf.mxu1 }
 0x903   :  { %1231 = vmax.xlane.f32.xlu0 %v1230_v46  ;;  %v1239_v47 = vsel %vm275_vm14, %v1173_v45, -inf }
 0x904   :  { %1240 = vmax.xlane.f32.xlu2 %v1239_v47 }
 0x906   :  { %1246 = vmax.xlane.f32.xlu1 %v1245_v48 }
 0x90c   :  { %1234 = vmax.xlane.f32.xlu2 %v1233_v51 }
 0x914   :  { %1243 = vmax.xlane.f32.xlu2 %v1242_v54 }
 0x91c   :  { %1273 = vadd.xlane.f32.xlu2 %v1272_v56 }
 0x91f   :  { %4397 = vrot.lane.b32.xlu1 %v4396_v57, %s6027_s4 }
 0x96e   :  { %v1238_v58 = vpop.xlane.xlu0 %1237 }
 0x96f   :  { %v1252_v30 = vsub.f32 %v1149_v39, %v1238_v58  ;;  %v4406_v39 = vpack.i.bf16 %v5196_v16, %v5190_v13 }
 0x971   :  { %v1264_v32 = vmul.f32 1.442695, %v1252_v30  ;;  %v5231_v60 = vpop.xlane.xlu1 %1276 }
 0x973   :  { %4606 = vpow2.f32 %v1264_v32 }
 0x976   :  { %v1232_v61 = vpop.xlane.xlu0 %1231 }
 0x977   :  { %v1250_v29 = vsub.f32 %v1101_v43, %v1232_v61  ;;  %v1241_v62 = vpop.xlane.xlu2 %1240 }
 0x978   :  { %v1253_v63 = vsub.f32 %v1173_v45, %v1241_v62 }
 0x979   :  { %v5233_v7 = vpop.eup %4606  ;;  %v1260_v1 = vmul.f32 1.442695, %v1250_v29  ;;  %v1247_v2 = vpop.xlane.xlu1 %1246 }
 0x97a   :  { %v1266_v11 = vmul.f32 1.442695, %v1253_v63  ;;  %v1255_v4 = vsub.f32 %v1221_v44, %v1247_v2  ;;  %v1284_v5 = vsel %vm275_vm14, %v5233_v7, 0.0 }
 0x97b   :  { %4608 = vpow2.f32 %v1260_v1  ;;  %1285 = vadd.xlane.f32.xlu0 %v1284_v5 }
 0x97c   :  { %4610 = vpow2.f32 %v1266_v11  ;;  %v1270_v6 = vmul.f32 1.442695, %v1255_v4 }
 0x97e   :  { %4612 = vpow2.f32 %v1270_v6 }
 0x97f   :  { %v1235_v8 = vpop.xlane.xlu2 %1234 }
 0x980   :  { %v1251_v9 = vsub.f32 %v1125_v38, %v1235_v8  ;;  %v4411_v38 = vpack.i.bf16 %v5210_v22, %v5202_v23 }
 0x981   :  { %v4609_v31 = vpop.eup %4608 }
 0x982   :  { %v5237_v10 = vpop.eup %4610  ;;  %v1262_v12 = vmul.f32 1.442695, %v1251_v9  ;;  %v1278_v14 = vsel %vm275_vm14, %v4609_v31, 0.0 }
 0x983   :  { %1279 = vadd.xlane.f32.xlu1 %v1278_v14  ;;  %v1287_v15 = vsel %vm275_vm14, %v5237_v10, 0.0 }
 0x984   :  { %4614 = vpow2.f32 %v1262_v12  ;;  %1288 = vadd.xlane.f32.xlu2 %v1287_v15  ;;  %v4613_v18 = vpop.eup %4612  ;;  %v4300_v15 = vld [vmem:[%s5971_s14] sm:$0xff] }
 0x985   :  { %v1293_v25 = vsel %vm275_vm14, %v4613_v18, 0.0 }
 0x987   :  { %v1244_v17 = vpop.xlane.xlu2 %1243 }
 0x988   :  { %v1254_v20 = vsub.f32 %v1197_v53, %v1244_v17 }
 0x98a   :  { %v4615_v21 = vpop.eup %4614  ;;  %v1268_v24 = vmul.f32 1.442695, %v1254_v20 }
 0x98b   :  { %v1281_v26 = vsel %vm275_vm14, %v4615_v21, 0.0 }
 0x98c   :  { %4616 = vpow2.f32 %v1268_v24  ;;  %1294 = vadd.xlane.f32.xlu2 %v1293_v25  ;;  %1282 = vadd.xlane.f32.xlu0 %v1281_v26 }
 0x98f   :  { %v1274_v42 = vpop.xlane.xlu2 %1273 }
 0x991   :  { %v4398_v33 = vpop.permute.xlu1 %4397 }
 0x992   :  { %v4617_v27 = vpop.eup %4616  ;;  %v4400_v35 = vunpack.i.h.bf16 %v4398_v33  ;;  %v4399_v36 = vunpack.i.l.bf16 %v4398_v33 }
 0x993   :  { %v1290_v37 = vsel %vm275_vm14, %v4617_v27, 0.0 }
 0x994   :  { %1385 = vmatpush.msra.mxu2 %v4399_v36  ;;  %1411 = vmatpush.msra.mxu3 %v4400_v35 }
 0x995   :  { %1291 = vadd.xlane.f32.xlu0 %v1290_v37 }
 0x99c   :  { %4412 = vrot.lane.b32.xlu1 %v4411_v38, %s6027_s4 }
 0x9a4   :  { %4407 = vrot.lane.b32.xlu2 %v4406_v39, %s6027_s4 }
 0x9a9   :  { %4402 = vrot.lane.b32.xlu0 %v4401_v40, %s6027_s4 }
 0x9ee   :  { %v1286_v44 = vpop.xlane.xlu0 %1285 }
 0x9f6   :  { %v1280_v43 = vpop.xlane.xlu1 %1279 }
 0x9f7   :  { %4618 = vrcp.f32 %v1280_v43  ;;  %v1289_v45 = vpop.xlane.xlu2 %1288 }
 0x9fd   :  { %v4619_v46 = vpop.eup %4618 }
 0x9fe   :  { %v1306_v47 = vmul.f32 %v4619_v46, %v4609_v31 }
 0x9ff   :  { %v1283_v23 = vpop.xlane.xlu0 %1282  ;;  %v1295_v22 = vpop.xlane.xlu2 %1294 }
 0xa00   :  { %4620 = vrcp.f32 %v1283_v23  ;;  %3970 = vmatmul.msk.f32.vlgmr.msra.gmra.mxu2 %vm275_vm14, %v1306_v47 }
 0xa01   :  { %4622 = vrcp.f32 %v1295_v22  ;;  %v118_v22 = vld [vmem:[%s6031_s29] sm:$0xff] }
 0xa02   :  { %vm120_vm2 = vcmp.ge.s32.totalorder %v118_v22, 1  ;;  %vm122_vm4 = vcmp.ge.s32.totalorder %v118_v22, 2 }
 0xa06   :  { %v4621_v13 = vpop.eup %4620 }
 0xa07   :  { %v1307_v16 = vmul.f32 %v4621_v13, %v4615_v21  ;;  %v4408_v48 = vpop.permute.xlu2 %4407  ;;  %v4623_v50 = vpop.eup %4622  ;;  %v4774_v13 = vmov 0  }
 0xa08   :  { %v1292_v49 = vpop.xlane.xlu0 %1291  ;;  %v4410_v0 = vunpack.i.h.bf16 %v4408_v48  ;;  %v4409_v3 = vunpack.i.l.bf16 %v4408_v48  ;;  %v1311_v52 = vmul.f32 %v4623_v50, %v4613_v18  ;;  %4433 = vset.pattern.permute.xlu0 %v4774_v13  ;;  %4431 = vset.pattern.permute.xlu1 %v4774_v13 }
 0xa09   :  { %4624 = vrcp.f32 %v1292_v49  ;;  %3971 = vmatmul.msk.f32.vlgmr.msra.gmra.mxu3 %vm275_vm14, %v1307_v16  ;;  %4432 = vset.pattern.permute.xlu2 %v4774_v13 }
 0xa0a   :  { %1489 = vmatpush.msrb.mxu2 %v4409_v3  ;;  %1515 = vmatpush.msrb.mxu3 %v4410_v0  ;;  %4626 = vrcp.f32 %v5231_v60 }
 0xa0b   :  { %4628 = vrcp.f32 %v1274_v42 }
 0xa0c   :  { %4630 = vrcp.f32 %v1286_v44 }
 0xa0d   :  { %4632 = vrcp.f32 %v1289_v45 }
 0xa0e   :  { %v4413_v57 = vpop.permute.xlu1 %4412 }
 0xa0f   :  { %v4625_v51 = vpop.eup %4624  ;;  %v4415_v62 = vunpack.i.h.bf16 %v4413_v57  ;;  %v4414_v63 = vunpack.i.l.bf16 %v4413_v57  ;;  %v1692_v57 = vsel %vm122_vm4, 1, %v4774_v13 }
 0xa10   :  { %v1310_v53 = vmul.f32 %v4625_v51, %v4617_v27  ;;  %v4627_v54 = vpop.eup %4626 }
 0xa11   :  { %3975 = vmatmul.msk.f32.vlgmr.msrb.gmra.mxu3 %vm275_vm14, %v1311_v52  ;;  %v4629_v56 = vpop.eup %4628  ;;  %v1305_v61 = vmul.f32 %v4627_v54, %v5216_v41  ;;  %v119_v54 = vld [vmem:[%s6031_s29 + $0x8] sm:$0xff] }
 0xa12   :  { %3974 = vmatmul.msk.f32.vlgmr.msrb.gmra.mxu2 %vm275_vm14, %v1310_v53  ;;  %v1304_v29 = vmul.f32 %v4629_v56, %v5225_v55  ;;  %v4631_v60 = vpop.eup %4630  ;;  %vm121_vm3 = vcmp.ge.s32.totalorder %v119_v54, 1  ;;  %vm123_vm5 = vcmp.ge.s32.totalorder %v119_v54, 2 }
 0xa13   :  { %v4633_v1 = vpop.eup %4632  ;;  %v1308_v2 = vmul.f32 %v4631_v60, %v5233_v7  ;;  %v1710_v56 = vsel %vm121_vm3, 1, %v4774_v13 }
 0xa14   :  { %v1309_v11 = vmul.f32 %v4633_v1, %v5237_v10  ;;  %v4301_v10 = vld [vmem:[%s5971_s14 + $0x8] sm:$0xff] }
 0xa15   :  { %1572 = vmatpush.bf16.msra.mxu2 %v4301_v10 }
 0xa19   :  { %1573 = vmatpush.bf16.msra.mxu2 %v4300_v15 }
 0xa1b   :  { %v4403_v58 = vpop.permute.xlu0 %4402 }
 0xa1c   :  { %v4405_v30 = vunpack.i.h.bf16 %v4403_v58  ;;  %v4404_v32 = vunpack.i.l.bf16 %v4403_v58  ;;  %v1693_v58 = vsel %vm123_vm5, 1, %v4774_v13 }
 0xa1e   :  { %1333 = vmatpush.msra.mxu0 %v4404_v32  ;;  %1359 = vmatpush.msrb.mxu1 %v4405_v30 }
 0xa1f   :  { %3968 = vmatmul.msk.f32.vlgmr.msra.gmra.mxu0 %vm275_vm14, %v1304_v29  ;;  %3969 = vmatmul.msk.f32.vlgmr.msrb.gmra.mxu1 %vm275_vm14, %v1305_v61 }
 0xa20   :  { %1437 = vmatpush.msrb.mxu0 %v4414_v63  ;;  %1463 = vmatpush.msra.mxu1 %v4415_v62 }
 0xa27   :  { %3972 = vmatmul.msk.f32.vlgmr.msrb.gmra.mxu0 %vm275_vm14, %v1308_v2  ;;  %3973 = vmatmul.msk.f32.vlgmr.msra.gmra.mxu1 %vm275_vm14, %v1309_v11 }
 0xa83   :  { %v1387_v41 = vpop.f32.mrf.mxu2 }
 0xa8c   :  { %v1413_v55 = vpop.f32.mrf.mxu3 }
 0xa8d   :  { %v4416_v4 = vpack.i.bf16 %v1413_v55, %v1387_v41 }
 0xa8f   :  { %4417 = vrot.lane.b32.xlu0 %v4416_v4, %s6028_s2 }
 0xa94   :  { %v1517_v5 = vpop.f32.mrf.mxu3 }
 0xa95   :  { %v1491_v6 = vpop.f32.mrf.mxu2 }
 0xa96   :  { %v4426_v8 = vpack.i.bf16 %v1517_v5, %v1491_v6 }
 0xa98   :  { %4427 = vrot.lane.b32.xlu2 %v4426_v8, %s6029_s6 }
 0xa9c   :  { %v1335_v9 = vpop.f32.mrf.mxu0  ;;  %v1361_v31 = vpop.f32.mrf.mxu1 }
 0xaa4   :  { %v1439_v12 = vpop.f32.mrf.mxu0  ;;  %v1465_v7 = vpop.f32.mrf.mxu1 }
 0xaa5   :  { %v4421_v14 = vpack.i.bf16 %v1465_v7, %v1439_v12 }
 0xaa7   :  { %4422 = vrot.lane.b32.xlu1 %v4421_v14, %s6030_s0 }
 0xaf2   :  { %v4428_v21 = vpop.permute.xlu2 %4427 }
 0xaf3   :  { %v4430_v33 = vunpack.i.h.bf16 %v4428_v21  ;;  %v4429_v27 = vunpack.i.l.bf16 %v4428_v21 }
 0xb01   :  { %v4418_v17 = vpop.permute.xlu0 %4417 }
 0xb02   :  { %v4420_v18 = vunpack.i.h.bf16 %v4418_v17  ;;  %v4419_v20 = vunpack.i.l.bf16 %v4418_v17 }
 0xb04   :  { %v1544_v35 = vsel %vm275_vm14, %v1335_v9, %v4419_v20  ;;  %v1545_v36 = vsel %vm275_vm14, %v1361_v31, %v4420_v18 }
 0xb19   :  { %v4423_v24 = vpop.permute.xlu1 %4422 }
 0xb1a   :  { %v4425_v25 = vunpack.i.h.bf16 %v4423_v24  ;;  %v4424_v26 = vunpack.i.l.bf16 %v4423_v24 }
 0xb1c   :  { %v1547_v37 = vsel %vm804_vm15, %v1545_v36, %v4425_v25  ;;  %v1546_v38 = vsel %vm804_vm15, %v1544_v35, %v4424_v26 }
 0xb1d   :  { %v1548_v39 = vsel %vm807_vm1, %v1546_v38, %v4429_v27  ;;  %v1549_v40 = vsel %vm807_vm1, %v1547_v37, %v4430_v33  ;;  %v4538_v37 = vld [vmem:[%s5972_s15] ss:$0 sm:$0xff] }
 0xb1e   :  { %v1550_v42 = vpack.c.bf16 %v1549_v40, %v1548_v39 }
 0xb20   :  { %3984 = vmatmul.msk.bf16.vlgmr.msra.gmra.mxu2 %vm97_vm0, %v1550_v42 }
 0xba3   :  { %v1575_v43 = vpop.f32.mrf.mxu2 }
 0xba4   :  { %v5284_v44 = vadd.f32 %v1575_v43, %v5104_v59  ;;  %v1709_v59 = vsel %vm120_vm2, 1, %v4774_v13 }
 0xba6   :  { %v1584_v45 = vsel %vm97_vm0, %v5284_v44, 0.0 }
 0xba7   :  { %1585 = vadd.xlane.f32.xlu0 %v1584_v45 }
 0xbab   :  { %v1577_v46 = vpop.f32.mrf.mxu2 }
 0xbac   :  { %v5289_v47 = vadd.f32 %v1577_v46, %v5109_v28 }
 0xbae   :  { %v1587_v23 = vsel %vm97_vm0, %v5289_v47, 0.0 }
 0xbaf   :  { %1588 = vadd.xlane.f32.xlu1 %v1587_v23  ;;  %v1687_v23 = vlaneseq }
 0xbc8   :  { %1712 = vperm.xlu1 %4431, %v1709_v59  }
 0xc1a   :  { %v1586_v16 = vpop.xlane.xlu0 %1585 }
 0xc1b   :  { %v1590_v48 = vmul.f32 %v1586_v16, %v4925_v19  ;;  %v4539_v16 = vld [vmem:[%s5973_s16] ss:$0 sm:$0xff] }
 0xc1d   :  { %v5298_v28 = vsub.f32 %v5284_v44, %v1590_v48 }
 0xc1f   :  { %v1594_v49 = vmul.f32 %v5298_v28, %v5298_v28  ;;  %v1663_v45 = vmul.f32 %v4538_v37, %v5298_v28 }
 0xc21   :  { %v1596_v0 = vsel %vm97_vm0, %v1594_v49, 0.0 }
 0xc22   :  { %1597 = vadd.xlane.f32.xlu2 %v1596_v0  ;;  %v1589_v3 = vpop.xlane.xlu1 %1588 }
 0xc23   :  { %v1591_v50 = vmul.f32 %v1589_v3, %v4925_v19  ;;  %v5321_v3 = vshrl.u32 %v1687_v23, 7 }
 0xc25   :  { %v5305_v51 = vsub.f32 %v5289_v47, %v1591_v50 }
 0xc27   :  { %v1595_v52 = vmul.f32 %v5305_v51, %v5305_v51  ;;  %v1664_v0 = vmul.f32 %v4538_v37, %v5305_v51  ;;  %v4316_v37 = vld [vmem:[%s5976_s19 + $0x40] sm:$0xff] }
 0xc29   :  { %v1599_v53 = vsel %vm97_vm0, %v1595_v52, 0.0 }
 0xc2a   :  { %1600 = vadd.xlane.f32.xlu0 %v1599_v53 }
 0xc3a   :  { %1715 = vperm.xlu2 %4432, %v1710_v56   ;;  %v5323_v54 = vpop.permute.xlu1 %1712 }
 0xc3e   :  { %1695 = vperm.xlu0 %4433, %v1692_v57  }
 0xc42   :  { %1698 = vperm.xlu2 %4432, %v1693_v58  }
 0xc95   :  { %v1598_v30 = vpop.xlane.xlu2 %1597 }
 0xc96   :  { %v1602_v32 = vmul.f32 0.032258064, %v1598_v30 }
 0xc98   :  { %4634 = vrsqrt.f32 %v1602_v32  ;;  %vm1611_vm6 = vcmp.eq.f32.partialorder %v1602_v32, inf  ;;  %v1614_v6 = vand.u32 2147483648, %v1602_v32  ;;  %vm1613_vm7 = vcmp.eq.f32.partialorder %v1602_v32, 0.0 }
 0xc9d   :  { %v1601_v61 = vpop.xlane.xlu0 %1600  ;;  %v5326_v56 = vpop.permute.xlu2 %1715 }
 0xc9e   :  { %v4635_v29 = vpop.eup %4634  ;;  %v1603_v62 = vmul.f32 0.032258064, %v1601_v61 }
 0xc9f   :  { %v1605_v63 = vmul.f32 %v4635_v29, %v1602_v32 }
 0xca0   :  { %4636 = vrsqrt.f32 %v1603_v62  ;;  %vm1623_vm8 = vcmp.eq.f32.partialorder %v1603_v62, inf  ;;  %v1626_v15 = vand.u32 2147483648, %v1603_v62  ;;  %vm1625_vm9 = vcmp.eq.f32.partialorder %v1603_v62, 0.0 }
 0xca1   :  { %v1606_v60 = vmul.f32 %v4635_v29, %v1605_v63 }
 0xca3   :  { %v1607_v1 = vmul.f32 0.5, %v1606_v60 }
 0xca5   :  { %v1608_v2 = vsub.f32 1.5, %v1607_v1 }
 0xca6   :  { %v4637_v11 = vpop.eup %4636 }
 0xca7   :  { %v1609_v41 = vmul.f32 %v4635_v29, %v1608_v2  ;;  %v1617_v55 = vmul.f32 %v4637_v11, %v1603_v62 }
 0xca9   :  { %v1610_v4 = vmul.f32 %v1609_v41, %v1602_v32  ;;  %v1618_v5 = vmul.f32 %v4637_v11, %v1617_v55  ;;  %v4307_v41 = vld [vmem:[%s5974_s17 + $0x28] sm:$0xff]  ;;  %v4306_v55 = vld [vmem:[%s5974_s17 + $0x20] sm:$0xff] }
 0xcaa   :  { %1788 = vmatpush.bf16.msrb.mxu1 %v4307_v41 }
 0xcab   :  { %v1612_v8 = vsel %vm1611_vm6, %v1602_v32, %v1610_v4  ;;  %v1619_v9 = vmul.f32 0.5, %v1618_v5  ;;  %vm1706_vm6 = vcmp.lt.s32.totalorder %v5321_v3, 1  ;;  %v4305_v4 = vld [vmem:[%s5974_s17 + $0x18] sm:$0xff]  ;;  %v4304_v5 = vld [vmem:[%s5974_s17 + $0x10] sm:$0xff] }
 0xcac   :  { %v1615_v31 = vsel %vm1613_vm7, %v1614_v6, %v1612_v8  ;;  %vm1718_vm7 = vcmp.eq.s32.totalorder %v5326_v56, 1  ;;  %v4303_v6 = vld [vmem:[%s5974_s17 + $0x8] sm:$0xff]  ;;  %v4302_v8 = vld [vmem:[%s5974_s17] sm:$0xff] }
 0xcad   :  { %v1628_v12 = vadd.f32 1e-06, %v1615_v31  ;;  %v1620_v7 = vsub.f32 1.5, %v1619_v9  ;;  %v5363_v9 = vpop.permute.xlu2 %1698 }
 0xcae   :  { %1789 = vmatpush.bf16.msrb.mxu1 %v4306_v55 }
 0xcaf   :  { %4638 = vrcp.f32 %v1628_v12  ;;  %v1621_v14 = vmul.f32 %v4637_v11, %v1620_v7  ;;  %v1641_v33 = vand.u32 2147483648, %v1628_v12  ;;  %v1639_v27 = vand.u32 2147483647, %v1628_v12 }
 0xcb0   :  { %vm1635_vm11 = vweird.f32 %v1628_v12  ;;  %v5365_v31 = vpop.permute.xlu0 %1695 }
 0xcb1   :  { %v1622_v10 = vmul.f32 %v1621_v14, %v1603_v62  ;;  %v1642_v39 = vor.u32 1.1754944e-38, %v1641_v33  ;;  %vm1640_vm13 = vcmp.eq.f32.partialorder %v1639_v27, 8.507059e+37  ;;  %v4319_v27 = vld [vmem:[%s5976_s19 + $0x58] sm:$0xff] }
 0xcb2   :  { %1790 = vmatpush.bf16.msrb.mxu1 %v4305_v4  ;;  %1947 = vmatpush.bf16.msra.mxu3 %v4319_v27 }
 0xcb3   :  { %v1624_v17 = vsel %vm1623_vm8, %v1603_v62, %v1622_v10  ;;  %vm1689_vm8 = vcmp.lt.s32.totalorder %v5321_v3, 2 }
 0xcb4   :  { %v1627_v18 = vsel %vm1625_vm9, %v1626_v15, %v1624_v17  ;;  %vm1717_vm9 = vcmp.eq.s32.totalorder %v5323_v54, 1 }
 0xcb5   :  { %v4639_v20 = vpop.eup %4638  ;;  %v1629_v21 = vadd.f32 1e-06, %v1627_v18 }
 0xcb6   :  { %v1631_v24 = vmul.f32 %v4639_v20, %v1628_v12  ;;  %vm1636_vm10 = vweird.f32 %v4639_v20  ;;  %1791 = vmatpush.bf16.msrb.mxu1 %v4304_v5  ;;  %v4541_v5 = vld [vmem:[%s5977_s20] ss:$0 sm:$0xff] }
 0xcb7   :  { %4640 = vrcp.f32 %v1629_v21  ;;  %vm1637_vm12 = vmor %vm1635_vm11, %vm1636_vm10  ;;  %v1656_v46 = vand.u32 2147483648, %v1629_v21  ;;  %v1654_v13 = vand.u32 2147483647, %v1629_v21  ;;  %vm1650_vm3 = vweird.f32 %v1629_v21 }
 0xcb8   :  { %v1632_v25 = vsub.f32 1.0, %v1631_v24  ;;  %vm6008_vm10 = vcmp.eq.s32.totalorder %v5363_v9, 1  ;;  %vm1700_vm11 = vcmp.eq.s32.totalorder %v5365_v31, 1 }
 0xcb9   :  { %v1657_v49 = vor.u32 1.1754944e-38, %v1656_v46  ;;  %vm1655_vm5 = vcmp.eq.f32.partialorder %v1654_v13, 8.507059e+37  ;;  %v4311_v46 = vld [vmem:[%s5976_s19 + $0x18] sm:$0xff] }
 0xcba   :  { %v1633_v26 = vmul.f32 %v4639_v20, %v1632_v25  ;;  %1792 = vmatpush.bf16.msrb.mxu1 %v4303_v6 }
 0xcbc   :  { %v1634_v35 = vadd.f32 %v4639_v20, %v1633_v26 }
 0xcbd   :  { %v4641_v36 = vpop.eup %4640 }
 0xcbe   :  { %v1638_v38 = vsel %vm1637_vm12, %v4639_v20, %v1634_v35  ;;  %v1646_v40 = vmul.f32 %v4641_v36, %v1629_v21  ;;  %vm1651_vm2 = vweird.f32 %v4641_v36  ;;  %1793 = vmatpush.bf16.msrb.mxu1 %v4302_v8  ;;  %vm6007_vm12 = vcmask 523264   ;;  %v4318_v35 = vld [vmem:[%s5976_s19 + $0x50] sm:$0xff] }
 0xcbf   :  { %v1643_v42 = vsel %vm1640_vm13, %v1642_v39, %v1638_v38  ;;  %vm1652_vm4 = vmor %vm1650_vm3, %vm1651_vm2  ;;  %vm6006_vm13 = vcmask 785408   ;;  %1948 = vmatpush.bf16.msra.mxu3 %v4318_v35  ;;  %v4315_v38 = vld [vmem:[%s5976_s19 + $0x38] sm:$0xff]  ;;  %v4314_v39 = vld [vmem:[%s5976_s19 + $0x30] sm:$0xff] }
 0xcc0   :  { %v1647_v43 = vsub.f32 1.0, %v1646_v40  ;;  %v1665_v59 = vmul.f32 %v1663_v45, %v1643_v42  ;;  %1929 = vmatpush.bf16.msrb.mxu2 %v4315_v38  ;;  %v4313_v40 = vld [vmem:[%s5976_s19 + $0x28] sm:$0xff]  ;;  %v4312_v42 = vld [vmem:[%s5976_s19 + $0x20] sm:$0xff] }
 0xcc2   :  { %v1648_v22 = vmul.f32 %v4641_v36, %v1647_v43  ;;  %v1670_v28 = vadd.f32 %v4539_v16, %v1665_v59  ;;  %v4540_v43 = vld [vmem:[%s5975_s18] ss:$0 sm:$0xff] }
 0xcc4   :  { %v1649_v48 = vadd.f32 %v4641_v36, %v1648_v22  ;;  %v1704_v58 = vrot.slane %v1670_v28, 7  ;;  %v1685_v30 = vrot.slane %v1670_v28, 6  ;;  %1930 = vmatpush.bf16.msrb.mxu2 %v4314_v39  ;;  %v4310_v22 = vld [vmem:[%s5976_s19 + $0x10] sm:$0xff] }
 0xcc6   :  { %v1653_v50 = vsel %vm1652_vm4, %v4641_v36, %v1649_v48  ;;  %v4317_v36 = vld [vmem:[%s5976_s19 + $0x48] sm:$0xff] }
 0xcc7   :  { %v1658_v52 = vsel %vm1655_vm5, %v1657_v49, %v1653_v50  ;;  %1949 = vmatpush.bf16.msra.mxu3 %v4317_v36  ;;  %v4309_v48 = vld [vmem:[%s5976_s19 + $0x8] sm:$0xff] }
 0xcc8   :  { %v1666_v53 = vmul.f32 %v1664_v0, %v1658_v52  ;;  %1931 = vmatpush.bf16.msrb.mxu2 %v4313_v40 }
 0xcca   :  { %v1671_v57 = vadd.f32 %v4539_v16, %v1666_v53 }
 0xccb   :  { %1950 = vmatpush.bf16.msra.mxu3 %v4316_v37 }
 0xccc   :  { %v1705_v51 = vrot.slane %v1671_v57, 7  ;;  %v1686_v32 = vrot.slane %v1671_v57, 6  ;;  %v4439_v61 = vpack.i.bf16 %v1671_v57, %v1670_v28  ;;  %1932 = vmatpush.bf16.msrb.mxu2 %v4312_v42 }
 0xcce   :  { %v1707_v29 = vsel %vm1706_vm6, %v1704_v58, %v1705_v51  ;;  %v1690_v62 = vsel %vm1689_vm8, %v1685_v30, %v1686_v32  ;;  %v1691_v63 = vsel %vm1689_vm8, %v1686_v32, %v1685_v30  ;;  %v1708_v60 = vsel %vm1706_vm6, %v1705_v51, %v1704_v58  ;;  %4440 = vrot.lane.b32.xlu2 %v4439_v61, %s6032_s5 }
 0xccf   :  { %v1720_v1 = vsel %vm1718_vm7, %v1707_v29, 0.0  ;;  %v1719_v2 = vsel %vm1717_vm9, %v1708_v60, 0.0  ;;  %v1703_v15 = vsel %vm6008_vm10, %v1690_v62, 0.0  ;;  %v1702_v17 = vsel %vm1700_vm11, %v1691_v63, 0.0  ;;  %v4308_v62 = vld [vmem:[%s5976_s19] sm:$0xff] }
 0xcd0   :  { %v4434_v11 = vpack.i.bf16 %v1720_v1, %v1719_v2  ;;  %1933 = vmatpush.bf16.msrb.mxu2 %v4311_v46  ;;  %v4320_v46 = vld [vmem:[%s5965_s8 + $0x10] sm:$0xff] }
 0xcd2   :  { %4435 = vrot.lane.b32.xlu1 %v4434_v11, %s6005_s1  ;;  %s6035_s1 = smov 112  }
 0xcd4   :  { %1934 = vmatpush.bf16.msrb.mxu2 %v4310_v22 }
 0xcd8   :  { %1935 = vmatpush.bf16.msrb.mxu2 %v4309_v48 }
 0xcdc   :  { %1936 = vmatpush.bf16.msrb.mxu2 %v4308_v62 }
 0xd28   :  { %v4441_v12 = vpop.permute.xlu2 %4440 }
 0xd29   :  { %v4443_v18 = vunpack.i.h.bf16 %v4441_v12  ;;  %v4442_v20 = vunpack.i.l.bf16 %v4441_v12 }
 0xd44   :  { %v4436_v7 = vpop.permute.xlu1 %4435 }
 0xd45   :  { %v4438_v14 = vunpack.i.h.bf16 %v4436_v7  ;;  %v4437_v10 = vunpack.i.l.bf16 %v4436_v7 }
 0xd47   :  { %v1738_v21 = vsel %vm97_vm0, %v1703_v15, %v4438_v14  ;;  %v1737_v24 = vsel %vm97_vm0, %v1702_v17, %v4437_v10 }
 0xd48   :  { %v1741_v25 = vsel %vm6007_vm12, %v1738_v21, %v4443_v18  ;;  %v1740_v26 = vsel %vm6007_vm12, %v1737_v24, %v4442_v20 }
 0xd49   :  { %v1742_v33 = vpack.c.bf16 %v1741_v25, %v1740_v26 }
 0xd4b   :  { %4009 = vmatmul.msk.bf16.vlgmr.msrb.gmra.mxu1 %vm6006_vm13, %v1742_v33 }
 0xdc8   :  { %v1795_v45 = vpop.f32.mrf.mxu1 }
 0xdc9   :  { %v1796_v23 = vadd.f32 %v4540_v43, %v1795_v45  ;;  %v4321_v45 = vld [vmem:[%s5965_s8 + $0x18] sm:$0xff] }
 0xdca   :  { %2080 = vmatpush.bf16.msra.mxu0 %v4321_v45 }
 0xdcb   :  { %v1800_v13 = vmax.f32 %v1796_v23, 0.0 }
 0xdcd   :  { %v1827_v0 = vrot.slane %v1800_v13, 6  ;;  %v1833_v50 = vrot.slane %v1800_v13, 7 }
 0xdce   :  { %2081 = vmatpush.bf16.msra.mxu0 %v4320_v46 }
 0xdd0   :  { %v1797_v59 = vpop.f32.mrf.mxu1 }
 0xdd1   :  { %v1798_v16 = vadd.f32 %v4540_v43, %v1797_v59 }
 0xdd3   :  { %v1801_v49 = vmax.f32 %v1798_v16, 0.0 }
 0xdd5   :  { %v1828_v28 = vrot.slane %v1801_v49, 6  ;;  %v1834_v52 = vrot.slane %v1801_v49, 7  ;;  %v1850_v53 = vpack.c.bf16 %v1801_v49, %v1800_v13 }
 0xdd7   :  { %4058 = vmatmul.msk.bf16.vlgmr.msra.gmra.mxu3 %vm6007_vm12, %v1850_v53  ;;  %v1835_v57 = vsel %vm1706_vm6, %v1833_v50, %v1834_v52  ;;  %v1836_v58 = vsel %vm1706_vm6, %v1834_v52, %v1833_v50  ;;  %v1829_v51 = vsel %vm1689_vm8, %v1827_v0, %v1828_v28  ;;  %v1830_v30 = vsel %vm1689_vm8, %v1828_v28, %v1827_v0 }
 0xdd8   :  { %v1837_v32 = vsel %vm1717_vm9, %v1836_v58, 0.0  ;;  %v1838_v61 = vsel %vm1718_vm7, %v1835_v57, 0.0  ;;  %v1831_v2 = vsel %vm1700_vm11, %v1830_v30, 0.0  ;;  %v1832_v11 = vsel %vm6008_vm10, %v1829_v51, 0.0 }
 0xdd9   :  { %v4444_v29 = vpack.i.bf16 %v1838_v61, %v1837_v32 }
 0xddb   :  { %4445 = vrot.lane.b32.xlu1 %v4444_v29, %s6032_s5 }
 0xe4d   :  { %v4446_v63 = vpop.permute.xlu1 %4445 }
 0xe4e   :  { %v4448_v60 = vunpack.i.h.bf16 %v4446_v63  ;;  %v4447_v1 = vunpack.i.l.bf16 %v4446_v63 }
 0xe50   :  { %v1847_v41 = vsel %vm6007_vm12, %v1831_v2, %v4447_v1  ;;  %v1848_v55 = vsel %vm6007_vm12, %v1832_v11, %v4448_v60 }
 0xe51   :  { %v1849_v4 = vpack.c.bf16 %v1848_v55, %v1847_v41 }
 0xe53   :  { %1937 = vmatmul.bf16.vlgmr.msrb.gmra.mxu2 %v1849_v4 }
 0xe5a   :  { %v1952_v6 = vpop.f32.mrf.mxu3 }
 0xe62   :  { %v1954_v20 = vpop.f32.mrf.mxu3 }
 0xed6   :  { %v1938_v8 = vpop.f32.mrf.mxu2 }
 0xed7   :  { %v1939_v12 = vadd.f32 %v4541_v5, %v1938_v8 }
 0xed9   :  { %v1953_v7 = vadd.f32 %v1952_v6, %v1939_v12 }
 0xedb   :  { %v1957_v14 = vmax.f32 %v1953_v7, 0.0 }
 0xedd   :  { %v5441_v10 = vadd.f32 %v1957_v14, %v5284_v44  ;;  %v4542_v14 = vld [vmem:[%s6023_s26 + $0x1] ss:$0 sm:$0xff] }
 0xede   :  { %v1940_v15 = vpop.f32.mrf.mxu2 }
 0xedf   :  { %v1941_v17 = vadd.f32 %v4541_v5, %v1940_v15  ;;  %v1965_v18 = vsel %vm97_vm0, %v5441_v10, 0.0 }
 0xee0   :  { %1966 = vadd.xlane.f32.xlu2 %v1965_v18 }
 0xee1   :  { %v1955_v21 = vadd.f32 %v1954_v20, %v1941_v17 }
 0xee3   :  { %v1958_v24 = vmax.f32 %v1955_v21, 0.0 }
 0xee5   :  { %v5446_v25 = vadd.f32 %v1958_v24, %v5289_v47 }
 0xee7   :  { %v1968_v26 = vsel %vm97_vm0, %v5446_v25, 0.0 }
 0xee8   :  { %1969 = vadd.xlane.f32.xlu1 %v1968_v26 }
 0xf53   :  { %v1967_v33 = vpop.xlane.xlu2 %1966 }
 0xf54   :  { %v1971_v44 = vmul.f32 %v1967_v33, %v4925_v19 }
 0xf56   :  { %v5452_v27 = vsub.f32 %v5441_v10, %v1971_v44 }
 0xf58   :  { %v1975_v35 = vmul.f32 %v5452_v27, %v5452_v27  ;;  %v2044_v33 = vmul.f32 %v4542_v14, %v5452_v27 }
 0xf5a   :  { %v1977_v36 = vsel %vm97_vm0, %v1975_v35, 0.0 }
 0xf5b   :  { %v1970_v37 = vpop.xlane.xlu1 %1969  ;;  %1978 = vadd.xlane.f32.xlu0 %v1977_v36 }
 0xf5c   :  { %v1972_v47 = vmul.f32 %v1970_v37, %v4925_v19 }
 0xf5e   :  { %v5459_v38 = vsub.f32 %v5446_v25, %v1972_v47 }
 0xf60   :  { %v1976_v39 = vmul.f32 %v5459_v38, %v5459_v38  ;;  %v2045_v36 = vmul.f32 %v4542_v14, %v5459_v38 }
 0xf62   :  { %v1980_v40 = vsel %vm97_vm0, %v1976_v39, 0.0  ;;  %v4543_v39 = vld [vmem:[%s6024_s27 + $0x1] ss:$0 sm:$0xff] }
 0xf63   :  { %1981 = vadd.xlane.f32.xlu2 %v1980_v40 }
 0xfce   :  { %v1979_v42 = vpop.xlane.xlu0 %1978 }
 0xfcf   :  { %v1983_v43 = vmul.f32 0.032258064, %v1979_v42 }
 0xfd1   :  { %4642 = vrsqrt.f32 %v1983_v43  ;;  %vm1992_vm2 = vcmp.eq.f32.partialorder %v1983_v43, inf  ;;  %v1995_v57 = vand.u32 2147483648, %v1983_v43  ;;  %vm1994_vm3 = vcmp.eq.f32.partialorder %v1983_v43, 0.0 }
 0xfd6   :  { %v1982_v23 = vpop.xlane.xlu2 %1981 }
 0xfd7   :  { %v4643_v22 = vpop.eup %4642  ;;  %v1984_v13 = vmul.f32 0.032258064, %v1982_v23 }
 0xfd8   :  { %v1986_v59 = vmul.f32 %v4643_v22, %v1983_v43 }
 0xfd9   :  { %4644 = vrsqrt.f32 %v1984_v13  ;;  %vm2004_vm4 = vcmp.eq.f32.partialorder %v1984_v13, inf  ;;  %v2007_v63 = vand.u32 2147483648, %v1984_v13  ;;  %vm2006_vm5 = vcmp.eq.f32.partialorder %v1984_v13, 0.0 }
 0xfda   :  { %v1987_v16 = vmul.f32 %v4643_v22, %v1986_v59 }
 0xfdc   :  { %v1988_v48 = vmul.f32 0.5, %v1987_v16 }
 0xfde   :  { %v1989_v49 = vsub.f32 1.5, %v1988_v48 }
 0xfdf   :  { %v4645_v0 = vpop.eup %4644 }
 0xfe0   :  { %v1990_v50 = vmul.f32 %v4643_v22, %v1989_v49  ;;  %v1998_v28 = vmul.f32 %v4645_v0, %v1984_v13 }
 0xfe2   :  { %v1991_v52 = vmul.f32 %v1990_v50, %v1983_v43  ;;  %v1999_v53 = vmul.f32 %v4645_v0, %v1998_v28 }
 0xfe4   :  { %v1993_v58 = vsel %vm1992_vm2, %v1983_v43, %v1991_v52  ;;  %v2000_v51 = vmul.f32 0.5, %v1999_v53 }
 0xfe5   :  { %v1996_v30 = vsel %vm1994_vm3, %v1995_v57, %v1993_v58 }
 0xfe6   :  { %v2009_v32 = vadd.f32 1e-06, %v1996_v30  ;;  %v2001_v61 = vsub.f32 1.5, %v2000_v51  ;;  %v4738_v30 = vld [vmem:[%s6025_s30] sm:$0xff] }
 0xfe8   :  { %4646 = vrcp.f32 %v2009_v32  ;;  %v2002_v29 = vmul.f32 %v4645_v0, %v2001_v61  ;;  %v2022_v8 = vand.u32 2147483648, %v2009_v32  ;;  %vm2016_vm3 = vweird.f32 %v2009_v32 }
 0xfe9   :  { %v2020_v12 = vand.u32 2147483647, %v2009_v32 }
 0xfea   :  { %v2003_v62 = vmul.f32 %v2002_v29, %v1984_v13  ;;  %v2023_v18 = vor.u32 1.1754944e-38, %v2022_v8 }
 0xfec   :  { %v2005_v60 = vsel %vm2004_vm4, %v1984_v13, %v2003_v62  ;;  %vm2021_vm4 = vcmp.eq.f32.partialorder %v2020_v12, 8.507059e+37 }
 0xfed   :  { %v2008_v1 = vsel %vm2006_vm5, %v2007_v63, %v2005_v60 }
 0xfee   :  { %v4647_v2 = vpop.eup %4646  ;;  %v2010_v11 = vadd.f32 1e-06, %v2008_v1 }
 0xfef   :  { %v2012_v41 = vmul.f32 %v4647_v2, %v2009_v32  ;;  %vm2017_vm2 = vweird.f32 %v4647_v2 }
 0xff0   :  { %4648 = vrcp.f32 %v2010_v11  ;;  %vm2018_vm13 = vmor %vm2016_vm3, %vm2017_vm2  ;;  %v2037_v20 = vand.u32 2147483648, %v2010_v11  ;;  %v2035_v24 = vand.u32 2147483647, %v2010_v11  ;;  %vm2031_vm12 = vweird.f32 %v2010_v11 }
 0xff1   :  { %v2013_v55 = vsub.f32 1.0, %v2012_v41 }
 0xff2   :  { %v2038_v35 = vor.u32 1.1754944e-38, %v2037_v20  ;;  %vm2036_vm2 = vcmp.eq.f32.partialorder %v2035_v24, 8.507059e+37 }
 0xff3   :  { %v2014_v4 = vmul.f32 %v4647_v2, %v2013_v55 }
 0xff5   :  { %v2015_v5 = vadd.f32 %v4647_v2, %v2014_v4 }
 0xff6   :  { %v4649_v6 = vpop.eup %4648 }
 0xff7   :  { %v2027_v7 = vmul.f32 %v4649_v6, %v2010_v11  ;;  %v2019_v15 = vsel %vm2018_vm13, %v4647_v2, %v2015_v5  ;;  %vm2032_vm5 = vweird.f32 %v4649_v6 }
 0xff8   :  { %v2024_v26 = vsel %vm2021_vm4, %v2023_v18, %v2019_v15  ;;  %vm2033_vm10 = vmor %vm2031_vm12, %vm2032_vm5 }
 0xff9   :  { %v2028_v17 = vsub.f32 1.0, %v2027_v7  ;;  %v2046_v47 = vmul.f32 %v2044_v33, %v2024_v26 }
 0xffb   :  { %v2029_v21 = vmul.f32 %v4649_v6, %v2028_v17  ;;  %v2051_v43 = vadd.f32 %v4543_v39, %v2046_v47 }
 0xffd   :  { %v2030_v44 = vadd.f32 %v4649_v6, %v2029_v21 }
 0xfff   :  { %v2034_v37 = vsel %vm2033_vm10, %v4649_v6, %v2030_v44 }
0x1000   :  { %v2039_v40 = vsel %vm2036_vm2, %v2038_v35, %v2034_v37 }
0x1001   :  { %v2047_v42 = vmul.f32 %v2045_v36, %v2039_v40 }
0x1003   :  { %v2052_v45 = vadd.f32 %v4543_v39, %v2047_v42 }
0x1005   :  { %v2053_v46 = vpack.c.bf16 %v2052_v45, %v2051_v43 }
0x1007   :  { %4073 = vmatmul.msk.bf16.vlgmr.msra.gmra.mxu0 %vm97_vm0, %v2053_v46 }
0x1084   :  { %v5479_v27 = vpop.f32.mrf.mxu0 }
0x1085   :  { %2103 = vrot.lane.b32.xlu2 %v5479_v27, %s6033_s28  ;;  %2095 = vrot.lane.b32.xlu0 %v5479_v27, %s6034_s3 }
0x108c   :  { %v5485_v38 = vpop.f32.mrf.mxu0 }
0x108d   :  { %2101 = vrot.lane.b32.xlu2 %v5485_v38, %s6035_s1  ;;  %2105 = vrot.lane.b32.xlu0 %v5485_v38, %s6033_s28 }
0x108e   :  { %2097 = vrot.lane.b32.xlu1 %v5485_v38, %s6034_s3 }
0x1095   :  { %2107 = vrot.lane.b32.xlu0 %v5479_v27, %s6027_s4 }
0x1096   :  { %2099 = vrot.lane.b32.xlu1 %v5479_v27, %s6035_s1 }
0x10df   :  { %v5497_v23 = vpop.permute.xlu2 %2103 }
0x10e0   :  { %2263 = vrot.lane.b32.xlu0 %v5497_v23, %s6027_s4 }
0x10e7   :  { %v5522_v49 = vpop.permute.xlu2 %2101 }
0x10f7   :  { %v5501_v22 = vpop.permute.xlu0 %2095 }
0x10f8   :  { %2159 = vrot.lane.b32.xlu2 %v5501_v22, %s6027_s4 }
0x10ff   :  { %v5505_v13 = vpop.permute.xlu0 %2105 }
0x1100   :  { %v5507_v59 = vpop.permute.xlu1 %2097  ;;  %2133 = vrot.lane.b32.xlu2 %v5485_v38, %s6027_s4 }
0x1101   :  { %2185 = vrot.lane.b32.xlu1 %v5507_v59, %s6027_s4 }
0x1107   :  { %v2108_v16 = vpop.permute.xlu0 %2107 }
0x1108   :  { %v5513_v48 = vpop.permute.xlu1 %2099  ;;  %4078 = vmatpush.xpose.msk.msrb.mxu3 %vm275_vm14, %v2108_v16 }
0x1109   :  { %2289 = vrot.lane.b32.xlu1 %v5505_v13, %s6027_s4  ;;  %2211 = vrot.lane.b32.xlu0 %v5513_v48, %s6027_s4 }
0x110b   :  { %4079 = vmatmul.msk.f32.vlgmr.msrb.gmra.mxu3 %vm275_vm14, %v5479_v27 }
0x1111   :  { %2237 = vrot.lane.b32.xlu1 %v5522_v49, %s6027_s4 }
0x1152   :  { %v2160_v0 = vpop.permute.xlu2 %2159  ;;  %v2264_v50 = vpop.permute.xlu0 %2263 }
0x1153   :  { %4082 = vmatpush.xpose.msk.msra.mxu1 %vm275_vm14, %v2160_v0  ;;  %4090 = vmatpush.xpose.msk.msra.mxu2 %vm275_vm14, %v2264_v50 }
0x1156   :  { %4083 = vmatmul.msk.f32.vlgmr.msra.gmra.mxu1 %vm275_vm14, %v5501_v22  ;;  %4091 = vmatmul.msk.f32.vlgmr.msra.gmra.mxu2 %vm275_vm14, %v5497_v23 }
0x115a   :  { %v2134_v28 = vpop.permute.xlu2 %2133 }
0x115b   :  { %4080 = vmatpush.xpose.msk.msrb.mxu0 %vm275_vm14, %v2134_v28 }
0x115e   :  { %4081 = vmatmul.msk.f32.vlgmr.msrb.gmra.mxu0 %vm275_vm14, %v5485_v38 }
0x1173   :  { %v2186_v52 = vpop.permute.xlu1 %2185 }
0x1174   :  { %4084 = vmatpush.xpose.msk.msra.mxu3 %vm275_vm14, %v2186_v52 }
0x1177   :  { %4085 = vmatmul.msk.f32.vlgmr.msra.gmra.mxu3 %vm275_vm14, %v5507_v59 }
0x117b   :  { %v2212_v53 = vpop.permute.xlu0 %2211  ;;  %v2290_v57 = vpop.permute.xlu1 %2289 }
0x117c   :  { %4086 = vmatpush.xpose.msk.msra.mxu0 %vm275_vm14, %v2212_v53  ;;  %4092 = vmatpush.xpose.msk.msrb.mxu3 %vm275_vm14, %v2290_v57 }
0x117f   :  { %4087 = vmatmul.msk.f32.vlgmr.msra.gmra.mxu0 %vm275_vm14, %v5513_v48  ;;  %4093 = vmatmul.msk.f32.vlgmr.msrb.gmra.mxu3 %vm275_vm14, %v5505_v13 }
0x1183   :  { %v2238_v58 = vpop.permute.xlu1 %2237 }
0x1184   :  { %4088 = vmatpush.xpose.msk.msrb.mxu1 %vm275_vm14, %v2238_v58  ;;  %v4449_v58 = vpack.i.bf16 %v5507_v59, %v5501_v22 }
0x1187   :  { %4089 = vmatmul.msk.f32.vlgmr.msrb.gmra.mxu1 %vm275_vm14, %v5522_v49 }
0x118e   :  { %v2130_v51 = vpop.f32.mrf.mxu3 }
0x118f   :  { %v2131_v32 = vadd.f32 %v4738_v30, %v2130_v51 }
0x1191   :  { %v2315_v61 = vsel %vm275_vm14, %v2131_v32, -inf }
0x1192   :  { %2316 = vmax.xlane.f32.xlu1 %v2315_v61 }
0x11d3   :  { %v2182_v11 = vpop.f32.mrf.mxu1 }
0x11d4   :  { %v5553_v41 = vadd.f32 %v4738_v30, %v2182_v11 }
0x11d6   :  { %v2321_v55 = vsel %vm275_vm14, %v5553_v41, -inf }
0x11d9   :  { %v2286_v29 = vpop.f32.mrf.mxu2 }
0x11da   :  { %v2287_v62 = vadd.f32 %v4738_v30, %v2286_v29 }
0x11db   :  { %v2156_v63 = vpop.f32.mrf.mxu0 }
0x11dc   :  { %v2157_v60 = vadd.f32 %v4738_v30, %v2156_v63  ;;  %v2333_v1 = vsel %vm275_vm14, %v2287_v62, -inf }
0x11dd   :  { %2334 = vmax.xlane.f32.xlu0 %v2333_v1 }
0x11de   :  { %v2318_v2 = vsel %vm275_vm14, %v2157_v60, -inf }
0x11df   :  { %2319 = vmax.xlane.f32.xlu2 %v2318_v2 }
0x11e7   :  { %2322 = vmax.xlane.f32.xlu2 %v2321_v55  ;;  %v4454_v55 = vpack.i.bf16 %v5485_v38, %v5479_v27 }
0x11fa   :  { %v2208_v4 = vpop.f32.mrf.mxu3 }
0x11fb   :  { %v2209_v5 = vadd.f32 %v4738_v30, %v2208_v4 }
0x11fc   :  { %v2234_v6 = vpop.f32.mrf.mxu0 }
0x11fd   :  { %v2235_v8 = vadd.f32 %v4738_v30, %v2234_v6  ;;  %v2324_v12 = vsel %vm275_vm14, %v2209_v5, -inf }
0x11fe   :  { %2325 = vmax.xlane.f32.xlu0 %v2324_v12 }
0x11ff   :  { %v2327_v7 = vsel %vm275_vm14, %v2235_v8, -inf }
0x1200   :  { %2328 = vmax.xlane.f32.xlu2 %v2327_v7 }
0x1202   :  { %v2312_v47 = vpop.f32.mrf.mxu3 }
0x1203   :  { %v2313_v39 = vadd.f32 %v4738_v30, %v2312_v47 }
0x1204   :  { %v2260_v14 = vpop.f32.mrf.mxu1 }
0x1205   :  { %v2261_v15 = vadd.f32 %v4738_v30, %v2260_v14  ;;  %v2317_v17 = vpop.xlane.xlu1 %2316  ;;  %v2336_v40 = vsel %vm275_vm14, %v2313_v39, -inf }
0x1206   :  { %v2339_v18 = vsub.f32 %v2131_v32, %v2317_v17 }
0x1207   :  { %v2330_v20 = vsel %vm275_vm14, %v2261_v15, -inf }
0x1208   :  { %v2347_v21 = vmul.f32 1.442695, %v2339_v18  ;;  %2331 = vmax.xlane.f32.xlu0 %v2330_v20 }
0x120a   :  { %4650 = vpow2.f32 %v2347_v21 }
0x1210   :  { %v5560_v24 = vpop.eup %4650 }
0x1211   :  { %v2363_v26 = vsel %vm275_vm14, %v5560_v24, 0.0 }
0x1212   :  { %2364 = vadd.xlane.f32.xlu0 %v2363_v26 }
0x1250   :  { %v2335_v42 = vpop.xlane.xlu0 %2334 }
0x1251   :  { %v2345_v0 = vsub.f32 %v2287_v62, %v2335_v42 }
0x1252   :  { %v2320_v33 = vpop.xlane.xlu2 %2319 }
0x1253   :  { %v2340_v44 = vsub.f32 %v2157_v60, %v2320_v33  ;;  %v2359_v28 = vmul.f32 1.442695, %v2345_v0 }
0x1255   :  { %v2349_v35 = vmul.f32 1.442695, %v2340_v44 }
0x1257   :  { %4652 = vpow2.f32 %v2349_v35 }
0x125a   :  { %v2323_v43 = vpop.xlane.xlu2 %2322 }
0x125b   :  { %v2341_v1 = vsub.f32 %v5553_v41, %v2323_v43 }
0x125d   :  { %v5564_v36 = vpop.eup %4652  ;;  %v2351_v2 = vmul.f32 1.442695, %v2341_v1 }
0x125e   :  { %v2366_v37 = vsel %vm275_vm14, %v5564_v36, 0.0 }
0x125f   :  { %2367 = vadd.xlane.f32.xlu1 %v2366_v37 }
0x1267   :  { %2337 = vmax.xlane.f32.xlu1 %v2336_v40 }
0x1271   :  { %v2326_v45 = vpop.xlane.xlu0 %2325 }
0x1272   :  { %v2342_v51 = vsub.f32 %v2209_v5, %v2326_v45  ;;  %v4464_v5 = vpack.i.bf16 %v5522_v49, %v5513_v48  ;;  %v4459_v48 = vpack.i.bf16 %v5505_v13, %v5497_v23 }
0x1273   :  { %v2329_v46 = vpop.xlane.xlu2 %2328 }
0x1274   :  { %v2343_v16 = vsub.f32 %v2235_v8, %v2329_v46  ;;  %v2353_v61 = vmul.f32 1.442695, %v2342_v51 }
0x1276   :  { %v2355_v50 = vmul.f32 1.442695, %v2343_v16 }
0x1278   :  { %4654 = vpow2.f32 %v2355_v50 }
0x1279   :  { %4656 = vpow2.f32 %v2359_v28 }
0x127b   :  { %v2332_v52 = vpop.xlane.xlu0 %2331 }
0x127c   :  { %v2344_v53 = vsub.f32 %v2261_v15, %v2332_v52 }
0x127e   :  { %v5569_v57 = vpop.eup %4654  ;;  %v2357_v30 = vmul.f32 1.442695, %v2344_v53 }
0x127f   :  { %v2375_v32 = vsel %vm275_vm14, %v5569_v57, 0.0  ;;  %v5576_v29 = vpop.eup %4656 }
0x1280   :  { %4658 = vpow2.f32 %v2357_v30  ;;  %2376 = vadd.xlane.f32.xlu2 %v2375_v32  ;;  %4450 = vrot.lane.b32.xlu1 %v4449_v58, %s6032_s5  ;;  %v2381_v63 = vsel %vm275_vm14, %v5576_v29, 0.0 }
0x1281   :  { %4660 = vpow2.f32 %v2353_v61 }
0x1282   :  { %4662 = vpow2.f32 %v2351_v2 }
0x1285   :  { %v2365_v18 = vpop.xlane.xlu0 %2364 }
0x1286   :  { %v5578_v62 = vpop.eup %4658 }
0x1287   :  { %v2378_v22 = vsel %vm275_vm14, %v5578_v62, 0.0  ;;  %v4661_v59 = vpop.eup %4660 }
0x1288   :  { %2382 = vadd.xlane.f32.xlu2 %v2381_v63  ;;  %2379 = vadd.xlane.f32.xlu0 %v2378_v22  ;;  %v2372_v60 = vsel %vm275_vm14, %v4661_v59, 0.0  ;;  %v4663_v11 = vpop.eup %4662 }
0x1289   :  { %v2369_v4 = vsel %vm275_vm14, %v4663_v11, 0.0 }
0x1290   :  { %2373 = vadd.xlane.f32.xlu2 %v2372_v60 }
0x12a8   :  { %4455 = vrot.lane.b32.xlu2 %v4454_v55, %s6032_s5 }
0x12aa   :  { %2370 = vadd.xlane.f32.xlu1 %v2369_v4  ;;  %v4323_v4 = vld [vmem:[%s5966_s9 + $0x18] sm:$0xff] }
0x12c3   :  { %4465 = vrot.lane.b32.xlu1 %v4464_v5, %s6032_s5  ;;  %v4322_v5 = vld [vmem:[%s5966_s9 + $0x10] sm:$0xff] }
0x12d2   :  { %v2368_v6 = vpop.xlane.xlu1 %2367 }
0x12da   :  { %v2338_v8 = vpop.xlane.xlu1 %2337 }
0x12db   :  { %v2346_v12 = vsub.f32 %v2313_v39, %v2338_v8 }
0x12dd   :  { %v2361_v41 = vmul.f32 1.442695, %v2346_v12 }
0x12df   :  { %4664 = vpow2.f32 %v2361_v41 }
0x12e0   :  { %4666 = vrcp.f32 %v2365_v18 }
0x12e1   :  { %4668 = vrcp.f32 %v2368_v6 }
0x12e5   :  { %v4665_v7 = vpop.eup %4664 }
0x12e6   :  { %v2384_v14 = vsel %vm275_vm14, %v4665_v7, 0.0  ;;  %v4667_v21 = vpop.eup %4666 }
0x12e7   :  { %2385 = vadd.xlane.f32.xlu0 %v2384_v14  ;;  %v4669_v26 = vpop.eup %4668  ;;  %v2395_v39 = vmul.f32 %v4667_v21, %v5560_v24 }
0x12e8   :  { %v2396_v40 = vmul.f32 %v4669_v26, %v5564_v36 }
0x12f2   :  { %v4451_v27 = vpop.permute.xlu1 %4450 }
0x12f3   :  { %v2377_v38 = vpop.xlane.xlu2 %2376  ;;  %v4453_v15 = vunpack.i.h.bf16 %v4451_v27  ;;  %v4452_v17 = vunpack.i.l.bf16 %v4451_v27 }
0x12f5   :  { %2476 = vmatpush.msrb.mxu2 %v4452_v17  ;;  %2502 = vmatpush.msra.mxu3 %v4453_v15 }
0x12fb   :  { %v2383_v49 = vpop.xlane.xlu2 %2382  ;;  %4460 = vrot.lane.b32.xlu0 %v4459_v48, %s6032_s5  ;;  %v2380_v43 = vpop.xlane.xlu0 %2379 }
0x1303   :  { %v2374_v20 = vpop.xlane.xlu2 %2373 }
0x1304   :  { %4670 = vrcp.f32 %v2374_v20 }
0x130a   :  { %v4671_v33 = vpop.eup %4670 }
0x130b   :  { %v2398_v44 = vmul.f32 %v4671_v33, %v4661_v59  ;;  %v4456_v35 = vpop.permute.xlu2 %4455 }
0x130c   :  { %v4458_v37 = vunpack.i.h.bf16 %v4456_v35  ;;  %v4457_v47 = vunpack.i.l.bf16 %v4456_v35 }
0x130d   :  { %4097 = vmatmul.msk.f32.vlgmr.msra.gmra.mxu3 %vm275_vm14, %v2398_v44 }
0x130e   :  { %2424 = vmatpush.msrb.mxu0 %v4457_v47  ;;  %2450 = vmatpush.msra.mxu1 %v4458_v37 }
0x130f   :  { %4094 = vmatmul.msk.f32.vlgmr.msrb.gmra.mxu0 %vm275_vm14, %v2395_v39  ;;  %4095 = vmatmul.msk.f32.vlgmr.msra.gmra.mxu1 %vm275_vm14, %v2396_v40 }
0x131d   :  { %v2371_v23 = vpop.xlane.xlu1 %2370 }
0x131e   :  { %4672 = vrcp.f32 %v2371_v23 }
0x131f   :  { %4674 = vrcp.f32 %v2377_v38 }
0x1320   :  { %4676 = vrcp.f32 %v2380_v43 }
0x1321   :  { %4678 = vrcp.f32 %v2383_v49 }
0x1324   :  { %v4673_v13 = vpop.eup %4672 }
0x1325   :  { %v2397_v42 = vmul.f32 %v4673_v13, %v4663_v11  ;;  %v4675_v24 = vpop.eup %4674 }
0x1326   :  { %v4677_v45 = vpop.eup %4676  ;;  %v2399_v0 = vmul.f32 %v4675_v24, %v5569_v57 }
0x1327   :  { %4096 = vmatmul.msk.f32.vlgmr.msrb.gmra.mxu2 %vm275_vm14, %v2397_v42  ;;  %v2400_v50 = vmul.f32 %v4677_v45, %v5578_v62  ;;  %v4679_v52 = vpop.eup %4678 }
0x1328   :  { %v2401_v32 = vmul.f32 %v4679_v52, %v5576_v29  ;;  %v4324_v52 = vld [vmem:[%s5969_s12 + $0x10] sm:$0xff] }
0x1335   :  { %v4466_v36 = vpop.permute.xlu1 %4465 }
0x1336   :  { %v4468_v46 = vunpack.i.h.bf16 %v4466_v36  ;;  %v4467_v16 = vunpack.i.l.bf16 %v4466_v36 }
0x1338   :  { %2528 = vmatpush.msra.mxu0 %v4467_v16  ;;  %2554 = vmatpush.msrb.mxu1 %v4468_v46  ;;  %v4327_v46 = vld [vmem:[%s5970_s13 + $0x18] sm:$0xff]  ;;  %v4326_v16 = vld [vmem:[%s5970_s13 + $0x10] sm:$0xff] }
0x1339   :  { %4098 = vmatmul.msk.f32.vlgmr.msra.gmra.mxu0 %vm275_vm14, %v2399_v0  ;;  %4099 = vmatmul.msk.f32.vlgmr.msrb.gmra.mxu1 %vm275_vm14, %v2400_v50 }
0x133a   :  { %2663 = vmatpush.bf16.msrb.mxu0 %v4323_v4 }
0x133e   :  { %2664 = vmatpush.bf16.msrb.mxu0 %v4322_v5 }
0x135a   :  { %v2386_v28 = vpop.xlane.xlu0 %2385 }
0x135b   :  { %4680 = vrcp.f32 %v2386_v28  ;;  %v4325_v28 = vld [vmem:[%s5969_s12 + $0x18] sm:$0xff] }
0x135c   :  { %2792 = vmatpush.bf16.msra.mxu1 %v4325_v28 }
0x1360   :  { %2793 = vmatpush.bf16.msra.mxu1 %v4324_v52 }
0x1361   :  { %v4681_v53 = vpop.eup %4680 }
0x1362   :  { %v2402_v61 = vmul.f32 %v4681_v53, %v4665_v7 }
0x136d   :  { %v4461_v58 = vpop.permute.xlu0 %4460 }
0x136e   :  { %v4463_v51 = vunpack.i.h.bf16 %v4461_v58  ;;  %v4462_v30 = vunpack.i.l.bf16 %v4461_v58 }
0x1370   :  { %2580 = vmatpush.msra.mxu2 %v4462_v30  ;;  %2606 = vmatpush.msrb.mxu3 %v4463_v51 }
0x1371   :  { %4100 = vmatmul.msk.f32.vlgmr.msra.gmra.mxu2 %vm275_vm14, %v2401_v32  ;;  %4101 = vmatmul.msk.f32.vlgmr.msrb.gmra.mxu3 %vm275_vm14, %v2402_v61 }
0x1372   :  { %2823 = vmatpush.bf16.msrb.mxu2 %v4327_v46 }
0x1376   :  { %2824 = vmatpush.bf16.msrb.mxu2 %v4326_v16 }
0x1379   :  { %4138 = vmatmul.msk.bf16.vlgmr.msrb.gmra.mxu2 %vm97_vm0, %v5139_v34 }
0x138c   :  { %v2426_v22 = vpop.f32.mrf.mxu0  ;;  %v2452_v59 = vpop.f32.mrf.mxu1 }
0x1390   :  { %v2504_v57 = vpop.f32.mrf.mxu3 }
0x13aa   :  { %v2478_v62 = vpop.f32.mrf.mxu2 }
0x13ab   :  { %v4469_v63 = vpack.i.bf16 %v2504_v57, %v2478_v62 }
0x13ad   :  { %4470 = vrot.lane.b32.xlu1 %v4469_v63, %s6028_s2 }
0x13b6   :  { %v2530_v60 = vpop.f32.mrf.mxu0  ;;  %v2556_v1 = vpop.f32.mrf.mxu1 }
0x13b7   :  { %v4474_v2 = vpack.i.bf16 %v2556_v1, %v2530_v60 }
0x13b9   :  { %4475 = vrot.lane.b32.xlu0 %v4474_v2, %s6030_s0 }
0x13f4   :  { %v2582_v29 = vpop.f32.mrf.mxu2  ;;  %v2608_v11 = vpop.f32.mrf.mxu3 }
0x13f5   :  { %v4479_v55 = vpack.i.bf16 %v2608_v11, %v2582_v29 }
0x13f7   :  { %4480 = vrot.lane.b32.xlu2 %v4479_v55, %s6029_s6 }
0x141f   :  { %v4471_v6 = vpop.permute.xlu1 %4470 }
0x1420   :  { %v4473_v12 = vunpack.i.h.bf16 %v4471_v6  ;;  %v4472_v41 = vunpack.i.l.bf16 %v4471_v6 }
0x1422   :  { %v2636_v38 = vsel %vm275_vm14, %v2452_v59, %v4473_v12  ;;  %v2635_v15 = vsel %vm275_vm14, %v2426_v22, %v4472_v41 }
0x142b   :  { %v4476_v8 = vpop.permute.xlu0 %4475 }
0x142c   :  { %v4478_v7 = vunpack.i.h.bf16 %v4476_v8  ;;  %v4477_v14 = vunpack.i.l.bf16 %v4476_v8 }
0x142e   :  { %v2637_v49 = vsel %vm804_vm15, %v2635_v15, %v4477_v14  ;;  %v2638_v18 = vsel %vm804_vm15, %v2636_v38, %v4478_v7 }
0x1451   :  { %v4481_v27 = vpop.permute.xlu2 %4480 }
0x1452   :  { %v4483_v17 = vunpack.i.h.bf16 %v4481_v27  ;;  %v4482_v48 = vunpack.i.l.bf16 %v4481_v27 }
0x1454   :  { %v2640_v20 = vsel %vm807_vm1, %v2638_v18, %v4483_v17  ;;  %v2639_v21 = vsel %vm807_vm1, %v2637_v49, %v4482_v48 }
0x1455   :  { %v2641_v26 = vpack.c.bf16 %v2640_v20, %v2639_v21  ;;  %v4544_v20 = vld [vmem:[%s5967_s10 + $0x1] ss:$0 sm:$0xff]  ;;  %s6046_s10 = sld [smem:[#allocation14_spill]] }
0x1457   :  { %4110 = vmatmul.msk.bf16.vlgmr.msrb.gmra.mxu0 %vm97_vm0, %v2641_v26 }
0x14d4   :  { %v2666_v33 = vpop.f32.mrf.mxu0 }
0x14d5   :  { %v5627_v44 = vadd.f32 %v2666_v33, %v5441_v10 }
0x14d7   :  { %v2677_v35 = vsel %vm97_vm0, %v5627_v44, 0.0 }
0x14d8   :  { %2678 = vadd.xlane.f32.xlu1 %v2677_v35 }
0x14dc   :  { %v2668_v37 = vpop.f32.mrf.mxu0 }
0x14dd   :  { %v5632_v47 = vadd.f32 %v2668_v37, %v5446_v25 }
0x14df   :  { %v2680_v39 = vsel %vm97_vm0, %v5632_v47, 0.0 }
0x14e0   :  { %2681 = vadd.xlane.f32.xlu0 %v2680_v39 }
0x154b   :  { %v2679_v40 = vpop.xlane.xlu1 %2678 }
0x154c   :  { %v2683_v23 = vmul.f32 %v2679_v40, %v4925_v19 }
0x154e   :  { %v5638_v13 = vsub.f32 %v5627_v44, %v2683_v23 }
0x1550   :  { %v2687_v10 = vmul.f32 %v5638_v13, %v5638_v13  ;;  %v2756_v23 = vmul.f32 %v4544_v20, %v5638_v13  ;;  %v5673_v13 = vpop.f32.mrf.mxu2 }
0x1551   :  { %2856 = vrot.lane.b32.xlu0 %v5673_v13, %s6035_s1  ;;  %4143 = vmatpush.xpose.msk.msra.mxu3 %vm275_vm14, %v5673_v13 }
0x1552   :  { %v2689_v42 = vsel %vm97_vm0, %v2687_v10, 0.0 }
0x1553   :  { %2690 = vadd.xlane.f32.xlu2 %v2689_v42  ;;  %v2682_v43 = vpop.xlane.xlu0 %2681 }
0x1554   :  { %v2684_v25 = vmul.f32 %v2682_v43, %v4925_v19 }
0x1556   :  { %v5645_v24 = vsub.f32 %v5632_v47, %v2684_v25 }
0x1558   :  { %v2688_v45 = vmul.f32 %v5645_v24, %v5645_v24  ;;  %v2757_v43 = vmul.f32 %v4544_v20, %v5645_v24  ;;  %v5679_v24 = vpop.f32.mrf.mxu2 }
0x1559   :  { %2854 = vrot.lane.b32.xlu0 %v5679_v24, %s6034_s3  ;;  %4145 = vmatpush.xpose.msk.msrb.mxu3 %vm275_vm14, %v5679_v24 }
0x155a   :  { %v2692_v36 = vsel %vm97_vm0, %v2688_v45, 0.0 }
0x155b   :  { %2693 = vadd.xlane.f32.xlu1 %v2692_v36  ;;  %v4545_v36 = vld [vmem:[%s5968_s11 + $0x1] ss:$0 sm:$0xff] }
0x156b   :  { %2858 = vrot.lane.b32.xlu2 %v5679_v24, %s6035_s1 }
0x1573   :  { %2852 = vrot.lane.b32.xlu2 %v5673_v13, %s6034_s3 }
0x15c6   :  { %v2691_v0 = vpop.xlane.xlu2 %2690 }
0x15c7   :  { %v2695_v50 = vmul.f32 0.032258064, %v2691_v0 }
0x15c9   :  { %4682 = vrsqrt.f32 %v2695_v50  ;;  %vm2704_vm10 = vcmp.eq.f32.partialorder %v2695_v50, inf  ;;  %v2707_v60 = vand.u32 2147483648, %v2695_v50  ;;  %vm2706_vm12 = vcmp.eq.f32.partialorder %v2695_v50, 0.0 }
0x15ce   :  { %v2694_v53 = vpop.xlane.xlu1 %2693 }
0x15cf   :  { %v4683_v58 = vpop.eup %4682  ;;  %v2696_v51 = vmul.f32 0.032258064, %v2694_v53 }
0x15d0   :  { %v2698_v30 = vmul.f32 %v4683_v58, %v2695_v50 }
0x15d1   :  { %4684 = vrsqrt.f32 %v2696_v51  ;;  %vm2716_vm13 = vcmp.eq.f32.partialorder %v2696_v51, inf  ;;  %v2719_v6 = vand.u32 2147483648, %v2696_v51  ;;  %vm2718_vm3 = vcmp.eq.f32.partialorder %v2696_v51, 0.0 }
0x15d2   :  { %v2699_v32 = vmul.f32 %v4683_v58, %v2698_v30  ;;  %v5709_v30 = vpop.permute.xlu0 %2856 }
0x15d3   :  { %4151 = vmatpush.xpose.msk.msra.mxu2 %vm275_vm14, %v5709_v30 }
0x15d4   :  { %v2700_v34 = vmul.f32 0.5, %v2699_v32 }
0x15d6   :  { %v2701_v61 = vsub.f32 1.5, %v2700_v34 }
0x15d7   :  { %v4685_v57 = vpop.eup %4684 }
0x15d8   :  { %v2702_v62 = vmul.f32 %v4683_v58, %v2701_v61  ;;  %v2710_v63 = vmul.f32 %v4685_v57, %v2696_v51  ;;  %v5701_v58 = vpop.permute.xlu2 %2858 }
0x15d9   :  { %v4494_v32 = vpack.i.bf16 %v5701_v58, %v5709_v30 }
0x15da   :  { %v2703_v22 = vmul.f32 %v2702_v62, %v2695_v50  ;;  %v2711_v59 = vmul.f32 %v4685_v57, %v2710_v63  ;;  %v5715_v34 = vpop.permute.xlu0 %2854 }
0x15db   :  { %4149 = vmatpush.xpose.msk.msrb.mxu1 %vm275_vm14, %v5715_v34 }
0x15dc   :  { %v2705_v1 = vsel %vm2704_vm10, %v2695_v50, %v2703_v22  ;;  %v2712_v2 = vmul.f32 0.5, %v2711_v59 }
0x15dd   :  { %v2708_v29 = vsel %vm2706_vm12, %v2707_v60, %v2705_v1 }
0x15de   :  { %v2721_v11 = vadd.f32 1e-06, %v2708_v29  ;;  %v2713_v55 = vsub.f32 1.5, %v2712_v2 }
0x15e0   :  { %4686 = vrcp.f32 %v2721_v11  ;;  %v2714_v4 = vmul.f32 %v4685_v57, %v2713_v55  ;;  %v2734_v48 = vand.u32 2147483648, %v2721_v11  ;;  %vm2728_vm5 = vweird.f32 %v2721_v11 }
0x15e1   :  { %v2732_v49 = vand.u32 2147483647, %v2721_v11 }
0x15e2   :  { %v2715_v5 = vmul.f32 %v2714_v4, %v2696_v51  ;;  %v2735_v33 = vor.u32 1.1754944e-38, %v2734_v48 }
0x15e3   :  { %vm2733_vm10 = vcmp.eq.f32.partialorder %v2732_v49, 8.507059e+37 }
0x15e4   :  { %v2717_v8 = vsel %vm2716_vm13, %v2696_v51, %v2715_v5  ;;  %v5705_v51 = vpop.permute.xlu2 %2852 }
0x15e5   :  { %v2720_v12 = vsel %vm2718_vm3, %v2719_v6, %v2717_v8  ;;  %4147 = vmatpush.xpose.msk.msra.mxu0 %vm275_vm14, %v5705_v51 }
0x15e6   :  { %v4687_v41 = vpop.eup %4686  ;;  %v2722_v7 = vadd.f32 1e-06, %v2720_v12 }
0x15e7   :  { %v2724_v14 = vmul.f32 %v4687_v41, %v2721_v11  ;;  %vm2729_vm4 = vweird.f32 %v4687_v41 }
0x15e8   :  { %4688 = vrcp.f32 %v2722_v7  ;;  %vm2730_vm2 = vmor %vm2728_vm5, %vm2729_vm4  ;;  %v2749_v35 = vand.u32 2147483648, %v2722_v7  ;;  %v2747_v39 = vand.u32 2147483647, %v2722_v7  ;;  %vm2743_vm13 = vweird.f32 %v2722_v7 }
0x15e9   :  { %v2725_v27 = vsub.f32 1.0, %v2724_v14 }
0x15ea   :  { %v2750_v42 = vor.u32 1.1754944e-38, %v2749_v35  ;;  %vm2748_vm4 = vcmp.eq.f32.partialorder %v2747_v39, 8.507059e+37 }
0x15eb   :  { %v2726_v38 = vmul.f32 %v4687_v41, %v2725_v27 }
0x15ed   :  { %v2727_v15 = vadd.f32 %v4687_v41, %v2726_v38 }
0x15ee   :  { %v4689_v17 = vpop.eup %4688 }
0x15ef   :  { %v2739_v18 = vmul.f32 %v4689_v17, %v2722_v7  ;;  %v2731_v21 = vsel %vm2730_vm2, %v4687_v41, %v2727_v15  ;;  %vm2744_vm12 = vweird.f32 %v4689_v17 }
0x15f0   :  { %v2736_v40 = vsel %vm2733_vm10, %v2735_v33, %v2731_v21  ;;  %vm2745_vm3 = vmor %vm2743_vm13, %vm2744_vm12 }
0x15f1   :  { %v2740_v26 = vsub.f32 1.0, %v2739_v18  ;;  %v2758_v45 = vmul.f32 %v2756_v23, %v2736_v40 }
0x15f3   :  { %v2741_v37 = vmul.f32 %v4689_v17, %v2740_v26  ;;  %v2763_v0 = vadd.f32 %v4545_v36, %v2758_v45  ;;  %v4484_v26 = vpack.i.bf16 %v5679_v24, %v5673_v13 }
0x15f5   :  { %v2742_v10 = vadd.f32 %v4689_v17, %v2741_v37 }
0x15f7   :  { %v2746_v25 = vsel %vm2745_vm3, %v4689_v17, %v2742_v10 }
0x15f8   :  { %v2751_v46 = vsel %vm2748_vm4, %v2750_v42, %v2746_v25 }
0x15f9   :  { %v2759_v16 = vmul.f32 %v2757_v43, %v2751_v46 }
0x15fb   :  { %v2764_v50 = vadd.f32 %v4545_v36, %v2759_v16 }
0x15fd   :  { %v2765_v28 = vpack.c.bf16 %v2764_v50, %v2763_v0 }
0x15ff   :  { %4125 = vmatmul.msk.bf16.vlgmr.msra.gmra.mxu1 %vm97_vm0, %v2765_v28 }
0x167c   :  { %v2795_v52 = vpop.f32.mrf.mxu1 }
0x167d   :  { %2842 = vrot.lane.b32.xlu1 %v2795_v52, %s6035_s1  ;;  %4144 = vmatmul.msk.f32.vlgmr.msra.gmra.mxu3 %vm275_vm14, %v2795_v52 }
0x167e   :  { %4153 = vmatpush.xpose.msk.msra.mxu3 %vm275_vm14, %v5701_v58 }
0x1684   :  { %v2797_v53 = vpop.f32.mrf.mxu1 }
0x1685   :  { %2838 = vrot.lane.b32.xlu1 %v2795_v52, %s6034_s3  ;;  %2844 = vrot.lane.b32.xlu0 %v2797_v53, %s6035_s1 }
0x1686   :  { %2840 = vrot.lane.b32.xlu2 %v2797_v53, %s6034_s3  ;;  %4146 = vmatmul.msk.f32.vlgmr.msrb.gmra.mxu3 %vm275_vm14, %v2797_v53  ;;  %s4776_s3 = smov [#allocation2]  }
0x168d   :  { %2862 = vrot.lane.b32.xlu1 %v5679_v24, %s6033_s28  ;;  %2860 = vrot.lane.b32.xlu0 %v5673_v13, %s6033_s28 }
0x168e   :  { %2846 = vrot.lane.b32.xlu2 %v2795_v52, %s6033_s28 }
0x1695   :  { %2848 = vrot.lane.b32.xlu0 %v2797_v53, %s6033_s28 }
0x16e0   :  { %v2841_v61 = vpop.permute.xlu2 %2840 }
0x16e1   :  { %4150 = vmatmul.msk.f32.vlgmr.msrb.gmra.mxu1 %vm275_vm14, %v2841_v61 }
0x16e8   :  { %v2847_v2 = vpop.permute.xlu2 %2846 }
0x16ef   :  { %v2843_v57 = vpop.permute.xlu1 %2842 }
0x16f0   :  { %4152 = vmatmul.msk.f32.vlgmr.msra.gmra.mxu2 %vm275_vm14, %v2843_v57 }
0x16f7   :  { %v2839_v62 = vpop.permute.xlu1 %2838  ;;  %v2845_v63 = vpop.permute.xlu0 %2844 }
0x16f8   :  { %4148 = vmatmul.msk.f32.vlgmr.msra.gmra.mxu0 %vm275_vm14, %v2839_v62  ;;  %4154 = vmatmul.msk.f32.vlgmr.msra.gmra.mxu3 %vm275_vm14, %v2845_v63 }
0x16ff   :  { %v5723_v22 = vpop.permute.xlu1 %2862  ;;  %v5725_v59 = vpop.permute.xlu0 %2860 }
0x1700   :  { %v2885_v60 = vpop.f32.mrf.mxu3  ;;  %4155 = vmatpush.xpose.msk.msrb.mxu0 %vm275_vm14, %v5725_v59  ;;  %4157 = vmatpush.xpose.msk.msra.mxu1 %vm275_vm14, %v5723_v22  ;;  %v4499_v28 = vpack.i.bf16 %v5723_v22, %v5725_v59 }
0x1701   :  { %v3056_v1 = vsel %vm275_vm14, %v2885_v60, -inf }
0x1702   :  { %3057 = vmax.xlane.f32.xlu1 %v3056_v1 }
0x1703   :  { %4156 = vmatmul.msk.f32.vlgmr.msrb.gmra.mxu0 %vm275_vm14, %v2847_v2 }
0x1707   :  { %v2849_v29 = vpop.permute.xlu0 %2848 }
0x1708   :  { %4158 = vmatmul.msk.f32.vlgmr.msra.gmra.mxu1 %vm275_vm14, %v2849_v29 }
0x1709   :  { %v2909_v11 = vpop.f32.mrf.mxu3 }
0x170a   :  { %v3059_v55 = vsel %vm275_vm14, %v2909_v11, -inf }
0x170b   :  { %3060 = vmax.xlane.f32.xlu2 %v3059_v55 }
0x175e   :  { %v2957_v4 = vpop.f32.mrf.mxu1 }
0x175f   :  { %v3065_v5 = vsel %vm275_vm14, %v2957_v4, -inf }
0x1760   :  { %3066 = vmax.xlane.f32.xlu1 %v3065_v5 }
0x1773   :  { %v2981_v6 = vpop.f32.mrf.mxu2 }
0x1774   :  { %v3068_v8 = vsel %vm275_vm14, %v2981_v6, -inf }
0x1775   :  { %v2933_v12 = vpop.f32.mrf.mxu0  ;;  %3069 = vmax.xlane.f32.xlu2 %v3068_v8  ;;  %v3058_v33 = vpop.xlane.xlu1 %3057 }
0x1776   :  { %v3062_v41 = vsel %vm275_vm14, %v2933_v12, -inf  ;;  %v3080_v35 = vsub.f32 %v2885_v60, %v3058_v33 }
0x1777   :  { %3063 = vmax.xlane.f32.xlu0 %v3062_v41 }
0x1778   :  { %v3088_v37 = vmul.f32 1.442695, %v3080_v35 }
0x177b   :  { %v3005_v7 = vpop.f32.mrf.mxu3 }
0x177c   :  { %v3071_v27 = vsel %vm275_vm14, %v3005_v7, -inf }
0x177e   :  { %v3061_v14 = vpop.xlane.xlu2 %3060 }
0x177f   :  { %v3081_v38 = vsub.f32 %v2909_v11, %v3061_v14  ;;  %3072 = vmax.xlane.f32.xlu0 %v3071_v27 }
0x1780   :  { %v3029_v15 = vpop.f32.mrf.mxu0 }
0x1781   :  { %v3090_v17 = vmul.f32 1.442695, %v3081_v38  ;;  %v3074_v48 = vsel %vm275_vm14, %v3029_v15, -inf  ;;  %v4489_v38 = vpack.i.bf16 %v5715_v34, %v5705_v51 }
0x1782   :  { %3075 = vmax.xlane.f32.xlu1 %v3074_v48 }
0x1783   :  { %4690 = vpow2.f32 %v3090_v17 }
0x1784   :  { %4692 = vpow2.f32 %v3088_v37 }
0x1785   :  { %v3053_v49 = vpop.f32.mrf.mxu1 }
0x1786   :  { %v3077_v18 = vsel %vm275_vm14, %v3053_v49, -inf }
0x1787   :  { %3078 = vmax.xlane.f32.xlu2 %v3077_v18 }
0x1789   :  { %v4691_v20 = vpop.eup %4690 }
0x178a   :  { %v3107_v21 = vsel %vm275_vm14, %v4691_v20, 0.0  ;;  %v5745_v39 = vpop.eup %4692 }
0x178b   :  { %3108 = vadd.xlane.f32.xlu1 %v3107_v21  ;;  %v3104_v40 = vsel %vm275_vm14, %v5745_v39, 0.0 }
0x1793   :  { %4485 = vrot.lane.b32.xlu0 %v4484_v26, %s6027_s4 }
0x17bd   :  { %3105 = vadd.xlane.f32.xlu0 %v3104_v40 }
0x17d3   :  { %v3067_v23 = vpop.xlane.xlu1 %3066 }
0x17d4   :  { %v3083_v10 = vsub.f32 %v2957_v4, %v3067_v23 }
0x17d6   :  { %v3094_v42 = vmul.f32 1.442695, %v3083_v10 }
0x17d8   :  { %4694 = vpow2.f32 %v3094_v42 }
0x17de   :  { %v5749_v43 = vpop.eup %4694 }
0x17df   :  { %v3113_v25 = vsel %vm275_vm14, %v5749_v43, 0.0 }
0x17e0   :  { %3114 = vadd.xlane.f32.xlu0 %v3113_v25 }
0x17e8   :  { %v3070_v45 = vpop.xlane.xlu2 %3069 }
0x17e9   :  { %v3084_v36 = vsub.f32 %v2981_v6, %v3070_v45 }
0x17ea   :  { %v3064_v46 = vpop.xlane.xlu0 %3063 }
0x17eb   :  { %v3096_v16 = vmul.f32 1.442695, %v3084_v36  ;;  %v3082_v0 = vsub.f32 %v2933_v12, %v3064_v46 }
0x17ed   :  { %4696 = vpow2.f32 %v3096_v16  ;;  %v3092_v50 = vmul.f32 1.442695, %v3082_v0 }
0x17ef   :  { %4698 = vpow2.f32 %v3092_v50 }
0x17f2   :  { %v3073_v13 = vpop.xlane.xlu0 %3072 }
0x17f3   :  { %v4697_v24 = vpop.eup %4696  ;;  %v3085_v52 = vsub.f32 %v3005_v7, %v3073_v13 }
0x17f4   :  { %4500 = vrot.lane.b32.xlu0 %v4499_v28, %s6027_s4  ;;  %v3116_v53 = vsel %vm275_vm14, %v4697_v24, 0.0 }
0x17f5   :  { %v5757_v61 = vpop.eup %4698  ;;  %v3098_v57 = vmul.f32 1.442695, %v3085_v52  ;;  %v3076_v62 = vpop.xlane.xlu1 %3075  ;;  %3117 = vadd.xlane.f32.xlu1 %v3116_v53 }
0x17f6   :  { %v3086_v63 = vsub.f32 %v3029_v15, %v3076_v62  ;;  %v3110_v60 = vsel %vm275_vm14, %v5757_v61, 0.0 }
0x17f7   :  { %4700 = vpow2.f32 %v3098_v57  ;;  %3111 = vadd.xlane.f32.xlu2 %v3110_v60 }
0x17f8   :  { %v3100_v1 = vmul.f32 1.442695, %v3086_v63 }
0x17fa   :  { %4702 = vpow2.f32 %v3100_v1  ;;  %v3079_v22 = vpop.xlane.xlu2 %3078 }
0x17fb   :  { %v3087_v59 = vsub.f32 %v3053_v49, %v3079_v22 }
0x17fd   :  { %v4701_v2 = vpop.eup %4700  ;;  %v3102_v29 = vmul.f32 1.442695, %v3087_v59  ;;  %v4329_v59 = vld [vmem:[%s5971_s14 + $0x18] sm:$0xff] }
0x17fe   :  { %v3109_v11 = vpop.xlane.xlu1 %3108  ;;  %v3119_v55 = vsel %vm275_vm14, %v4701_v2, 0.0 }
0x17ff   :  { %4704 = vpow2.f32 %v3102_v29  ;;  %3120 = vadd.xlane.f32.xlu2 %v3119_v55 }
0x1800   :  { %v5762_v4 = vpop.eup %4702  ;;  %4706 = vrcp.f32 %v3109_v11 }
0x1801   :  { %v3122_v5 = vsel %vm275_vm14, %v5762_v4, 0.0 }
0x1802   :  { %3123 = vadd.xlane.f32.xlu1 %v3122_v5 }
0x1805   :  { %v4705_v6 = vpop.eup %4704  ;;  %v4486_v8 = vpop.permute.xlu0 %4485 }
0x1806   :  { %v4707_v12 = vpop.eup %4706  ;;  %v4488_v41 = vunpack.i.h.bf16 %v4486_v8  ;;  %v4487_v7 = vunpack.i.l.bf16 %v4486_v8  ;;  %v3125_v14 = vsel %vm275_vm14, %v4705_v6, 0.0 }
0x1807   :  { %v3137_v27 = vmul.f32 %v4707_v12, %v4691_v20  ;;  %3126 = vadd.xlane.f32.xlu2 %v3125_v14 }
0x1808   :  { %3165 = vmatpush.msrb.mxu2 %v4487_v7  ;;  %3191 = vmatpush.msrb.mxu3 %v4488_v41 }
0x1809   :  { %4160 = vmatmul.msk.f32.vlgmr.msrb.gmra.mxu3 %vm275_vm14, %v3137_v27 }
0x181b   :  { %4490 = vrot.lane.b32.xlu1 %v4489_v38, %s6027_s4 }
0x181f   :  { %4495 = vrot.lane.b32.xlu2 %v4494_v32, %s6027_s4  ;;  %s6047_s4 = sld [smem:[#allocation15_spill]] }
0x1825   :  { %s3871_s28 = sshll.u32 %s6047_s4, 4  ;;  %s3872_s28 = int_to_ptr.hbm [resolvable:$true] %s3871_s28 }
0x1830   :  { %v3106_v15 = vpop.xlane.xlu0 %3105 }
0x1831   :  { %4708 = vrcp.f32 %v3106_v15 }
0x1837   :  { %v4709_v17 = vpop.eup %4708 }
0x1838   :  { %v3136_v48 = vmul.f32 %v4709_v17, %v5745_v39 }
0x183a   :  { %4159 = vmatmul.msk.f32.vlgmr.msrb.gmra.mxu2 %vm275_vm14, %v3136_v48 }
0x1853   :  { %v3115_v26 = vpop.xlane.xlu0 %3114 }
0x1866   :  { %v4501_v23 = vpop.permute.xlu0 %4500 }
0x1867   :  { %v4503_v46 = vunpack.i.h.bf16 %v4501_v23  ;;  %v4502_v16 = vunpack.i.l.bf16 %v4501_v23 }
0x1868   :  { %v3118_v20 = vpop.xlane.xlu1 %3117 }
0x1869   :  { %4710 = vrcp.f32 %v3118_v20 }
0x186a   :  { %v3112_v49 = vpop.xlane.xlu2 %3111 }
0x186f   :  { %v4711_v51 = vpop.eup %4710 }
0x1870   :  { %v3140_v30 = vmul.f32 %v4711_v51, %v4697_v24 }
0x1872   :  { %v3121_v18 = vpop.xlane.xlu2 %3120 }
0x1873   :  { %4712 = vrcp.f32 %v3121_v18 }
0x1874   :  { %4714 = vrcp.f32 %v3115_v26 }
0x1875   :  { %v3124_v37 = vpop.xlane.xlu1 %3123  ;;  %4716 = vrcp.f32 %v3112_v49 }
0x1876   :  { %4718 = vrcp.f32 %v3124_v37 }
0x1879   :  { %v4713_v34 = vpop.eup %4712 }
0x187a   :  { %v3127_v21 = vpop.xlane.xlu2 %3126  ;;  %v3141_v32 = vmul.f32 %v4713_v34, %v4701_v2  ;;  %v4715_v39 = vpop.eup %4714  ;;  %v4328_v2 = vld [vmem:[%s5971_s14 + $0x10] sm:$0xff]  ;;  %s3869_s14 = sshll.u32 %s4776_s3, 4  ;;  %s3870_s14 = int_to_ptr.vmem [resolvable:$true] %s3869_s14 }
0x187b   :  { %v4717_v40 = vpop.eup %4716  ;;  %4720 = vrcp.f32 %v3127_v21  ;;  %v3139_v45 = vmul.f32 %v4715_v39, %v5749_v43 }
0x187c   :  { %v3138_v36 = vmul.f32 %v4717_v40, %v5757_v61  ;;  %v4719_v0 = vpop.eup %4718 }
0x187d   :  { %v3142_v28 = vmul.f32 %v4719_v0, %v5762_v4 }
0x1881   :  { %v4721_v50 = vpop.eup %4720 }
0x1882   :  { %v4496_v33 = vpop.permute.xlu2 %4495  ;;  %v3143_v13 = vmul.f32 %v4721_v50, %v4705_v6 }
0x1883   :  { %v4498_v35 = vunpack.i.h.bf16 %v4496_v33  ;;  %v4497_v58 = vunpack.i.l.bf16 %v4496_v33 }
0x1885   :  { %3269 = vmatpush.msra.mxu2 %v4497_v58  ;;  %3295 = vmatpush.msra.mxu3 %v4498_v35 }
0x1886   :  { %4163 = vmatmul.msk.f32.vlgmr.msra.gmra.mxu2 %vm275_vm14, %v3140_v30  ;;  %4164 = vmatmul.msk.f32.vlgmr.msra.gmra.mxu3 %vm275_vm14, %v3141_v32 }
0x1887   :  { %3404 = vmatpush.bf16.msrb.mxu2 %v4329_v59 }
0x188b   :  { %3405 = vmatpush.bf16.msrb.mxu2 %v4328_v2 }
0x188c   :  { %v3193_v43 = vpop.f32.mrf.mxu3 }
0x188d   :  { %v4491_v10 = vpop.permute.xlu1 %4490 }
0x188e   :  { %v4493_v42 = vunpack.i.h.bf16 %v4491_v10  ;;  %v4492_v25 = vunpack.i.l.bf16 %v4491_v10 }
0x1890   :  { %3217 = vmatpush.msra.mxu0 %v4492_v25  ;;  %3243 = vmatpush.msrb.mxu1 %v4493_v42 }
0x1891   :  { %4161 = vmatmul.msk.f32.vlgmr.msra.gmra.mxu0 %vm275_vm14, %v3138_v36  ;;  %4162 = vmatmul.msk.f32.vlgmr.msrb.gmra.mxu1 %vm275_vm14, %v3139_v45 }
0x1892   :  { %3321 = vmatpush.msrb.mxu0 %v4502_v16  ;;  %3347 = vmatpush.msra.mxu1 %v4503_v46 }
0x1899   :  { %4165 = vmatmul.msk.f32.vlgmr.msrb.gmra.mxu0 %vm275_vm14, %v3142_v28  ;;  %4166 = vmatmul.msk.f32.vlgmr.msra.gmra.mxu1 %vm275_vm14, %v3143_v13 }
0x18bd   :  { %v3167_v24 = vpop.f32.mrf.mxu2 }
0x1909   :  { %v3271_v57 = vpop.f32.mrf.mxu2  ;;  %v3297_v62 = vpop.f32.mrf.mxu3 }
0x190a   :  { %v4509_v1 = vpack.i.bf16 %v3297_v62, %v3271_v57 }
0x190e   :  { %v3219_v52 = vpop.f32.mrf.mxu0  ;;  %v3245_v53 = vpop.f32.mrf.mxu1 }
0x190f   :  { %v4504_v61 = vpack.i.bf16 %v3245_v53, %v3219_v52 }
0x1911   :  { %4505 = vrot.lane.b32.xlu0 %v4504_v61, %s6028_s2 }
0x1916   :  { %v3323_v63 = vpop.f32.mrf.mxu0  ;;  %v3349_v60 = vpop.f32.mrf.mxu1 }
0x1917   :  { %v4514_v22 = vpack.i.bf16 %v3349_v60, %v3323_v63 }
0x1919   :  { %4515 = vrot.lane.b32.xlu2 %v4514_v22, %s6029_s6  ;;  %4510 = vrot.lane.b32.xlu0 %v4509_v1, %s6030_s0  ;;  %s4777_s6 = smov 128  }
0x1973   :  { %v4516_v4 = vpop.permute.xlu2 %4515 }
0x1974   :  { %v4518_v12 = vunpack.i.h.bf16 %v4516_v4  ;;  %v4517_v41 = vunpack.i.l.bf16 %v4516_v4 }
0x1983   :  { %v4506_v29 = vpop.permute.xlu0 %4505 }
0x1984   :  { %v4508_v11 = vunpack.i.h.bf16 %v4506_v29  ;;  %v4507_v55 = vunpack.i.l.bf16 %v4506_v29 }
0x1986   :  { %v3376_v7 = vsel %vm275_vm14, %v3167_v24, %v4507_v55  ;;  %v3377_v14 = vsel %vm275_vm14, %v3193_v43, %v4508_v11 }
0x198b   :  { %v4511_v5 = vpop.permute.xlu0 %4510 }
0x198c   :  { %v4513_v6 = vunpack.i.h.bf16 %v4511_v5  ;;  %v4512_v8 = vunpack.i.l.bf16 %v4511_v5 }
0x198e   :  { %v3379_v27 = vsel %vm804_vm15, %v3377_v14, %v4513_v6  ;;  %v3378_v38 = vsel %vm804_vm15, %v3376_v7, %v4512_v8 }
0x198f   :  { %v3381_v15 = vsel %vm807_vm1, %v3379_v27, %v4518_v12  ;;  %v3380_v17 = vsel %vm807_vm1, %v3378_v38, %v4517_v41  ;;  %v4546_v41 = vld [vmem:[%s5972_s15 + $0x1] ss:$0 sm:$0xff]  ;;  %s6036_s15 = smov 32  }
0x1990   :  { %v3382_v48 = vpack.c.bf16 %v3381_v15, %v3380_v17 }
0x1992   :  { %4175 = vmatmul.msk.bf16.vlgmr.msrb.gmra.mxu2 %vm97_vm0, %v3382_v48 }
0x1a15   :  { %v3407_v49 = vpop.f32.mrf.mxu2 }
0x1a16   :  { %v5803_v18 = vadd.f32 %v3407_v49, %v5627_v44 }
0x1a18   :  { %v3418_v20 = vsel %vm97_vm0, %v5803_v18, 0.0 }
0x1a19   :  { %3419 = vadd.xlane.f32.xlu1 %v3418_v20 }
0x1a1d   :  { %v3409_v21 = vpop.f32.mrf.mxu2 }
0x1a1e   :  { %v5808_v51 = vadd.f32 %v3409_v21, %v5632_v47 }
0x1a20   :  { %v3421_v34 = vsel %vm97_vm0, %v5808_v51, 0.0 }
0x1a21   :  { %3422 = vadd.xlane.f32.xlu0 %v3421_v34  ;;  %v4547_v34 = vld [vmem:[%s5973_s16 + $0x1] ss:$0 sm:$0xff] }
0x1a8c   :  { %v3420_v26 = vpop.xlane.xlu1 %3419 }
0x1a8d   :  { %v3424_v33 = vmul.f32 %v3420_v26, %v4925_v19 }
0x1a8f   :  { %v3426_v35 = vsub.f32 %v5803_v18, %v3424_v33 }
0x1a91   :  { %v3428_v58 = vmul.f32 %v3426_v35, %v3426_v35  ;;  %v3497_v17 = vmul.f32 %v4546_v41, %v3426_v35 }
0x1a93   :  { %v3430_v44 = vsel %vm97_vm0, %v3428_v58, 0.0 }
0x1a94   :  { %3431 = vadd.xlane.f32.xlu2 %v3430_v44  ;;  %v3423_v30 = vpop.xlane.xlu0 %3422 }
0x1a95   :  { %v3425_v32 = vmul.f32 %v3423_v30, %v4925_v19 }
0x1a97   :  { %v5817_v37 = vsub.f32 %v5808_v51, %v3425_v32 }
0x1a99   :  { %v3429_v47 = vmul.f32 %v5817_v37, %v5817_v37  ;;  %v3498_v58 = vmul.f32 %v4546_v41, %v5817_v37  ;;  %v4342_v41 = vld [vmem:[%s5976_s19 + $0x90] sm:$0xff] }
0x1a9b   :  { %v3433_v39 = vsel %vm97_vm0, %v3429_v47, 0.0 }
0x1a9c   :  { %3434 = vadd.xlane.f32.xlu1 %v3433_v39 }
0x1b07   :  { %v3432_v40 = vpop.xlane.xlu2 %3431 }
0x1b08   :  { %v3436_v23 = vmul.f32 0.032258064, %v3432_v40 }
0x1b0a   :  { %4722 = vrsqrt.f32 %v3436_v23  ;;  %vm3445_vm14 = vcmp.eq.f32.partialorder %v3436_v23, inf  ;;  %v3448_v24 = vand.u32 2147483648, %v3436_v23  ;;  %vm3447_vm15 = vcmp.eq.f32.partialorder %v3436_v23, 0.0 }
0x1b0f   :  { %v3435_v10 = vpop.xlane.xlu1 %3434 }
0x1b10   :  { %v4723_v42 = vpop.eup %4722  ;;  %v3437_v25 = vmul.f32 0.032258064, %v3435_v10 }
0x1b11   :  { %v3439_v45 = vmul.f32 %v4723_v42, %v3436_v23 }
0x1b12   :  { %4724 = vrsqrt.f32 %v3437_v25  ;;  %vm3457_vm1 = vcmp.eq.f32.partialorder %v3437_v25, inf  ;;  %v3460_v1 = vand.u32 2147483648, %v3437_v25  ;;  %vm3459_vm5 = vcmp.eq.f32.partialorder %v3437_v25, 0.0 }
0x1b13   :  { %v3440_v36 = vmul.f32 %v4723_v42, %v3439_v45 }
0x1b15   :  { %v3441_v46 = vmul.f32 0.5, %v3440_v36 }
0x1b17   :  { %v3442_v16 = vsub.f32 1.5, %v3441_v46 }
0x1b18   :  { %v4725_v0 = vpop.eup %4724 }
0x1b19   :  { %v3443_v50 = vmul.f32 %v4723_v42, %v3442_v16  ;;  %v3451_v28 = vmul.f32 %v4725_v0, %v3437_v25 }
0x1b1b   :  { %v3444_v13 = vmul.f32 %v3443_v50, %v3436_v23  ;;  %v3452_v43 = vmul.f32 %v4725_v0, %v3451_v28  ;;  %v4335_v50 = vld [vmem:[%s5974_s17 + $0x58] sm:$0xff]  ;;  %v4334_v28 = vld [vmem:[%s5974_s17 + $0x50] sm:$0xff] }
0x1b1c   :  { %3598 = vmatpush.bf16.msrb.mxu3 %v4335_v50 }
0x1b1d   :  { %v3446_v52 = vsel %vm3445_vm14, %v3436_v23, %v3444_v13  ;;  %v3453_v53 = vmul.f32 0.5, %v3452_v43  ;;  %v4333_v13 = vld [vmem:[%s5974_s17 + $0x48] sm:$0xff]  ;;  %v4332_v43 = vld [vmem:[%s5974_s17 + $0x40] sm:$0xff] }
0x1b1e   :  { %v3449_v61 = vsel %vm3447_vm15, %v3448_v24, %v3446_v52  ;;  %v4331_v24 = vld [vmem:[%s5974_s17 + $0x38] sm:$0xff]  ;;  %v4330_v52 = vld [vmem:[%s5974_s17 + $0x30] sm:$0xff]  ;;  %s6045_s17 = sld [smem:[#allocation13_spill]] }
0x1b1f   :  { %v3462_v57 = vadd.f32 1e-06, %v3449_v61  ;;  %v3454_v62 = vsub.f32 1.5, %v3453_v53 }
0x1b20   :  { %3599 = vmatpush.bf16.msrb.mxu3 %v4334_v28 }
0x1b21   :  { %4726 = vrcp.f32 %v3462_v57  ;;  %v3455_v63 = vmul.f32 %v4725_v0, %v3454_v62  ;;  %v3475_v5 = vand.u32 2147483648, %v3462_v57  ;;  %v3473_v6 = vand.u32 2147483647, %v3462_v57 }
0x1b22   :  { %vm3469_vm10 = vweird.f32 %v3462_v57 }
0x1b23   :  { %v3456_v60 = vmul.f32 %v3455_v63, %v3437_v25  ;;  %v3476_v14 = vor.u32 1.1754944e-38, %v3475_v5  ;;  %vm3474_vm13 = vcmp.eq.f32.partialorder %v3473_v6, 8.507059e+37  ;;  %v4346_v5 = vld [vmem:[%s5976_s19 + $0xb0] sm:$0xff]  ;;  %v4345_v6 = vld [vmem:[%s5976_s19 + $0xa8] sm:$0xff] }
0x1b24   :  { %3600 = vmatpush.bf16.msrb.mxu3 %v4333_v13 }
0x1b25   :  { %v3458_v22 = vsel %vm3457_vm1, %v3437_v25, %v3456_v60  ;;  %vm6037_vm1 = vcmp.eq.s32.totalorder %v5363_v9, 1 }
0x1b26   :  { %v3461_v59 = vsel %vm3459_vm5, %v3460_v1, %v3458_v22  ;;  %vm6038_vm5 = vcmask 523264  }
0x1b27   :  { %v4727_v2 = vpop.eup %4726  ;;  %v3463_v29 = vadd.f32 1e-06, %v3461_v59 }
0x1b28   :  { %v3465_v11 = vmul.f32 %v4727_v2, %v3462_v57  ;;  %vm3470_vm2 = vweird.f32 %v4727_v2  ;;  %3601 = vmatpush.bf16.msrb.mxu3 %v4332_v43 }
0x1b29   :  { %4728 = vrcp.f32 %v3463_v29  ;;  %vm3471_vm12 = vmor %vm3469_vm10, %vm3470_vm2  ;;  %v3490_v48 = vand.u32 2147483648, %v3463_v29  ;;  %v3488_v20 = vand.u32 2147483647, %v3463_v29  ;;  %vm3484_vm4 = vweird.f32 %v3463_v29 }
0x1b2a   :  { %v3466_v55 = vsub.f32 1.0, %v3465_v11  ;;  %vm6039_vm2 = vmmov %vm6038_vm5  ;;  %vm6040_vm10 = vcmask 785408  }
0x1b2b   :  { %v3491_v33 = vor.u32 1.1754944e-38, %v3490_v48  ;;  %vm3489_vm15 = vcmp.eq.f32.partialorder %v3488_v20, 8.507059e+37  ;;  %v4338_v48 = vld [vmem:[%s5976_s19 + $0x70] sm:$0xff] }
0x1b2c   :  { %v3467_v4 = vmul.f32 %v4727_v2, %v3466_v55  ;;  %3602 = vmatpush.bf16.msrb.mxu3 %v4331_v24 }
0x1b2e   :  { %v3468_v8 = vadd.f32 %v4727_v2, %v3467_v4  ;;  %v4347_v4 = vld [vmem:[%s5976_s19 + $0xb8] sm:$0xff] }
0x1b2f   :  { %v4729_v12 = vpop.eup %4728  ;;  %3759 = vmatpush.bf16.msrb.mxu1 %v4347_v4 }
0x1b30   :  { %v3472_v7 = vsel %vm3471_vm12, %v4727_v2, %v3468_v8  ;;  %v3480_v27 = vmul.f32 %v4729_v12, %v3463_v29  ;;  %vm3485_vm3 = vweird.f32 %v4729_v12  ;;  %3603 = vmatpush.bf16.msrb.mxu3 %v4330_v52  ;;  %v4344_v8 = vld [vmem:[%s5976_s19 + $0xa0] sm:$0xff]  ;;  %vm6041_vm12 = vmmov %vm6039_vm2 }
0x1b31   :  { %v3477_v38 = vsel %vm3474_vm13, %v3476_v14, %v3472_v7  ;;  %vm3486_vm14 = vmor %vm3484_vm4, %vm3485_vm3  ;;  %v4341_v7 = vld [vmem:[%s5976_s19 + $0x88] sm:$0xff]  ;;  %v4340_v14 = vld [vmem:[%s5976_s19 + $0x80] sm:$0xff] }
0x1b32   :  { %v3481_v15 = vsub.f32 1.0, %v3480_v27  ;;  %v3499_v21 = vmul.f32 %v3497_v17, %v3477_v38  ;;  %v4548_v27 = vld [vmem:[%s5975_s18 + $0x1] ss:$0 sm:$0xff] }
0x1b33   :  { %3760 = vmatpush.bf16.msrb.mxu1 %v4346_v5 }
0x1b34   :  { %v3482_v49 = vmul.f32 %v4729_v12, %v3481_v15  ;;  %v3504_v32 = vadd.f32 %v4547_v34, %v3499_v21  ;;  %v4339_v15 = vld [vmem:[%s5976_s19 + $0x78] sm:$0xff] }
0x1b36   :  { %v3483_v26 = vadd.f32 %v4729_v12, %v3482_v49  ;;  %v3527_v39 = vrot.slane %v3504_v32, 7  ;;  %v3521_v10 = vrot.slane %v3504_v32, 6 }
0x1b37   :  { %3761 = vmatpush.bf16.msrb.mxu1 %v4345_v6 }
0x1b38   :  { %v3487_v44 = vsel %vm3486_vm14, %v4729_v12, %v3483_v26  ;;  %v4343_v12 = vld [vmem:[%s5976_s19 + $0x98] sm:$0xff] }
0x1b39   :  { %v3492_v30 = vsel %vm3489_vm15, %v3491_v33, %v3487_v44  ;;  %3741 = vmatpush.bf16.msra.mxu0 %v4343_v12 }
0x1b3a   :  { %v3500_v35 = vmul.f32 %v3498_v58, %v3492_v30 }
0x1b3b   :  { %3762 = vmatpush.bf16.msrb.mxu1 %v4344_v8 }
0x1b3c   :  { %v3505_v47 = vadd.f32 %v4547_v34, %v3500_v35  ;;  %v4337_v34 = vld [vmem:[%s5976_s19 + $0x68] sm:$0xff] }
0x1b3d   :  { %3742 = vmatpush.bf16.msra.mxu0 %v4342_v41 }
0x1b3e   :  { %v4524_v40 = vpack.i.bf16 %v3505_v47, %v3504_v32  ;;  %v3528_v23 = vrot.slane %v3505_v47, 7  ;;  %v3522_v42 = vrot.slane %v3505_v47, 6 }
0x1b40   :  { %4525 = vrot.lane.b32.xlu0 %v4524_v40, %s6032_s5  ;;  %v3529_v25 = vsel %vm1706_vm6, %v3527_v39, %v3528_v23  ;;  %v3530_v45 = vsel %vm1706_vm6, %v3528_v23, %v3527_v39  ;;  %v3523_v37 = vsel %vm1689_vm8, %v3521_v10, %v3522_v42  ;;  %v3524_v36 = vsel %vm1689_vm8, %v3522_v42, %v3521_v10 }
0x1b41   :  { %v3531_v46 = vsel %vm1717_vm9, %v3530_v45, 0.0  ;;  %v3532_v16 = vsel %vm1718_vm7, %v3529_v25, 0.0  ;;  %v3525_v63 = vsel %vm1700_vm11, %v3524_v36, 0.0  ;;  %v3526_v60 = vsel %vm6037_vm1, %v3523_v37, 0.0  ;;  %3743 = vmatpush.bf16.msra.mxu0 %v4341_v7  ;;  %v4336_v25 = vld [vmem:[%s5976_s19 + $0x60] sm:$0xff] }
0x1b42   :  { %v4519_v0 = vpack.i.bf16 %v3532_v16, %v3531_v46 }
0x1b44   :  { %4520 = vrot.lane.b32.xlu2 %v4519_v0, %s6036_s15  ;;  %v4549_v0 = vld [vmem:[%s5977_s20 + $0x1] ss:$0 sm:$0xff] }
0x1b45   :  { %3744 = vmatpush.bf16.msra.mxu0 %v4340_v14 }
0x1b49   :  { %3745 = vmatpush.bf16.msra.mxu0 %v4339_v15 }
0x1b4d   :  { %3746 = vmatpush.bf16.msra.mxu0 %v4338_v48 }
0x1b51   :  { %3747 = vmatpush.bf16.msra.mxu0 %v4337_v34 }
0x1b55   :  { %3748 = vmatpush.bf16.msra.mxu0 %v4336_v25  ;;  %v4550_v25 = vld [vmem:[%s6045_s17] ss:$0 sm:$0xff] }
0x1b9e   :  { %v4521_v53 = vpop.permute.xlu2 %4520 }
0x1b9f   :  { %v4523_v61 = vunpack.i.h.bf16 %v4521_v53  ;;  %v4522_v57 = vunpack.i.l.bf16 %v4521_v53 }
0x1ba1   :  { %v3549_v59 = vsel %vm97_vm0, %v3525_v63, %v4522_v57  ;;  %v3550_v2 = vsel %vm97_vm0, %v3526_v60, %v4523_v61 }
0x1bb2   :  { %v4526_v62 = vpop.permute.xlu0 %4525 }
0x1bb3   :  { %v4528_v1 = vunpack.i.h.bf16 %v4526_v62  ;;  %v4527_v22 = vunpack.i.l.bf16 %v4526_v62 }
0x1bb5   :  { %v3551_v29 = vsel %vm6038_vm5, %v3549_v59, %v4527_v22  ;;  %v3552_v11 = vsel %vm6039_vm2, %v3550_v2, %v4528_v1 }
0x1bb6   :  { %v3553_v55 = vpack.c.bf16 %v3552_v11, %v3551_v29 }
0x1bb8   :  { %4215 = vmatmul.msk.bf16.vlgmr.msrb.gmra.mxu3 %vm6040_vm10, %v3553_v55 }
0x1c3b   :  { %v3605_v38 = vpop.f32.mrf.mxu3 }
0x1c3c   :  { %v3606_v17 = vadd.f32 %v4548_v27, %v3605_v38 }
0x1c3e   :  { %v3610_v49 = vmax.f32 %v3606_v17, 0.0 }
0x1c40   :  { %v3639_v33 = vrot.slane %v3610_v49, 6  ;;  %v3645_v58 = vrot.slane %v3610_v49, 7 }
0x1c43   :  { %v3607_v20 = vpop.f32.mrf.mxu3 }
0x1c44   :  { %v3608_v21 = vadd.f32 %v4548_v27, %v3607_v20 }
0x1c46   :  { %v3611_v26 = vmax.f32 %v3608_v21, 0.0 }
0x1c48   :  { %v3640_v44 = vrot.slane %v3611_v26, 6  ;;  %v3646_v30 = vrot.slane %v3611_v26, 7  ;;  %v3662_v32 = vpack.c.bf16 %v3611_v26, %v3610_v49 }
0x1c4a   :  { %4289 = vmatmul.msk.bf16.vlgmr.msrb.gmra.mxu1 %vm6041_vm12, %v3662_v32  ;;  %v3647_v35 = vsel %vm1706_vm6, %v3645_v58, %v3646_v30  ;;  %v3648_v47 = vsel %vm1706_vm6, %v3646_v30, %v3645_v58  ;;  %v3641_v39 = vsel %vm1689_vm8, %v3639_v33, %v3640_v44  ;;  %v3642_v40 = vsel %vm1689_vm8, %v3640_v44, %v3639_v33  ;;  %vm6042_vm6 = vmmov %vm6037_vm1 }
0x1c4b   :  { %v3649_v23 = vsel %vm1717_vm9, %v3648_v47, 0.0  ;;  %v3650_v10 = vsel %vm1718_vm7, %v3647_v35, 0.0  ;;  %v3643_v3 = vsel %vm1700_vm11, %v3642_v40, 0.0  ;;  %v3644_v54 = vsel %vm6042_vm6, %v3641_v39, 0.0  ;;  %vm6043_vm8 = vmmov %vm6039_vm2 }
0x1c4c   :  { %v4529_v42 = vpack.i.bf16 %v3650_v10, %v3649_v23  ;;  %vm6044_vm7 = vmmov %vm6039_vm2 }
0x1c4e   :  { %4530 = vrot.lane.b32.xlu1 %v4529_v42, %s6032_s5 }
0x1cc0   :  { %v4531_v45 = vpop.permute.xlu1 %4530 }
0x1cc1   :  { %v4533_v37 = vunpack.i.h.bf16 %v4531_v45  ;;  %v4532_v36 = vunpack.i.l.bf16 %v4531_v45 }
0x1cc3   :  { %v3659_v56 = vsel %vm6043_vm8, %v3643_v3, %v4532_v36  ;;  %v3660_v46 = vsel %vm6044_vm7, %v3644_v54, %v4533_v37 }
0x1cc4   :  { %v3661_v16 = vpack.c.bf16 %v3660_v46, %v3659_v56 }
0x1cc6   :  { %3749 = vmatmul.bf16.vlgmr.msra.gmra.mxu0 %v3661_v16 }
0x1cc7   :  { %v3764_v50 = vpop.f32.mrf.mxu1 }
0x1ccf   :  { %v3766_v61 = vpop.f32.mrf.mxu1 }
0x1d43   :  { %v3750_v28 = vpop.f32.mrf.mxu0 }
0x1d44   :  { %v3751_v13 = vadd.f32 %v4549_v0, %v3750_v28 }
0x1d46   :  { %v3765_v43 = vadd.f32 %v3764_v50, %v3751_v13 }
0x1d48   :  { %v3769_v24 = vmax.f32 %v3765_v43, 0.0 }
0x1d4a   :  { %v3771_v31 = vadd.f32 %v3769_v24, %v5803_v18 }
0x1d4b   :  { %v3752_v52 = vpop.f32.mrf.mxu0 }
0x1d4c   :  { %v3753_v9 = vadd.f32 %v4549_v0, %v3752_v52  ;;  %v3775_v53 = vsel %vm97_vm0, %v3771_v31, 0.0  ;;  %v4551_v0 = vld [vmem:[%s6046_s10] ss:$0 sm:$0xff] }
0x1d4d   :  { %3776 = vadd.xlane.f32.xlu0 %v3775_v53 }
0x1d4e   :  { %v3767_v57 = vadd.f32 %v3766_v61, %v3753_v9 }
0x1d50   :  { %v3770_v62 = vmax.f32 %v3767_v57, 0.0 }
0x1d52   :  { %v3772_v63 = vadd.f32 %v3770_v62, %v5808_v51 }
0x1d54   :  { %v3778_v60 = vsel %vm97_vm0, %v3772_v63, 0.0 }
0x1d55   :  { %3779 = vadd.xlane.f32.xlu2 %v3778_v60 }
0x1dc0   :  { %v3777_v1 = vpop.xlane.xlu0 %3776 }
0x1dc1   :  { %v3781_v22 = vmul.f32 %v3777_v1, %v4925_v19 }
0x1dc3   :  { %v3783_v59 = vsub.f32 %v3771_v31, %v3781_v22 }
0x1dc5   :  { %v3785_v2 = vmul.f32 %v3783_v59, %v3783_v59  ;;  %v3854_v56 = vmul.f32 %v4550_v25, %v3783_v59 }
0x1dc7   :  { %v3787_v18 = vsel %vm97_vm0, %v3785_v2, 0.0 }
0x1dc8   :  { %v3780_v29 = vpop.xlane.xlu2 %3779  ;;  %3788 = vadd.xlane.f32.xlu1 %v3787_v18 }
0x1dc9   :  { %v3782_v11 = vmul.f32 %v3780_v29, %v4925_v19 }
0x1dcb   :  { %v5939_v55 = vsub.f32 %v3772_v63, %v3782_v11 }
0x1dcd   :  { %v3786_v4 = vmul.f32 %v5939_v55, %v5939_v55  ;;  %v3855_v61 = vmul.f32 %v4550_v25, %v5939_v55 }
0x1dcf   :  { %v3790_v51 = vsel %vm97_vm0, %v3786_v4, 0.0 }
0x1dd0   :  { %3791 = vadd.xlane.f32.xlu0 %v3790_v51 }
0x1e3b   :  { %v3789_v5 = vpop.xlane.xlu1 %3788 }
0x1e3c   :  { %v3793_v6 = vmul.f32 0.032258064, %v3789_v5 }
0x1e3e   :  { %4730 = vrsqrt.f32 %v3793_v6  ;;  %vm3802_vm9 = vcmp.eq.f32.partialorder %v3793_v6, inf  ;;  %v3805_v20 = vand.u32 2147483648, %v3793_v6  ;;  %vm3804_vm11 = vcmp.eq.f32.partialorder %v3793_v6, 0.0 }
0x1e43   :  { %v3792_v8 = vpop.xlane.xlu0 %3791 }
0x1e44   :  { %v4731_v12 = vpop.eup %4730  ;;  %v3794_v41 = vmul.f32 0.032258064, %v3792_v8 }
0x1e45   :  { %v3796_v7 = vmul.f32 %v4731_v12, %v3793_v6 }
0x1e46   :  { %4732 = vrsqrt.f32 %v3794_v41  ;;  %vm3814_vm13 = vcmp.eq.f32.partialorder %v3794_v41, inf  ;;  %v3817_v32 = vand.u32 2147483648, %v3794_v41  ;;  %vm3816_vm3 = vcmp.eq.f32.partialorder %v3794_v41, 0.0 }
0x1e47   :  { %v3797_v14 = vmul.f32 %v4731_v12, %v3796_v7 }
0x1e49   :  { %v3798_v27 = vmul.f32 0.5, %v3797_v14 }
0x1e4b   :  { %v3799_v38 = vsub.f32 1.5, %v3798_v27 }
0x1e4c   :  { %v4733_v19 = vpop.eup %4732 }
0x1e4d   :  { %v3800_v15 = vmul.f32 %v4731_v12, %v3799_v38  ;;  %v3808_v17 = vmul.f32 %v4733_v19, %v3794_v41 }
0x1e4f   :  { %v3801_v48 = vmul.f32 %v3800_v15, %v3793_v6  ;;  %v3809_v49 = vmul.f32 %v4733_v19, %v3808_v17 }
0x1e51   :  { %v3803_v21 = vsel %vm3802_vm9, %v3793_v6, %v3801_v48  ;;  %v3810_v34 = vmul.f32 0.5, %v3809_v49 }
0x1e52   :  { %v3806_v26 = vsel %vm3804_vm11, %v3805_v20, %v3803_v21 }
0x1e53   :  { %v3819_v33 = vadd.f32 1e-06, %v3806_v26  ;;  %v3811_v58 = vsub.f32 1.5, %v3810_v34 }
0x1e55   :  { %4734 = vrcp.f32 %v3819_v33  ;;  %v3812_v44 = vmul.f32 %v4733_v19, %v3811_v58  ;;  %v3832_v42 = vand.u32 2147483648, %v3819_v33  ;;  %v3830_v37 = vand.u32 2147483647, %v3819_v33 }
0x1e56   :  { %vm3826_vm14 = vweird.f32 %v3819_v33 }
0x1e57   :  { %v3813_v30 = vmul.f32 %v3812_v44, %v3794_v41  ;;  %v3833_v54 = vor.u32 1.1754944e-38, %v3832_v42  ;;  %vm3831_vm1 = vcmp.eq.f32.partialorder %v3830_v37, 8.507059e+37 }
0x1e59   :  { %v3815_v35 = vsel %vm3814_vm13, %v3794_v41, %v3813_v30 }
0x1e5a   :  { %v3818_v47 = vsel %vm3816_vm3, %v3817_v32, %v3815_v35 }
0x1e5b   :  { %v4735_v39 = vpop.eup %4734  ;;  %v3820_v40 = vadd.f32 1e-06, %v3818_v47 }
0x1e5c   :  { %v3822_v23 = vmul.f32 %v4735_v39, %v3819_v33  ;;  %vm3827_vm4 = vweird.f32 %v4735_v39 }
0x1e5d   :  { %4736 = vrcp.f32 %v3820_v40  ;;  %vm3828_vm15 = vmor %vm3826_vm14, %vm3827_vm4  ;;  %v3847_v43 = vand.u32 2147483648, %v3820_v40  ;;  %v3845_v31 = vand.u32 2147483647, %v3820_v40  ;;  %vm3841_vm2 = vweird.f32 %v3820_v40 }
0x1e5e   :  { %v3823_v10 = vsub.f32 1.0, %v3822_v23 }
0x1e5f   :  { %v3848_v53 = vor.u32 1.1754944e-38, %v3847_v43  ;;  %vm3846_vm12 = vcmp.eq.f32.partialorder %v3845_v31, 8.507059e+37 }
0x1e60   :  { %v3824_v45 = vmul.f32 %v4735_v39, %v3823_v10 }
0x1e62   :  { %v3825_v36 = vadd.f32 %v4735_v39, %v3824_v45 }
0x1e63   :  { %v4737_v3 = vpop.eup %4736 }
0x1e64   :  { %v3829_v46 = vsel %vm3828_vm15, %v4735_v39, %v3825_v36  ;;  %v3837_v16 = vmul.f32 %v4737_v3, %v3820_v40  ;;  %vm3842_vm5 = vweird.f32 %v4737_v3 }
0x1e65   :  { %v3834_v50 = vsel %vm3831_vm1, %v3833_v54, %v3829_v46  ;;  %vm3843_vm10 = vmor %vm3841_vm2, %vm3842_vm5 }
0x1e66   :  { %v3838_v28 = vsub.f32 1.0, %v3837_v16  ;;  %v3856_v13 = vmul.f32 %v3854_v56, %v3834_v50 }
0x1e68   :  { %v3839_v24 = vmul.f32 %v4737_v3, %v3838_v28  ;;  %v3861_v52 = vadd.f32 %v4551_v0, %v3856_v13 }
0x1e6a   :  { %v3840_v9 = vadd.f32 %v4737_v3, %v3839_v24  ;;  %3863 = vst.msk [vmem:[#allocation2] sm:$0xff] %vm97_vm0, %v3861_v52 }
0x1e6c   :  { %v3844_v57 = vsel %vm3843_vm10, %v4737_v3, %v3840_v9 }
0x1e6d   :  { %v3849_v62 = vsel %vm3846_vm12, %v3848_v53, %v3844_v57 }
0x1e6e   :  { %v3857_v63 = vmul.f32 %v3855_v61, %v3849_v62 }
0x1e70   :  { %v3862_v60 = vadd.f32 %v4551_v0, %v3857_v63 }
0x1e72   :  { %3864 = vst.msk [vmem:[#allocation2 + $0x8] sm:$0xff] %vm97_vm0, %v3862_v60 }
0x1e73   :  { %3877 = dma.vmem_to_hbm [thread:$0]  %s3870_s14, 256, %s3872_s28, [#allocation3], %s4777_s6, %s4777_s6, %s6028_s2  }
0x1e74   :  { %4763 = dma.done.wait [#allocation3], 256  }
0x1e75   :  { %4764 = vsyncadd [#allocation3], 4294967040 }
0x1e76   :  { %3882 = vsyncpa [#allocation3], 1 }

</bundles_post_ra>
